<compile_context>
chip_gen: v6e
topology: v6e:2x2x1
jax: 0.10.0
libtpu: 0.0.40
codegen_flags: <defaults>
</compile_context>

<pallas_src>
import functools

import jax
import jax.numpy as jnp
from jax.experimental import pallas as pl
from jax.experimental.pallas import tpu as pltpu


# ----------------------------------------------------------------------------
# Fused Pallas kernel: all residual blocks, one batch element per grid step.
# ----------------------------------------------------------------------------
def residual_stack_kernel(x_ref, w0_ref, w1_ref, wr_ref, br_ref, ws_ref, bs_ref,
                          skip_ref, *, dilations, skip_size):
    # x_ref:   (T, C)        one batch element, channels-last
    # w0/w1:   (L, C, C)     dilated-conv taps (pre-transposed to (Cin, Cout))
    # wr/br:   (L, C, C)/(L, 1, C)  conv_res with the PyTorch 2x quirk folded in
    # ws/bs:   (L, C, S)/(L, 1, S)  conv_skip
    # skip_ref:(L, S, skip_size)    skips already in the final (transposed) layout
    x = x_ref[...].astype(jnp.float32)

    # Static unroll over layers: dilations / shapes are compile-time constants,
    # the inter-layer activation never leaves VMEM/vregs.
    for l, d in enumerate(dilations):
        t_out = x.shape[0] - d

        # Dilated causal conv (kernel_size=2, no bias).  Matmul the full block
        # first and slice the f32 RESULTS afterwards, so the MXU consumes x in
        # its native (8,128) layout; the misaligned slices land on cheap VPU
        # add operands instead of the MXU input path.
        y0 = jnp.dot(x, w0_ref[l], preferred_element_type=jnp.float32)
        y1 = jnp.dot(x, w1_ref[l], preferred_element_type=jnp.float32)
        h = y0[:t_out, :] + y1[d:, :]

        # Gated activation tanh(h)*sigmoid(h) with a single EUP transcendental.
        e = jnp.exp(-jnp.abs(h))
        e2 = e * e
        gated = (1.0 - e2) * jnp.where(h >= 0, 1.0, -e) / ((1.0 + e2) * (1.0 + e))

        # Residual path: conv_res (+ bias); the PyTorch `x += x` doubling is
        # already folded into wr/br.  Becomes next layer's input.
        x = jnp.dot(gated, wr_ref[l], preferred_element_type=jnp.float32) + br_ref[l]

        # Skip path: only the last `skip_size` timesteps are kept, so only
        # those rows hit the MXU.  Emit directly as (S, skip_size) so the
        # wrapper needs no transpose/stack.
        g_tail = gated[t_out - skip_size:, :]
        skip = jnp.dot(g_tail, ws_ref[l], preferred_element_type=jnp.float32) + bs_ref[l]
        skip_ref[l] = jnp.transpose(skip, (1, 0)).astype(skip_ref.dtype)


# ----------------------------------------------------------------------------
# Wrapper: one pallas_call for the whole stack.
# ----------------------------------------------------------------------------
def residual_stack_forward(x, params, dilations, skip_size):
    """x: (B, T, C) channels-last.  `params` must have the 2x residual quirk
    already folded into wr/br (see fold_residual_double).
    Returns (num_blocks, B, skip_channels, skip_size), matching PyTorch's
    torch.stack(skip_connections) of NCT skips."""
    B, T, C = x.shape
    L = len(dilations)
    S = params["ws"].shape[-1]

    # Static guards: PyTorch silently mis-slices if these are violated.
    t = T
    for d in dilations:
        assert t > d, f"sequence length {t} too short for dilation {d}"
        t -= d
        assert t >= skip_size, (
            f"skip_size={skip_size} exceeds valid length {t} after dilation {d}")

    kernel = functools.partial(residual_stack_kernel,
                               dilations=tuple(dilations), skip_size=skip_size)

    skips = pl.pallas_call(
        kernel,
        out_shape=jax.ShapeDtypeStruct((L, B, S, skip_size), x.dtype),
        grid=(B,),
        in_specs=[
            pl.BlockSpec((None, T, C), lambda b: (b, 0, 0)),   # x, per-batch slice
            pl.BlockSpec((L, C, C), lambda b: (0, 0, 0)),      # w0 (all layers)
            pl.BlockSpec((L, C, C), lambda b: (0, 0, 0)),      # w1
            pl.BlockSpec((L, C, C), lambda b: (0, 0, 0)),      # wr (2x folded)
            pl.BlockSpec((L, 1, C), lambda b: (0, 0, 0)),      # br (2x folded)
            pl.BlockSpec((L, C, S), lambda b: (0, 0, 0)),      # ws
            pl.BlockSpec((L, 1, S), lambda b: (0, 0, 0)),      # bs
        ],
        out_specs=pl.BlockSpec((L, None, S, skip_size), lambda b: (0, b, 0, 0)),
        compiler_params=pltpu.CompilerParams(
            dimension_semantics=("parallel",)),   # batch axis feeds both v7x TCs
    )(x, params["w0"], params["w1"], params["wr"], params["br"],
      params["ws"], params["bs"])
    return skips


# ----------------------------------------------------------------------------
# Parameter init (raw, PyTorch-equivalent) and one-time 2x fold.
# ----------------------------------------------------------------------------
def init_residual_stack(key, layer_size, stack_size, res_channels, skip_channels):
    """Deterministic init.  Weights are stored stacked over layers and
    pre-transposed for channels-last matmuls: (L, C_in, C_out)."""
    L = layer_size * stack_size
    dilations = tuple(2 ** l for _ in range(stack_size) for l in range(layer_size))
    C, S = res_channels, skip_channels
    k = jax.random.split(key, 6)
    params = {
        # torch Conv1d(C, C, 2, dilation=d, bias=False).weight is (out,in,2);
        # stored here as two (C_in, C_out) taps per layer.
        "w0": 0.05 * jax.random.normal(k[0], (L, C, C), jnp.float32),
        "w1": 0.05 * jax.random.normal(k[1], (L, C, C), jnp.float32),
        # conv_res: Conv1d(C, C, 1) with bias.
        "wr": 0.05 * jax.random.normal(k[2], (L, C, C), jnp.float32),
        "br": 0.05 * jax.random.normal(k[3], (L, 1, C), jnp.float32),
        # conv_skip: Conv1d(C, S, 1) with bias.
        "ws": 0.05 * jax.random.normal(k[4], (L, C, S), jnp.float32),
        "bs": 0.05 * jax.random.normal(k[5], (L, 1, S), jnp.float32),
    }
    return params, dilations


def fold_residual_double(params):
    """Fold the PyTorch `x += x[:, :, -x.size(2):]` quirk (x = 2*conv_res(g))
    into conv_res weight/bias once, so the kernel needs no extra multiply."""
    p = dict(params)
    p["wr"] = 2.0 * params["wr"]
    p["br"] = 2.0 * params["br"]
    return p


# ----------------------------------------------------------------------------
# Pure-JAX reference with explicit PyTorch semantics (for correctness check).
# ----------------------------------------------------------------------------
def _ref_stack(x, params, dilations, skip_size):
    skips = []
    for l, d in enumerate(dilations):
        t_out = x.shape[1] - d
        a = x[:, :t_out, :]
        b = x[:, d:d + t_out, :]
        h = a @ params["w0"][l] + b @ params["w1"][l]
        g = jnp.tanh(h) * jax.nn.sigmoid(h)
        res = g @ params["wr"][l] + params["br"][l]
        x = res + res                                   # the `x += x[...]` quirk
        skip = (g @ params["ws"][l] + params["bs"][l])[:, t_out - skip_size:, :]
        skips.append(jnp.transpose(skip, (0, 2, 1)))    # (B, S, skip_size)
    return jnp.stack(skips, axis=0)


# ----------------------------------------------------------------------------
if __name__ == "__main__":
    # Small shapes consistent with the module semantics.
    layer_size = 3          # dilations 1, 2, 4
    stack_size = 2          # repeated twice -> 6 blocks
    res_channels = 32
    skip_channels = 32
    B, T = 2, 64            # total causal shrink = 2 * (2**3 - 1) = 14 -> final T = 50
    skip_size = 32

    key = jax.random.PRNGKey(0)
    key, xkey = jax.random.split(key)
    # kernel-layout input: (B, T, C)  (PyTorch NCT (B, C, T) transposed)
    x = jax.random.normal(xkey, (B, T, res_channels), jnp.float32)

    params, dilations = init_residual_stack(
        key, layer_size, stack_size, res_channels, skip_channels)
    kernel_params = fold_residual_double(params)        # one-time parameter fold

    out = residual_stack_forward(x, kernel_params, dilations, skip_size)
    out = jax.block_until_ready(out)

    ref = jax.block_until_ready(_ref_stack(x, params, dilations, skip_size))

    assert out.shape == (layer_size * stack_size, B, skip_channels, skip_size), out.shape
    assert jnp.allclose(out, ref, rtol=1e-5, atol=2e-5), \
        f"max abs err {jnp.max(jnp.abs(out - ref))}"

    print("KERNEL_OK")
</pallas_src>

<mosaic_0001>
module attributes {stable_mosaic.version = 11 : i64} {
  func.func @residual_stack_kernel(%arg0: i32, %arg1: memref<1x64x32xf32, #tpu.memory_space<vmem>>, %arg2: memref<6x32x32xf32, #tpu.memory_space<vmem>>, %arg3: memref<6x32x32xf32, #tpu.memory_space<vmem>>, %arg4: memref<6x32x32xf32, #tpu.memory_space<vmem>>, %arg5: memref<6x1x32xf32, #tpu.memory_space<vmem>>, %arg6: memref<6x32x32xf32, #tpu.memory_space<vmem>>, %arg7: memref<6x1x32xf32, #tpu.memory_space<vmem>>, %arg8: memref<6x1x32x32xf32, #tpu.memory_space<vmem>>) attributes {dimension_semantics = [#tpu.dimension_semantics<parallel>], iteration_bounds = array<i64: 2>, scalar_prefetch = 0 : i64, scratch_operands = 0 : i64, tpu.core_type = #tpu.core_type<tc>, window_params = [{transform_indices = @transform_0, window_bounds = array<i64: 1, 64, 32>}, {pipeline_mode = #tpu.pipeline_mode<synchronous>, transform_indices = @transform_1, window_bounds = array<i64: 6, 32, 32>}, {pipeline_mode = #tpu.pipeline_mode<synchronous>, transform_indices = @transform_2, window_bounds = array<i64: 6, 32, 32>}, {pipeline_mode = #tpu.pipeline_mode<synchronous>, transform_indices = @transform_3, window_bounds = array<i64: 6, 32, 32>}, {pipeline_mode = #tpu.pipeline_mode<synchronous>, transform_indices = @transform_4, window_bounds = array<i64: 6, 1, 32>}, {pipeline_mode = #tpu.pipeline_mode<synchronous>, transform_indices = @transform_5, window_bounds = array<i64: 6, 32, 32>}, {pipeline_mode = #tpu.pipeline_mode<synchronous>, transform_indices = @transform_6, window_bounds = array<i64: 6, 1, 32>}, {transform_indices = @transform_7, window_bounds = array<i64: 6, 1, 32, 32>}]} {
    %c0 = arith.constant 0 : index
    %c0_0 = arith.constant 0 : index
    %c0_1 = arith.constant 0 : index
    %0 = vector.load %arg1[%c0, %c0_0, %c0_1] : memref<1x64x32xf32, #tpu.memory_space<vmem>>, vector<1x64x32xf32>
    %1 = vector.shape_cast %0 : vector<1x64x32xf32> to vector<64x32xf32>
    %c0_2 = arith.constant 0 : index
    %c0_3 = arith.constant 0 : index
    %c0_4 = arith.constant 0 : index
    %2 = vector.load %arg2[%c0_2, %c0_3, %c0_4] : memref<6x32x32xf32, #tpu.memory_space<vmem>>, vector<1x32x32xf32>
    %3 = vector.shape_cast %2 : vector<1x32x32xf32> to vector<32x32xf32>
    %cst = arith.constant dense<0.000000e+00> : vector<64x32xf32>
    %4 = tpu.matmul %1, %3, %cst {dimension_numbers = #tpu.dot_dimension_numbers<[1], [0], [0], [1], [0, 0, 1, 1], [], []>} : vector<64x32xf32>, vector<32x32xf32>, vector<64x32xf32> -> vector<64x32xf32>
    %c0_5 = arith.constant 0 : index
    %c0_6 = arith.constant 0 : index
    %c0_7 = arith.constant 0 : index
    %5 = vector.load %arg3[%c0_5, %c0_6, %c0_7] : memref<6x32x32xf32, #tpu.memory_space<vmem>>, vector<1x32x32xf32>
    %6 = vector.shape_cast %5 : vector<1x32x32xf32> to vector<32x32xf32>
    %cst_8 = arith.constant dense<0.000000e+00> : vector<64x32xf32>
    %7 = tpu.matmul %1, %6, %cst_8 {dimension_numbers = #tpu.dot_dimension_numbers<[1], [0], [0], [1], [0, 0, 1, 1], [], []>} : vector<64x32xf32>, vector<32x32xf32>, vector<64x32xf32> -> vector<64x32xf32>
    %8 = vector.extract_strided_slice %4 {offsets = [0, 0], sizes = [63, 32], strides = [1, 1]} : vector<64x32xf32> to vector<63x32xf32>
    %9 = vector.extract_strided_slice %7 {offsets = [1, 0], sizes = [63, 32], strides = [1, 1]} : vector<64x32xf32> to vector<63x32xf32>
    %10 = arith.addf %8, %9 : vector<63x32xf32>
    %11 = math.absf %10 : vector<63x32xf32>
    %cst_9 = arith.constant 0.000000e+00 : f32
    %12 = vector.broadcast %cst_9 : f32 to vector<63x32xf32>
    %13 = arith.subf %12, %11 : vector<63x32xf32>
    %14 = math.exp %13 : vector<63x32xf32>
    %15 = arith.mulf %14, %14 : vector<63x32xf32>
    %cst_10 = arith.constant 1.000000e+00 : f32
    %16 = vector.broadcast %cst_10 : f32 to vector<63x32xf32>
    %17 = arith.subf %16, %15 : vector<63x32xf32>
    %cst_11 = arith.constant 0.000000e+00 : f32
    %18 = vector.broadcast %cst_11 : f32 to vector<63x32xf32>
    %19 = arith.cmpf oge, %10, %18 : vector<63x32xf32>
    %cst_12 = arith.constant 0.000000e+00 : f32
    %20 = vector.broadcast %cst_12 : f32 to vector<63x32xf32>
    %21 = arith.subf %20, %14 : vector<63x32xf32>
    %cst_13 = arith.constant 1.000000e+00 : f32
    %22 = vector.broadcast %cst_13 : f32 to vector<63x32xf32>
    %23 = arith.select %19, %22, %21 : vector<63x32xi1>, vector<63x32xf32>
    %24 = arith.mulf %17, %23 : vector<63x32xf32>
    %cst_14 = arith.constant 1.000000e+00 : f32
    %25 = vector.broadcast %cst_14 : f32 to vector<63x32xf32>
    %26 = arith.addf %25, %15 : vector<63x32xf32>
    %cst_15 = arith.constant 1.000000e+00 : f32
    %27 = vector.broadcast %cst_15 : f32 to vector<63x32xf32>
    %28 = arith.addf %27, %14 : vector<63x32xf32>
    %29 = arith.mulf %26, %28 : vector<63x32xf32>
    %30 = arith.divf %24, %29 : vector<63x32xf32>
    %c0_16 = arith.constant 0 : index
    %c0_17 = arith.constant 0 : index
    %c0_18 = arith.constant 0 : index
    %31 = vector.load %arg4[%c0_16, %c0_17, %c0_18] : memref<6x32x32xf32, #tpu.memory_space<vmem>>, vector<1x32x32xf32>
    %32 = vector.shape_cast %31 : vector<1x32x32xf32> to vector<32x32xf32>
    %cst_19 = arith.constant dense<0.000000e+00> : vector<63x32xf32>
    %33 = tpu.matmul %30, %32, %cst_19 {dimension_numbers = #tpu.dot_dimension_numbers<[1], [0], [0], [1], [0, 0, 1, 1], [], []>} : vector<63x32xf32>, vector<32x32xf32>, vector<63x32xf32> -> vector<63x32xf32>
    %c0_20 = arith.constant 0 : index
    %c0_21 = arith.constant 0 : index
    %c0_22 = arith.constant 0 : index
    %34 = vector.load %arg5[%c0_20, %c0_21, %c0_22] : memref<6x1x32xf32, #tpu.memory_space<vmem>>, vector<1x1x32xf32>
    %35 = vector.shape_cast %34 : vector<1x1x32xf32> to vector<1x32xf32>
    %36 = vector.broadcast %35 : vector<1x32xf32> to vector<63x32xf32>
    %37 = arith.addf %33, %36 : vector<63x32xf32>
    %38 = vector.extract_strided_slice %30 {offsets = [31, 0], sizes = [32, 32], strides = [1, 1]} : vector<63x32xf32> to vector<32x32xf32>
    %c0_23 = arith.constant 0 : index
    %c0_24 = arith.constant 0 : index
    %c0_25 = arith.constant 0 : index
    %39 = vector.load %arg6[%c0_23, %c0_24, %c0_25] : memref<6x32x32xf32, #tpu.memory_space<vmem>>, vector<1x32x32xf32>
    %40 = vector.shape_cast %39 : vector<1x32x32xf32> to vector<32x32xf32>
    %cst_26 = arith.constant dense<0.000000e+00> : vector<32x32xf32>
    %41 = tpu.matmul %38, %40, %cst_26 {dimension_numbers = #tpu.dot_dimension_numbers<[1], [0], [0], [1], [0, 0, 1, 1], [], []>} : vector<32x32xf32>, vector<32x32xf32>, vector<32x32xf32> -> vector<32x32xf32>
    %c0_27 = arith.constant 0 : index
    %c0_28 = arith.constant 0 : index
    %c0_29 = arith.constant 0 : index
    %42 = vector.load %arg7[%c0_27, %c0_28, %c0_29] : memref<6x1x32xf32, #tpu.memory_space<vmem>>, vector<1x1x32xf32>
    %43 = vector.shape_cast %42 : vector<1x1x32xf32> to vector<1x32xf32>
    %44 = vector.broadcast %43 : vector<1x32xf32> to vector<32x32xf32>
    %45 = arith.addf %41, %44 : vector<32x32xf32>
    %46 = tpu.transpose %45, [1, 0] : vector<32x32xf32> -> vector<32x32xf32>
    %c0_30 = arith.constant 0 : index
    %c0_31 = arith.constant 0 : index
    %c0_32 = arith.constant 0 : index
    %c0_33 = arith.constant 0 : index
    %47 = vector.load %arg8[%c0_30, %c0_31, %c0_32, %c0_33] : memref<6x1x32x32xf32, #tpu.memory_space<vmem>>, vector<1x1x32x32xf32>
    %48 = vector.shape_cast %47 : vector<1x1x32x32xf32> to vector<32x32xf32>
    %49 = vector.shape_cast %46 : vector<32x32xf32> to vector<1x1x32x32xf32>
    tpu.vector_store %arg8[%c0_30, %c0_31, %c0_32, %c0_33], %49 {strides = array<i32>} : memref<6x1x32x32xf32, #tpu.memory_space<vmem>>, vector<1x1x32x32xf32>,
    %c1 = arith.constant 1 : index
    %c0_34 = arith.constant 0 : index
    %c0_35 = arith.constant 0 : index
    %50 = vector.load %arg2[%c1, %c0_34, %c0_35] : memref<6x32x32xf32, #tpu.memory_space<vmem>>, vector<1x32x32xf32>
    %51 = vector.shape_cast %50 : vector<1x32x32xf32> to vector<32x32xf32>
    %cst_36 = arith.constant dense<0.000000e+00> : vector<63x32xf32>
    %52 = tpu.matmul %37, %51, %cst_36 {dimension_numbers = #tpu.dot_dimension_numbers<[1], [0], [0], [1], [0, 0, 1, 1], [], []>} : vector<63x32xf32>, vector<32x32xf32>, vector<63x32xf32> -> vector<63x32xf32>
    %c1_37 = arith.constant 1 : index
    %c0_38 = arith.constant 0 : index
    %c0_39 = arith.constant 0 : index
    %53 = vector.load %arg3[%c1_37, %c0_38, %c0_39] : memref<6x32x32xf32, #tpu.memory_space<vmem>>, vector<1x32x32xf32>
    %54 = vector.shape_cast %53 : vector<1x32x32xf32> to vector<32x32xf32>
    %cst_40 = arith.constant dense<0.000000e+00> : vector<63x32xf32>
    %55 = tpu.matmul %37, %54, %cst_40 {dimension_numbers = #tpu.dot_dimension_numbers<[1], [0], [0], [1], [0, 0, 1, 1], [], []>} : vector<63x32xf32>, vector<32x32xf32>, vector<63x32xf32> -> vector<63x32xf32>
    %56 = vector.extract_strided_slice %52 {offsets = [0, 0], sizes = [61, 32], strides = [1, 1]} : vector<63x32xf32> to vector<61x32xf32>
    %57 = vector.extract_strided_slice %55 {offsets = [2, 0], sizes = [61, 32], strides = [1, 1]} : vector<63x32xf32> to vector<61x32xf32>
    %58 = arith.addf %56, %57 : vector<61x32xf32>
    %59 = math.absf %58 : vector<61x32xf32>
    %cst_41 = arith.constant 0.000000e+00 : f32
    %60 = vector.broadcast %cst_41 : f32 to vector<61x32xf32>
    %61 = arith.subf %60, %59 : vector<61x32xf32>
    %62 = math.exp %61 : vector<61x32xf32>
    %63 = arith.mulf %62, %62 : vector<61x32xf32>
    %cst_42 = arith.constant 1.000000e+00 : f32
    %64 = vector.broadcast %cst_42 : f32 to vector<61x32xf32>
    %65 = arith.subf %64, %63 : vector<61x32xf32>
    %cst_43 = arith.constant 0.000000e+00 : f32
    %66 = vector.broadcast %cst_43 : f32 to vector<61x32xf32>
    %67 = arith.cmpf oge, %58, %66 : vector<61x32xf32>
    %cst_44 = arith.constant 0.000000e+00 : f32
    %68 = vector.broadcast %cst_44 : f32 to vector<61x32xf32>
    %69 = arith.subf %68, %62 : vector<61x32xf32>
    %cst_45 = arith.constant 1.000000e+00 : f32
    %70 = vector.broadcast %cst_45 : f32 to vector<61x32xf32>
    %71 = arith.select %67, %70, %69 : vector<61x32xi1>, vector<61x32xf32>
    %72 = arith.mulf %65, %71 : vector<61x32xf32>
    %cst_46 = arith.constant 1.000000e+00 : f32
    %73 = vector.broadcast %cst_46 : f32 to vector<61x32xf32>
    %74 = arith.addf %73, %63 : vector<61x32xf32>
    %cst_47 = arith.constant 1.000000e+00 : f32
    %75 = vector.broadcast %cst_47 : f32 to vector<61x32xf32>
    %76 = arith.addf %75, %62 : vector<61x32xf32>
    %77 = arith.mulf %74, %76 : vector<61x32xf32>
    %78 = arith.divf %72, %77 : vector<61x32xf32>
    %c1_48 = arith.constant 1 : index
    %c0_49 = arith.constant 0 : index
    %c0_50 = arith.constant 0 : index
    %79 = vector.load %arg4[%c1_48, %c0_49, %c0_50] : memref<6x32x32xf32, #tpu.memory_space<vmem>>, vector<1x32x32xf32>
    %80 = vector.shape_cast %79 : vector<1x32x32xf32> to vector<32x32xf32>
    %cst_51 = arith.constant dense<0.000000e+00> : vector<61x32xf32>
    %81 = tpu.matmul %78, %80, %cst_51 {dimension_numbers = #tpu.dot_dimension_numbers<[1], [0], [0], [1], [0, 0, 1, 1], [], []>} : vector<61x32xf32>, vector<32x32xf32>, vector<61x32xf32> -> vector<61x32xf32>
    %c1_52 = arith.constant 1 : index
    %c0_53 = arith.constant 0 : index
    %c0_54 = arith.constant 0 : index
    %82 = vector.load %arg5[%c1_52, %c0_53, %c0_54] : memref<6x1x32xf32, #tpu.memory_space<vmem>>, vector<1x1x32xf32>
    %83 = vector.shape_cast %82 : vector<1x1x32xf32> to vector<1x32xf32>
    %84 = vector.broadcast %83 : vector<1x32xf32> to vector<61x32xf32>
    %85 = arith.addf %81, %84 : vector<61x32xf32>
    %86 = vector.extract_strided_slice %78 {offsets = [29, 0], sizes = [32, 32], strides = [1, 1]} : vector<61x32xf32> to vector<32x32xf32>
    %c1_55 = arith.constant 1 : index
    %c0_56 = arith.constant 0 : index
    %c0_57 = arith.constant 0 : index
    %87 = vector.load %arg6[%c1_55, %c0_56, %c0_57] : memref<6x32x32xf32, #tpu.memory_space<vmem>>, vector<1x32x32xf32>
    %88 = vector.shape_cast %87 : vector<1x32x32xf32> to vector<32x32xf32>
    %cst_58 = arith.constant dense<0.000000e+00> : vector<32x32xf32>
    %89 = tpu.matmul %86, %88, %cst_58 {dimension_numbers = #tpu.dot_dimension_numbers<[1], [0], [0], [1], [0, 0, 1, 1], [], []>} : vector<32x32xf32>, vector<32x32xf32>, vector<32x32xf32> -> vector<32x32xf32>
    %c1_59 = arith.constant 1 : index
    %c0_60 = arith.constant 0 : index
    %c0_61 = arith.constant 0 : index
    %90 = vector.load %arg7[%c1_59, %c0_60, %c0_61] : memref<6x1x32xf32, #tpu.memory_space<vmem>>, vector<1x1x32xf32>
    %91 = vector.shape_cast %90 : vector<1x1x32xf32> to vector<1x32xf32>
    %92 = vector.broadcast %91 : vector<1x32xf32> to vector<32x32xf32>
    %93 = arith.addf %89, %92 : vector<32x32xf32>
    %94 = tpu.transpose %93, [1, 0] : vector<32x32xf32> -> vector<32x32xf32>
    %c1_62 = arith.constant 1 : index
    %c0_63 = arith.constant 0 : index
    %c0_64 = arith.constant 0 : index
    %c0_65 = arith.constant 0 : index
    %95 = vector.load %arg8[%c1_62, %c0_63, %c0_64, %c0_65] : memref<6x1x32x32xf32, #tpu.memory_space<vmem>>, vector<1x1x32x32xf32>
    %96 = vector.shape_cast %95 : vector<1x1x32x32xf32> to vector<32x32xf32>
    %97 = vector.shape_cast %94 : vector<32x32xf32> to vector<1x1x32x32xf32>
    tpu.vector_store %arg8[%c1_62, %c0_63, %c0_64, %c0_65], %97 {strides = array<i32>} : memref<6x1x32x32xf32, #tpu.memory_space<vmem>>, vector<1x1x32x32xf32>,
    %c2 = arith.constant 2 : index
    %c0_66 = arith.constant 0 : index
    %c0_67 = arith.constant 0 : index
    %98 = vector.load %arg2[%c2, %c0_66, %c0_67] : memref<6x32x32xf32, #tpu.memory_space<vmem>>, vector<1x32x32xf32>
    %99 = vector.shape_cast %98 : vector<1x32x32xf32> to vector<32x32xf32>
    %cst_68 = arith.constant dense<0.000000e+00> : vector<61x32xf32>
    %100 = tpu.matmul %85, %99, %cst_68 {dimension_numbers = #tpu.dot_dimension_numbers<[1], [0], [0], [1], [0, 0, 1, 1], [], []>} : vector<61x32xf32>, vector<32x32xf32>, vector<61x32xf32> -> vector<61x32xf32>
    %c2_69 = arith.constant 2 : index
    %c0_70 = arith.constant 0 : index
    %c0_71 = arith.constant 0 : index
    %101 = vector.load %arg3[%c2_69, %c0_70, %c0_71] : memref<6x32x32xf32, #tpu.memory_space<vmem>>, vector<1x32x32xf32>
    %102 = vector.shape_cast %101 : vector<1x32x32xf32> to vector<32x32xf32>
    %cst_72 = arith.constant dense<0.000000e+00> : vector<61x32xf32>
    %103 = tpu.matmul %85, %102, %cst_72 {dimension_numbers = #tpu.dot_dimension_numbers<[1], [0], [0], [1], [0, 0, 1, 1], [], []>} : vector<61x32xf32>, vector<32x32xf32>, vector<61x32xf32> -> vector<61x32xf32>
    %104 = vector.extract_strided_slice %100 {offsets = [0, 0], sizes = [57, 32], strides = [1, 1]} : vector<61x32xf32> to vector<57x32xf32>
    %105 = vector.extract_strided_slice %103 {offsets = [4, 0], sizes = [57, 32], strides = [1, 1]} : vector<61x32xf32> to vector<57x32xf32>
    %106 = arith.addf %104, %105 : vector<57x32xf32>
    %107 = math.absf %106 : vector<57x32xf32>
    %cst_73 = arith.constant 0.000000e+00 : f32
    %108 = vector.broadcast %cst_73 : f32 to vector<57x32xf32>
    %109 = arith.subf %108, %107 : vector<57x32xf32>
    %110 = math.exp %109 : vector<57x32xf32>
    %111 = arith.mulf %110, %110 : vector<57x32xf32>
    %cst_74 = arith.constant 1.000000e+00 : f32
    %112 = vector.broadcast %cst_74 : f32 to vector<57x32xf32>
    %113 = arith.subf %112, %111 : vector<57x32xf32>
    %cst_75 = arith.constant 0.000000e+00 : f32
    %114 = vector.broadcast %cst_75 : f32 to vector<57x32xf32>
    %115 = arith.cmpf oge, %106, %114 : vector<57x32xf32>
    %cst_76 = arith.constant 0.000000e+00 : f32
    %116 = vector.broadcast %cst_76 : f32 to vector<57x32xf32>
    %117 = arith.subf %116, %110 : vector<57x32xf32>
    %cst_77 = arith.constant 1.000000e+00 : f32
    %118 = vector.broadcast %cst_77 : f32 to vector<57x32xf32>
    %119 = arith.select %115, %118, %117 : vector<57x32xi1>, vector<57x32xf32>
    %120 = arith.mulf %113, %119 : vector<57x32xf32>
    %cst_78 = arith.constant 1.000000e+00 : f32
    %121 = vector.broadcast %cst_78 : f32 to vector<57x32xf32>
    %122 = arith.addf %121, %111 : vector<57x32xf32>
    %cst_79 = arith.constant 1.000000e+00 : f32
    %123 = vector.broadcast %cst_79 : f32 to vector<57x32xf32>
    %124 = arith.addf %123, %110 : vector<57x32xf32>
    %125 = arith.mulf %122, %124 : vector<57x32xf32>
    %126 = arith.divf %120, %125 : vector<57x32xf32>
    %c2_80 = arith.constant 2 : index
    %c0_81 = arith.constant 0 : index
    %c0_82 = arith.constant 0 : index
    %127 = vector.load %arg4[%c2_80, %c0_81, %c0_82] : memref<6x32x32xf32, #tpu.memory_space<vmem>>, vector<1x32x32xf32>
    %128 = vector.shape_cast %127 : vector<1x32x32xf32> to vector<32x32xf32>
    %cst_83 = arith.constant dense<0.000000e+00> : vector<57x32xf32>
    %129 = tpu.matmul %126, %128, %cst_83 {dimension_numbers = #tpu.dot_dimension_numbers<[1], [0], [0], [1], [0, 0, 1, 1], [], []>} : vector<57x32xf32>, vector<32x32xf32>, vector<57x32xf32> -> vector<57x32xf32>
    %c2_84 = arith.constant 2 : index
    %c0_85 = arith.constant 0 : index
    %c0_86 = arith.constant 0 : index
    %130 = vector.load %arg5[%c2_84, %c0_85, %c0_86] : memref<6x1x32xf32, #tpu.memory_space<vmem>>, vector<1x1x32xf32>
    %131 = vector.shape_cast %130 : vector<1x1x32xf32> to vector<1x32xf32>
    %132 = vector.broadcast %131 : vector<1x32xf32> to vector<57x32xf32>
    %133 = arith.addf %129, %132 : vector<57x32xf32>
    %134 = vector.extract_strided_slice %126 {offsets = [25, 0], sizes = [32, 32], strides = [1, 1]} : vector<57x32xf32> to vector<32x32xf32>
    %c2_87 = arith.constant 2 : index
    %c0_88 = arith.constant 0 : index
    %c0_89 = arith.constant 0 : index
    %135 = vector.load %arg6[%c2_87, %c0_88, %c0_89] : memref<6x32x32xf32, #tpu.memory_space<vmem>>, vector<1x32x32xf32>
    %136 = vector.shape_cast %135 : vector<1x32x32xf32> to vector<32x32xf32>
    %cst_90 = arith.constant dense<0.000000e+00> : vector<32x32xf32>
    %137 = tpu.matmul %134, %136, %cst_90 {dimension_numbers = #tpu.dot_dimension_numbers<[1], [0], [0], [1], [0, 0, 1, 1], [], []>} : vector<32x32xf32>, vector<32x32xf32>, vector<32x32xf32> -> vector<32x32xf32>
    %c2_91 = arith.constant 2 : index
    %c0_92 = arith.constant 0 : index
    %c0_93 = arith.constant 0 : index
    %138 = vector.load %arg7[%c2_91, %c0_92, %c0_93] : memref<6x1x32xf32, #tpu.memory_space<vmem>>, vector<1x1x32xf32>
    %139 = vector.shape_cast %138 : vector<1x1x32xf32> to vector<1x32xf32>
    %140 = vector.broadcast %139 : vector<1x32xf32> to vector<32x32xf32>
    %141 = arith.addf %137, %140 : vector<32x32xf32>
    %142 = tpu.transpose %141, [1, 0] : vector<32x32xf32> -> vector<32x32xf32>
    %c2_94 = arith.constant 2 : index
    %c0_95 = arith.constant 0 : index
    %c0_96 = arith.constant 0 : index
    %c0_97 = arith.constant 0 : index
    %143 = vector.load %arg8[%c2_94, %c0_95, %c0_96, %c0_97] : memref<6x1x32x32xf32, #tpu.memory_space<vmem>>, vector<1x1x32x32xf32>
    %144 = vector.shape_cast %143 : vector<1x1x32x32xf32> to vector<32x32xf32>
    %145 = vector.shape_cast %142 : vector<32x32xf32> to vector<1x1x32x32xf32>
    tpu.vector_store %arg8[%c2_94, %c0_95, %c0_96, %c0_97], %145 {strides = array<i32>} : memref<6x1x32x32xf32, #tpu.memory_space<vmem>>, vector<1x1x32x32xf32>,
    %c3 = arith.constant 3 : index
    %c0_98 = arith.constant 0 : index
    %c0_99 = arith.constant 0 : index
    %146 = vector.load %arg2[%c3, %c0_98, %c0_99] : memref<6x32x32xf32, #tpu.memory_space<vmem>>, vector<1x32x32xf32>
    %147 = vector.shape_cast %146 : vector<1x32x32xf32> to vector<32x32xf32>
    %cst_100 = arith.constant dense<0.000000e+00> : vector<57x32xf32>
    %148 = tpu.matmul %133, %147, %cst_100 {dimension_numbers = #tpu.dot_dimension_numbers<[1], [0], [0], [1], [0, 0, 1, 1], [], []>} : vector<57x32xf32>, vector<32x32xf32>, vector<57x32xf32> -> vector<57x32xf32>
    %c3_101 = arith.constant 3 : index
    %c0_102 = arith.constant 0 : index
    %c0_103 = arith.constant 0 : index
    %149 = vector.load %arg3[%c3_101, %c0_102, %c0_103] : memref<6x32x32xf32, #tpu.memory_space<vmem>>, vector<1x32x32xf32>
    %150 = vector.shape_cast %149 : vector<1x32x32xf32> to vector<32x32xf32>
    %cst_104 = arith.constant dense<0.000000e+00> : vector<57x32xf32>
    %151 = tpu.matmul %133, %150, %cst_104 {dimension_numbers = #tpu.dot_dimension_numbers<[1], [0], [0], [1], [0, 0, 1, 1], [], []>} : vector<57x32xf32>, vector<32x32xf32>, vector<57x32xf32> -> vector<57x32xf32>
    %152 = vector.extract_strided_slice %148 {offsets = [0, 0], sizes = [56, 32], strides = [1, 1]} : vector<57x32xf32> to vector<56x32xf32>
    %153 = vector.extract_strided_slice %151 {offsets = [1, 0], sizes = [56, 32], strides = [1, 1]} : vector<57x32xf32> to vector<56x32xf32>
    %154 = arith.addf %152, %153 : vector<56x32xf32>
    %155 = math.absf %154 : vector<56x32xf32>
    %cst_105 = arith.constant 0.000000e+00 : f32
    %156 = vector.broadcast %cst_105 : f32 to vector<56x32xf32>
    %157 = arith.subf %156, %155 : vector<56x32xf32>
    %158 = math.exp %157 : vector<56x32xf32>
    %159 = arith.mulf %158, %158 : vector<56x32xf32>
    %cst_106 = arith.constant 1.000000e+00 : f32
    %160 = vector.broadcast %cst_106 : f32 to vector<56x32xf32>
    %161 = arith.subf %160, %159 : vector<56x32xf32>
    %cst_107 = arith.constant 0.000000e+00 : f32
    %162 = vector.broadcast %cst_107 : f32 to vector<56x32xf32>
    %163 = arith.cmpf oge, %154, %162 : vector<56x32xf32>
    %cst_108 = arith.constant 0.000000e+00 : f32
    %164 = vector.broadcast %cst_108 : f32 to vector<56x32xf32>
    %165 = arith.subf %164, %158 : vector<56x32xf32>
    %cst_109 = arith.constant 1.000000e+00 : f32
    %166 = vector.broadcast %cst_109 : f32 to vector<56x32xf32>
    %167 = arith.select %163, %166, %165 : vector<56x32xi1>, vector<56x32xf32>
    %168 = arith.mulf %161, %167 : vector<56x32xf32>
    %cst_110 = arith.constant 1.000000e+00 : f32
    %169 = vector.broadcast %cst_110 : f32 to vector<56x32xf32>
    %170 = arith.addf %169, %159 : vector<56x32xf32>
    %cst_111 = arith.constant 1.000000e+00 : f32
    %171 = vector.broadcast %cst_111 : f32 to vector<56x32xf32>
    %172 = arith.addf %171, %158 : vector<56x32xf32>
    %173 = arith.mulf %170, %172 : vector<56x32xf32>
    %174 = arith.divf %168, %173 : vector<56x32xf32>
    %c3_112 = arith.constant 3 : index
    %c0_113 = arith.constant 0 : index
    %c0_114 = arith.constant 0 : index
    %175 = vector.load %arg4[%c3_112, %c0_113, %c0_114] : memref<6x32x32xf32, #tpu.memory_space<vmem>>, vector<1x32x32xf32>
    %176 = vector.shape_cast %175 : vector<1x32x32xf32> to vector<32x32xf32>
    %cst_115 = arith.constant dense<0.000000e+00> : vector<56x32xf32>
    %177 = tpu.matmul %174, %176, %cst_115 {dimension_numbers = #tpu.dot_dimension_numbers<[1], [0], [0], [1], [0, 0, 1, 1], [], []>} : vector<56x32xf32>, vector<32x32xf32>, vector<56x32xf32> -> vector<56x32xf32>
    %c3_116 = arith.constant 3 : index
    %c0_117 = arith.constant 0 : index
    %c0_118 = arith.constant 0 : index
    %178 = vector.load %arg5[%c3_116, %c0_117, %c0_118] : memref<6x1x32xf32, #tpu.memory_space<vmem>>, vector<1x1x32xf32>
    %179 = vector.shape_cast %178 : vector<1x1x32xf32> to vector<1x32xf32>
    %180 = vector.broadcast %179 : vector<1x32xf32> to vector<56x32xf32>
    %181 = arith.addf %177, %180 : vector<56x32xf32>
    %182 = vector.extract_strided_slice %174 {offsets = [24, 0], sizes = [32, 32], strides = [1, 1]} : vector<56x32xf32> to vector<32x32xf32>
    %c3_119 = arith.constant 3 : index
    %c0_120 = arith.constant 0 : index
    %c0_121 = arith.constant 0 : index
    %183 = vector.load %arg6[%c3_119, %c0_120, %c0_121] : memref<6x32x32xf32, #tpu.memory_space<vmem>>, vector<1x32x32xf32>
    %184 = vector.shape_cast %183 : vector<1x32x32xf32> to vector<32x32xf32>
    %cst_122 = arith.constant dense<0.000000e+00> : vector<32x32xf32>
    %185 = tpu.matmul %182, %184, %cst_122 {dimension_numbers = #tpu.dot_dimension_numbers<[1], [0], [0], [1], [0, 0, 1, 1], [], []>} : vector<32x32xf32>, vector<32x32xf32>, vector<32x32xf32> -> vector<32x32xf32>
    %c3_123 = arith.constant 3 : index
    %c0_124 = arith.constant 0 : index
    %c0_125 = arith.constant 0 : index
    %186 = vector.load %arg7[%c3_123, %c0_124, %c0_125] : memref<6x1x32xf32, #tpu.memory_space<vmem>>, vector<1x1x32xf32>
    %187 = vector.shape_cast %186 : vector<1x1x32xf32> to vector<1x32xf32>
    %188 = vector.broadcast %187 : vector<1x32xf32> to vector<32x32xf32>
    %189 = arith.addf %185, %188 : vector<32x32xf32>
    %190 = tpu.transpose %189, [1, 0] : vector<32x32xf32> -> vector<32x32xf32>
    %c3_126 = arith.constant 3 : index
    %c0_127 = arith.constant 0 : index
    %c0_128 = arith.constant 0 : index
    %c0_129 = arith.constant 0 : index
    %191 = vector.load %arg8[%c3_126, %c0_127, %c0_128, %c0_129] : memref<6x1x32x32xf32, #tpu.memory_space<vmem>>, vector<1x1x32x32xf32>
    %192 = vector.shape_cast %191 : vector<1x1x32x32xf32> to vector<32x32xf32>
    %193 = vector.shape_cast %190 : vector<32x32xf32> to vector<1x1x32x32xf32>
    tpu.vector_store %arg8[%c3_126, %c0_127, %c0_128, %c0_129], %193 {strides = array<i32>} : memref<6x1x32x32xf32, #tpu.memory_space<vmem>>, vector<1x1x32x32xf32>,
    %c4 = arith.constant 4 : index
    %c0_130 = arith.constant 0 : index
    %c0_131 = arith.constant 0 : index
    %194 = vector.load %arg2[%c4, %c0_130, %c0_131] : memref<6x32x32xf32, #tpu.memory_space<vmem>>, vector<1x32x32xf32>
    %195 = vector.shape_cast %194 : vector<1x32x32xf32> to vector<32x32xf32>
    %cst_132 = arith.constant dense<0.000000e+00> : vector<56x32xf32>
    %196 = tpu.matmul %181, %195, %cst_132 {dimension_numbers = #tpu.dot_dimension_numbers<[1], [0], [0], [1], [0, 0, 1, 1], [], []>} : vector<56x32xf32>, vector<32x32xf32>, vector<56x32xf32> -> vector<56x32xf32>
    %c4_133 = arith.constant 4 : index
    %c0_134 = arith.constant 0 : index
    %c0_135 = arith.constant 0 : index
    %197 = vector.load %arg3[%c4_133, %c0_134, %c0_135] : memref<6x32x32xf32, #tpu.memory_space<vmem>>, vector<1x32x32xf32>
    %198 = vector.shape_cast %197 : vector<1x32x32xf32> to vector<32x32xf32>
    %cst_136 = arith.constant dense<0.000000e+00> : vector<56x32xf32>
    %199 = tpu.matmul %181, %198, %cst_136 {dimension_numbers = #tpu.dot_dimension_numbers<[1], [0], [0], [1], [0, 0, 1, 1], [], []>} : vector<56x32xf32>, vector<32x32xf32>, vector<56x32xf32> -> vector<56x32xf32>
    %200 = vector.extract_strided_slice %196 {offsets = [0, 0], sizes = [54, 32], strides = [1, 1]} : vector<56x32xf32> to vector<54x32xf32>
    %201 = vector.extract_strided_slice %199 {offsets = [2, 0], sizes = [54, 32], strides = [1, 1]} : vector<56x32xf32> to vector<54x32xf32>
    %202 = arith.addf %200, %201 : vector<54x32xf32>
    %203 = math.absf %202 : vector<54x32xf32>
    %cst_137 = arith.constant 0.000000e+00 : f32
    %204 = vector.broadcast %cst_137 : f32 to vector<54x32xf32>
    %205 = arith.subf %204, %203 : vector<54x32xf32>
    %206 = math.exp %205 : vector<54x32xf32>
    %207 = arith.mulf %206, %206 : vector<54x32xf32>
    %cst_138 = arith.constant 1.000000e+00 : f32
    %208 = vector.broadcast %cst_138 : f32 to vector<54x32xf32>
    %209 = arith.subf %208, %207 : vector<54x32xf32>
    %cst_139 = arith.constant 0.000000e+00 : f32
    %210 = vector.broadcast %cst_139 : f32 to vector<54x32xf32>
    %211 = arith.cmpf oge, %202, %210 : vector<54x32xf32>
    %cst_140 = arith.constant 0.000000e+00 : f32
    %212 = vector.broadcast %cst_140 : f32 to vector<54x32xf32>
    %213 = arith.subf %212, %206 : vector<54x32xf32>
    %cst_141 = arith.constant 1.000000e+00 : f32
    %214 = vector.broadcast %cst_141 : f32 to vector<54x32xf32>
    %215 = arith.select %211, %214, %213 : vector<54x32xi1>, vector<54x32xf32>
    %216 = arith.mulf %209, %215 : vector<54x32xf32>
    %cst_142 = arith.constant 1.000000e+00 : f32
    %217 = vector.broadcast %cst_142 : f32 to vector<54x32xf32>
    %218 = arith.addf %217, %207 : vector<54x32xf32>
    %cst_143 = arith.constant 1.000000e+00 : f32
    %219 = vector.broadcast %cst_143 : f32 to vector<54x32xf32>
    %220 = arith.addf %219, %206 : vector<54x32xf32>
    %221 = arith.mulf %218, %220 : vector<54x32xf32>
    %222 = arith.divf %216, %221 : vector<54x32xf32>
    %c4_144 = arith.constant 4 : index
    %c0_145 = arith.constant 0 : index
    %c0_146 = arith.constant 0 : index
    %223 = vector.load %arg4[%c4_144, %c0_145, %c0_146] : memref<6x32x32xf32, #tpu.memory_space<vmem>>, vector<1x32x32xf32>
    %224 = vector.shape_cast %223 : vector<1x32x32xf32> to vector<32x32xf32>
    %cst_147 = arith.constant dense<0.000000e+00> : vector<54x32xf32>
    %225 = tpu.matmul %222, %224, %cst_147 {dimension_numbers = #tpu.dot_dimension_numbers<[1], [0], [0], [1], [0, 0, 1, 1], [], []>} : vector<54x32xf32>, vector<32x32xf32>, vector<54x32xf32> -> vector<54x32xf32>
    %c4_148 = arith.constant 4 : index
    %c0_149 = arith.constant 0 : index
    %c0_150 = arith.constant 0 : index
    %226 = vector.load %arg5[%c4_148, %c0_149, %c0_150] : memref<6x1x32xf32, #tpu.memory_space<vmem>>, vector<1x1x32xf32>
    %227 = vector.shape_cast %226 : vector<1x1x32xf32> to vector<1x32xf32>
    %228 = vector.broadcast %227 : vector<1x32xf32> to vector<54x32xf32>
    %229 = arith.addf %225, %228 : vector<54x32xf32>
    %230 = vector.extract_strided_slice %222 {offsets = [22, 0], sizes = [32, 32], strides = [1, 1]} : vector<54x32xf32> to vector<32x32xf32>
    %c4_151 = arith.constant 4 : index
    %c0_152 = arith.constant 0 : index
    %c0_153 = arith.constant 0 : index
    %231 = vector.load %arg6[%c4_151, %c0_152, %c0_153] : memref<6x32x32xf32, #tpu.memory_space<vmem>>, vector<1x32x32xf32>
    %232 = vector.shape_cast %231 : vector<1x32x32xf32> to vector<32x32xf32>
    %cst_154 = arith.constant dense<0.000000e+00> : vector<32x32xf32>
    %233 = tpu.matmul %230, %232, %cst_154 {dimension_numbers = #tpu.dot_dimension_numbers<[1], [0], [0], [1], [0, 0, 1, 1], [], []>} : vector<32x32xf32>, vector<32x32xf32>, vector<32x32xf32> -> vector<32x32xf32>
    %c4_155 = arith.constant 4 : index
    %c0_156 = arith.constant 0 : index
    %c0_157 = arith.constant 0 : index
    %234 = vector.load %arg7[%c4_155, %c0_156, %c0_157] : memref<6x1x32xf32, #tpu.memory_space<vmem>>, vector<1x1x32xf32>
    %235 = vector.shape_cast %234 : vector<1x1x32xf32> to vector<1x32xf32>
    %236 = vector.broadcast %235 : vector<1x32xf32> to vector<32x32xf32>
    %237 = arith.addf %233, %236 : vector<32x32xf32>
    %238 = tpu.transpose %237, [1, 0] : vector<32x32xf32> -> vector<32x32xf32>
    %c4_158 = arith.constant 4 : index
    %c0_159 = arith.constant 0 : index
    %c0_160 = arith.constant 0 : index
    %c0_161 = arith.constant 0 : index
    %239 = vector.load %arg8[%c4_158, %c0_159, %c0_160, %c0_161] : memref<6x1x32x32xf32, #tpu.memory_space<vmem>>, vector<1x1x32x32xf32>
    %240 = vector.shape_cast %239 : vector<1x1x32x32xf32> to vector<32x32xf32>
    %241 = vector.shape_cast %238 : vector<32x32xf32> to vector<1x1x32x32xf32>
    tpu.vector_store %arg8[%c4_158, %c0_159, %c0_160, %c0_161], %241 {strides = array<i32>} : memref<6x1x32x32xf32, #tpu.memory_space<vmem>>, vector<1x1x32x32xf32>,
    %c5 = arith.constant 5 : index
    %c0_162 = arith.constant 0 : index
    %c0_163 = arith.constant 0 : index
    %242 = vector.load %arg2[%c5, %c0_162, %c0_163] : memref<6x32x32xf32, #tpu.memory_space<vmem>>, vector<1x32x32xf32>
    %243 = vector.shape_cast %242 : vector<1x32x32xf32> to vector<32x32xf32>
    %cst_164 = arith.constant dense<0.000000e+00> : vector<54x32xf32>
    %244 = tpu.matmul %229, %243, %cst_164 {dimension_numbers = #tpu.dot_dimension_numbers<[1], [0], [0], [1], [0, 0, 1, 1], [], []>} : vector<54x32xf32>, vector<32x32xf32>, vector<54x32xf32> -> vector<54x32xf32>
    %c5_165 = arith.constant 5 : index
    %c0_166 = arith.constant 0 : index
    %c0_167 = arith.constant 0 : index
    %245 = vector.load %arg3[%c5_165, %c0_166, %c0_167] : memref<6x32x32xf32, #tpu.memory_space<vmem>>, vector<1x32x32xf32>
    %246 = vector.shape_cast %245 : vector<1x32x32xf32> to vector<32x32xf32>
    %cst_168 = arith.constant dense<0.000000e+00> : vector<54x32xf32>
    %247 = tpu.matmul %229, %246, %cst_168 {dimension_numbers = #tpu.dot_dimension_numbers<[1], [0], [0], [1], [0, 0, 1, 1], [], []>} : vector<54x32xf32>, vector<32x32xf32>, vector<54x32xf32> -> vector<54x32xf32>
    %248 = vector.extract_strided_slice %244 {offsets = [0, 0], sizes = [50, 32], strides = [1, 1]} : vector<54x32xf32> to vector<50x32xf32>
    %249 = vector.extract_strided_slice %247 {offsets = [4, 0], sizes = [50, 32], strides = [1, 1]} : vector<54x32xf32> to vector<50x32xf32>
    %250 = arith.addf %248, %249 : vector<50x32xf32>
    %251 = math.absf %250 : vector<50x32xf32>
    %cst_169 = arith.constant 0.000000e+00 : f32
    %252 = vector.broadcast %cst_169 : f32 to vector<50x32xf32>
    %253 = arith.subf %252, %251 : vector<50x32xf32>
    %254 = math.exp %253 : vector<50x32xf32>
    %255 = arith.mulf %254, %254 : vector<50x32xf32>
    %cst_170 = arith.constant 1.000000e+00 : f32
    %256 = vector.broadcast %cst_170 : f32 to vector<50x32xf32>
    %257 = arith.subf %256, %255 : vector<50x32xf32>
    %cst_171 = arith.constant 0.000000e+00 : f32
    %258 = vector.broadcast %cst_171 : f32 to vector<50x32xf32>
    %259 = arith.cmpf oge, %250, %258 : vector<50x32xf32>
    %cst_172 = arith.constant 0.000000e+00 : f32
    %260 = vector.broadcast %cst_172 : f32 to vector<50x32xf32>
    %261 = arith.subf %260, %254 : vector<50x32xf32>
    %cst_173 = arith.constant 1.000000e+00 : f32
    %262 = vector.broadcast %cst_173 : f32 to vector<50x32xf32>
    %263 = arith.select %259, %262, %261 : vector<50x32xi1>, vector<50x32xf32>
    %264 = arith.mulf %257, %263 : vector<50x32xf32>
    %cst_174 = arith.constant 1.000000e+00 : f32
    %265 = vector.broadcast %cst_174 : f32 to vector<50x32xf32>
    %266 = arith.addf %265, %255 : vector<50x32xf32>
    %cst_175 = arith.constant 1.000000e+00 : f32
    %267 = vector.broadcast %cst_175 : f32 to vector<50x32xf32>
    %268 = arith.addf %267, %254 : vector<50x32xf32>
    %269 = arith.mulf %266, %268 : vector<50x32xf32>
    %270 = arith.divf %264, %269 : vector<50x32xf32>
    %271 = vector.extract_strided_slice %270 {offsets = [18, 0], sizes = [32, 32], strides = [1, 1]} : vector<50x32xf32> to vector<32x32xf32>
    %c5_176 = arith.constant 5 : index
    %c0_177 = arith.constant 0 : index
    %c0_178 = arith.constant 0 : index
    %272 = vector.load %arg6[%c5_176, %c0_177, %c0_178] : memref<6x32x32xf32, #tpu.memory_space<vmem>>, vector<1x32x32xf32>
    %273 = vector.shape_cast %272 : vector<1x32x32xf32> to vector<32x32xf32>
    %cst_179 = arith.constant dense<0.000000e+00> : vector<32x32xf32>
    %274 = tpu.matmul %271, %273, %cst_179 {dimension_numbers = #tpu.dot_dimension_numbers<[1], [0], [0], [1], [0, 0, 1, 1], [], []>} : vector<32x32xf32>, vector<32x32xf32>, vector<32x32xf32> -> vector<32x32xf32>
    %c5_180 = arith.constant 5 : index
    %c0_181 = arith.constant 0 : index
    %c0_182 = arith.constant 0 : index
    %275 = vector.load %arg7[%c5_180, %c0_181, %c0_182] : memref<6x1x32xf32, #tpu.memory_space<vmem>>, vector<1x1x32xf32>
    %276 = vector.shape_cast %275 : vector<1x1x32xf32> to vector<1x32xf32>
    %277 = vector.broadcast %276 : vector<1x32xf32> to vector<32x32xf32>
    %278 = arith.addf %274, %277 : vector<32x32xf32>
    %279 = tpu.transpose %278, [1, 0] : vector<32x32xf32> -> vector<32x32xf32>
    %c5_183 = arith.constant 5 : index
    %c0_184 = arith.constant 0 : index
    %c0_185 = arith.constant 0 : index
    %c0_186 = arith.constant 0 : index
    %280 = vector.load %arg8[%c5_183, %c0_184, %c0_185, %c0_186] : memref<6x1x32x32xf32, #tpu.memory_space<vmem>>, vector<1x1x32x32xf32>
    %281 = vector.shape_cast %280 : vector<1x1x32x32xf32> to vector<32x32xf32>
    %282 = vector.shape_cast %279 : vector<32x32xf32> to vector<1x1x32x32xf32>
    tpu.vector_store %arg8[%c5_183, %c0_184, %c0_185, %c0_186], %282 {strides = array<i32>} : memref<6x1x32x32xf32, #tpu.memory_space<vmem>>, vector<1x1x32x32xf32>,
    return
  }
  func.func @transform_0(%arg0: i32) -> (i32, i32, i32) {
    %c0_i32 = arith.constant 0 : i32
    %c0_i32_0 = arith.constant 0 : i32
    %c0_i32_1 = arith.constant 0 : i32
    return %arg0, %c0_i32, %c0_i32_0 : i32, i32, i32
  }
  func.func @transform_1(%arg0: i32) -> (i32, i32, i32) {
    %c0_i32 = arith.constant 0 : i32
    %c0_i32_0 = arith.constant 0 : i32
    %c0_i32_1 = arith.constant 0 : i32
    %c0_i32_2 = arith.constant 0 : i32
    return %c0_i32, %c0_i32_0, %c0_i32_1 : i32, i32, i32
  }
  func.func @transform_2(%arg0: i32) -> (i32, i32, i32) {
    %c0_i32 = arith.constant 0 : i32
    %c0_i32_0 = arith.constant 0 : i32
    %c0_i32_1 = arith.constant 0 : i32
    %c0_i32_2 = arith.constant 0 : i32
    return %c0_i32, %c0_i32_0, %c0_i32_1 : i32, i32, i32
  }
  func.func @transform_3(%arg0: i32) -> (i32, i32, i32) {
    %c0_i32 = arith.constant 0 : i32
    %c0_i32_0 = arith.constant 0 : i32
    %c0_i32_1 = arith.constant 0 : i32
    %c0_i32_2 = arith.constant 0 : i32
    return %c0_i32, %c0_i32_0, %c0_i32_1 : i32, i32, i32
  }
  func.func @transform_4(%arg0: i32) -> (i32, i32, i32) {
    %c0_i32 = arith.constant 0 : i32
    %c0_i32_0 = arith.constant 0 : i32
    %c0_i32_1 = arith.constant 0 : i32
    %c0_i32_2 = arith.constant 0 : i32
    return %c0_i32, %c0_i32_0, %c0_i32_1 : i32, i32, i32
  }
  func.func @transform_5(%arg0: i32) -> (i32, i32, i32) {
    %c0_i32 = arith.constant 0 : i32
    %c0_i32_0 = arith.constant 0 : i32
    %c0_i32_1 = arith.constant 0 : i32
    %c0_i32_2 = arith.constant 0 : i32
    return %c0_i32, %c0_i32_0, %c0_i32_1 : i32, i32, i32
  }
  func.func @transform_6(%arg0: i32) -> (i32, i32, i32) {
    %c0_i32 = arith.constant 0 : i32
    %c0_i32_0 = arith.constant 0 : i32
    %c0_i32_1 = arith.constant 0 : i32
    %c0_i32_2 = arith.constant 0 : i32
    return %c0_i32, %c0_i32_0, %c0_i32_1 : i32, i32, i32
  }
  func.func @transform_7(%arg0: i32) -> (i32, i32, i32, i32) {
    %c0_i32 = arith.constant 0 : i32
    %c0_i32_0 = arith.constant 0 : i32
    %c0_i32_1 = arith.constant 0 : i32
    %c0_i32_2 = arith.constant 0 : i32
    return %c0_i32, %arg0, %c0_i32_0, %c0_i32_1 : i32, i32, i32, i32
  }
}

</mosaic_0001>

<bundles_post_ra>
// kernel: tpu_custom_call.1
= control target key start
LH: loop header
LB: loop body
LE: loop exit
PB: predicated region body
PF: predicated region fallthrough
CT: control target
= control target key end

     0   :  { %12 = vsyncpa [#allocation3], 0  ;;  %s6844_s0 = inlined_call_operand.vmem [shape: f32[2,64,32], index: 0, kind: input, shape index: {}]   ;;  %s6845_s1 = inlined_call_operand.vmem [shape: f32[6,32,32], index: 1, kind: input, shape index: {}]   ;;  %s6846_s2 = inlined_call_operand.hbm [shape: f32[6,32,32], index: 2, kind: input, shape index: {}]   ;;  %s6847_s3 = inlined_call_operand.hbm [shape: f32[6,32,32], index: 3, kind: input, shape index: {}]   ;;  %s6848_s4 = inlined_call_operand.vmem [shape: f32[6,1,32], index: 4, kind: input, shape index: {}]   ;;  %s6849_s5 = inlined_call_operand.hbm [shape: f32[6,32,32], index: 5, kind: input, shape index: {}]   ;;  %s6850_s6 = inlined_call_operand.hbm [shape: f32[6,1,32], index: 6, kind: input, shape index: {}]   ;;  %s6851_s7 = inlined_call_operand.hbm [shape: f32[6,2,32,32], index: 7, kind: output, shape index: {}]  }
   0x1   :  { %13 = vsyncpa [#allocation6], 0 }
   0x2   :  { %14 = vsyncpa [#allocation9], 0 }
   0x3   :  { %15 = vsyncpa [#allocation4], 0 }
   0x4   :  { %17 = vsyncpa [#allocation4 + $0x1], 0  ;;  %s5802_s24 = smov 0   ;;  %s5804_s25 = smov 0  }
   0x5   :  { %s5806_s26 = smov 0   ;;  %s5808_s27 = smov 0  }
   0x6 LB: > { %s5823_s28 = sadd.s32 4294967295, %s5743_s27   ;;  %s4368_s29 = sadd.s32 4294967294, %s5743_s27   ;;  %s5743_s27 = sphi %s5808_s27, %s6869_s27   ;;  %s5739_s26 = sphi %s5806_s26, %s6868_s26   ;;  %s5735_s25 = sphi %s5804_s25, %s6867_s25   ;;  %s5731_s24 = sphi %s5802_s24, %s6866_s24  }
   0x7   : > { %s5827_s30 = sadd.s32 1, %s5743_s27   ;;  %s182_s8 = sadd.s32 1, %s5739_s26 }
   0x8   : > { %s179_s9 = ssub.s32 %s5743_s27, %s5827_s30  ;;  %p192_p0 = scmp.ne.s32.totalorder %s5739_s26, %s5735_s25 }
   0x9   : > { %p180_p1 = scmp.eq.s32.totalorder %s179_s9, 0  ;;  %p193_p2 = scmp.eq.s32.totalorder %s5823_s28, 1 }
   0xa   : > { %p198_p3 = scmp.ne.s32.totalorder %s5735_s25, %s5731_s24  ;;  %p199_p4 = scmp.eq.s32.totalorder %s4368_s29, 1 }
   0xb   : > { %s5838_s10 = scalar_select %p180_p1, %s5739_s26, %s182_s8  }
   0xc   : > { %p5840_p5 = por %p193_p2, %p192_p0  ;;  %p5844_p6 = por %p199_p4, %p198_p3 }
   0xd   : > { %p4369_p7 = scmp.ge.s32.totalorder %s5743_s27, 1  ;;  %p206_p8 = scmp.lt.s32.totalorder %s5743_s27, 3 }
   0xe   : > { %s6854_s11 = scalar_select %p5840_p5, 1, 0 }
   0xf   : > { %s6855_s12 = scalar_select %p5844_p6, 1, 0 }
  0x10   : > { %p6852_p9 = scmp.eq.s32.totalorder %s5823_s28, 0  ;;  %p5851_p10 = pnand %p4369_p7, %p206_p8 }
  0x11   : > { %s5745_s14 = smov [#allocation5]   ;;  %s5746_s17 = smov [#allocation2]  }
  0x12   : > { %p5346_p11 = pneg %p5851_p10  ;;  %s234_s15 = sshll.u32 %s5745_s14, 4  ;;  %s235_s15 = int_to_ptr.vmem [resolvable:$true] %s234_s15 }
  0x13   : > { %s221_s18 = sshll.u32 %s5746_s17, 4  ;;  %s5747_s19 = smov [#allocation7]   ;;  %s222_s18 = int_to_ptr.vmem [resolvable:$true] %s221_s18 }
  0x14   : > { %p5859_p12 = pnand %p6852_p9, %p5346_p11  ;;  %s250_s20 = sshll.u32 %s5747_s19, 4  ;;  %s251_s20 = int_to_ptr.vmem [resolvable:$true] %s250_s20 }
  0x15   : > { %s5604_s21 = scalar_lea.vmem %s235_s15, 3072  ;;  %p5612_p3 = scmp.lt.s32.totalorder %s235_s15, %s235_s15 }
  0x16   : > { %p5595_p13 = pneg %p5859_p12  ;;  %p5605_p0 = scmp.ne.s32.totalorder %s235_s15, %s5604_s21 }
  0x17   : > { %p5613_p4 = scmp.lt.s32.totalorder %s5604_s21, %s5604_s21 }
  0x18   : > { %p5607_p1 = pnand %p5605_p0, %p5595_p13 }
  0x19   : > { %p5614_p7 = por %p5613_p4, %p5612_p3 }
  0x1a   : > { %p5608_p2 = pneg %p5607_p1 }
  0x1c   : > { %p5615_p8 = pnand %p5614_p7, %p5608_p2 }
  0x1e   : > { %5618 = shalt.err (!%p5615_p8)
}
  0x1f   : > { %s5748_s22 = smov 128   ;;  %s5749_s23 = smov 8  }
  0x20   : > { %5352 = dma.hbm_to_vmem [thread:$0]  (!%p5859_p12), %s6847_s3, 3072, %s235_s15, [#allocation6], %s5748_s22, %s5748_s22, %s5749_s23  }
  0x21   : > { %s5630_s9 = scalar_lea.vmem %s222_s18, 3072  ;;  %p5638_p9 = scmp.lt.s32.totalorder %s222_s18, %s222_s18 }
  0x22   : > { %p5631_p11 = scmp.ne.s32.totalorder %s222_s18, %s5630_s9  ;;  %p5639_p6 = scmp.lt.s32.totalorder %s5630_s9, %s5630_s9 }
  0x24   : > { %p5633_p0 = pnand %p5631_p11, %p5595_p13  ;;  %p5640_p3 = por %p5639_p6, %p5638_p9 }
  0x26   : > { %p5634_p1 = pneg %p5633_p0 }
  0x28   : > { %p5641_p2 = pnand %p5640_p3, %p5634_p1 }
  0x2a   : > { %5644 = shalt.err (!%p5641_p2)
}
  0x2b   : > { %5349 = dma.hbm_to_vmem [thread:$0]  (!%p5859_p12), %s6846_s2, 3072, %s222_s18, [#allocation3], %s5748_s22, %s5748_s22, %s5749_s23  }
  0x2c   : > { %s5656_s15 = scalar_lea.vmem %s251_s20, 3072  ;;  %p5664_p11 = scmp.lt.s32.totalorder %s251_s20, %s251_s20 }
  0x2d   : > { %p5657_p4 = scmp.ne.s32.totalorder %s251_s20, %s5656_s15  ;;  %p5665_p0 = scmp.lt.s32.totalorder %s5656_s15, %s5656_s15 }
  0x2f   : > { %p5659_p7 = pnand %p5657_p4, %p5595_p13  ;;  %p5666_p5 = por %p5665_p0, %p5664_p11 }
  0x31   : > { %p5660_p8 = pneg %p5659_p7 }
  0x33   : > { %p5667_p6 = pnand %p5666_p5, %p5660_p8 }
  0x35   : > { %5670 = shalt.err (!%p5667_p6)
}
  0x36   : > { %5355 = dma.hbm_to_vmem [thread:$0]  (!%p5859_p12), %s6849_s5, 3072, %s251_s20, [#allocation6], %s5748_s22, %s5748_s22, %s5749_s23  }
  0x37   : > { %s5750_s18 = smov [#allocation8]  }
  0x38   : > { %s263_s29 = sshll.u32 %s5750_s18, 4  ;;  %s264_s29 = int_to_ptr.vmem [resolvable:$true] %s263_s29 }
  0x39   : > { %s5682_s8 = scalar_lea.vmem %s264_s29, 96  ;;  %p5690_p2 = scmp.lt.s32.totalorder %s264_s29, %s264_s29 }
  0x3a   : > { %p5683_p9 = scmp.ne.s32.totalorder %s264_s29, %s5682_s8  ;;  %p5691_p4 = scmp.lt.s32.totalorder %s5682_s8, %s5682_s8 }
  0x3c   : > { %p5685_p1 = pnand %p5683_p9, %p5595_p13  ;;  %p5692_p5 = por %p5691_p4, %p5690_p2 }
  0x3e   : > { %p5686_p3 = pneg %p5685_p1 }
  0x40   : > { %p5693_p7 = pnand %p5692_p5, %p5686_p3 }
  0x42   : > { %5696 = shalt.err (!%p5693_p7)
}
  0x43   : > { %s5751_s9 = smov 16   ;;  %s5752_s14 = smov 1  }
  0x44   : > { %5358 = dma.hbm_to_vmem [thread:$0]  (!%p5859_p12), %s6850_s6, 96, %s264_s29, [#allocation9], %s5751_s9, %s5751_s9, %s5752_s14  }
  0x45   : > { %287 = sbr.rel (%p5851_p10) target bundleno = 2916 (0xb64), region = 48  ;;  %p6858_p8 = scmp.eq.s32.totalorder (!%p5851_p10), %s5823_s28, 0 }
  0x4a   : > { %5714 = dma.done.wait (%p6858_p8), [#allocation3], 3072   ;;  %p6859_p13 = pmov %p6858_p8 }
  0x4b   : > { %p6860_p11 = pmov %p6858_p8 }
  0x4c   : > { %5716 = vsyncadd (%p6859_p13), [#allocation3], 4294964224 }
  0x4d   : > { %5718 = dma.done.wait (%p6860_p11), [#allocation6], 6144   ;;  %p6861_p0 = pmov %p6858_p8 }
  0x4f   : > { %5720 = vsyncadd (%p6861_p0), [#allocation6], 4294961152  ;;  %p6862_p6 = pmov %p6861_p0 }
  0x50   : > { %p6863_p12 = pmov %p6861_p0 }
  0x51   : > { %5722 = dma.done.wait (%p6862_p6), [#allocation9], 96  }
  0x52   : > { %5724 = vsyncadd (%p6863_p12), [#allocation9], 4294967200  ;;  %p331_p10 = scmp.lt.s32.totalorder %s5823_s28, 1  ;;  %v481_v0 = vld [vmem:[#allocation2 + $0x18] sm:$0xff]  ;;  %v480_v2 = vld [vmem:[#allocation2 + $0x10] sm:$0xff]  ;;  %vm348_vm0 = vcmask 261120  }
  0x53   : > { %v347_v1 = vld [vmem:[%s6845_s1 + $0x18] sm:$0xff]  ;;  %4863 = vmatprep.subr.mxu1 %v481_v0  ;;  %v346_v3 = vld [vmem:[%s6845_s1 + $0x10] sm:$0xff]  ;;  %v479_v4 = vld [vmem:[#allocation2 + $0x8] sm:$0xff]  ;;  %vm595_vm1 = vcmask 1046528   ;;  %vm898_vm10 = vcmask 1040384   ;;  %vm1289_vm11 = vcmask 1045504  }
  0x54   : > { %s332_s13 = scalar_select %p331_p10, %s5823_s28, 1  ;;  %4843 = vmatprep.subr.mxu0 %v347_v1  ;;  %4864 = vmatpush3.msra.mxu1 %v481_v0  ;;  %v345_v5 = vld [vmem:[%s6845_s1 + $0x8] sm:$0xff]  ;;  %v478_v6 = vld [vmem:[#allocation2] sm:$0xff]  ;;  %v750_v16 = vld [vmem:[#allocation5 + $0x18] sm:$0xff] }
  0x55   : > { %4844 = vmatpush3.msra.mxu0 %v347_v1  ;;  %4865 = vmatprep.subr.mxu1 %v480_v2  ;;  %v344_v8 = vld [vmem:[%s6845_s1] sm:$0xff]  ;;  %v749_v17 = vld [vmem:[#allocation5 + $0x10] sm:$0xff]  ;;  %v748_v18 = vld [vmem:[#allocation5 + $0x8] sm:$0xff]  ;;  %s328_s18 = sand.u32 1, %s5735_s25  }
  0x56   : > { %s4595_s16 = sshll.u32 %s332_s13, 6  ;;  %4845 = vmatprep.subr.mxu0 %v346_v3  ;;  %4866 = vmatpush3.msra.mxu1 %v480_v2  ;;  %v747_v19 = vld [vmem:[#allocation5] sm:$0xff]  ;;  %v890_v20 = vld [vmem:[#allocation7 + $0x18] sm:$0xff]  ;;  %v889_v21 = vld [vmem:[#allocation7 + $0x10] sm:$0xff]  ;;  %s4229_s9 = scalar_lea.sflag [#allocation4], %s328_s18 }
  0x57   : > { %s5922_s29 = scalar_lea.vmem %s6844_s0, %s4595_s16  ;;  %4846 = vmatpush3.msra.mxu0 %v346_v3  ;;  %4867 = vmatprep.subr.mxu1 %v479_v4  ;;  %v888_v22 = vld [vmem:[#allocation7 + $0x8] sm:$0xff]  ;;  %v887_v23 = vld [vmem:[#allocation7] sm:$0xff]  ;;  %v5954_v24 = vld [vmem:[#allocation2 + $0x38] sm:$0xff] }
  0x58   : > { %v336_v7 = vld [vmem:[%s5922_s29] sm:$0xff]  ;;  %4847 = vmatprep.subr.mxu0 %v345_v5  ;;  %4868 = vmatpush3.msra.mxu1 %v479_v4  ;;  %v337_v9 = vld [vmem:[%s5922_s29 + $0x8] sm:$0xff]  ;;  %v338_v10 = vld [vmem:[%s5922_s29 + $0x10] sm:$0xff] }
  0x59   : > { %4848 = vmatpush3.msra.mxu0 %v345_v5  ;;  %4869 = vmatprep.subr.mxu1 %v478_v6  ;;  %v339_v11 = vld [vmem:[%s5922_s29 + $0x18] sm:$0xff]  ;;  %v340_v12 = vld [vmem:[%s5922_s29 + $0x20] sm:$0xff]  ;;  %v341_v13 = vld [vmem:[%s5922_s29 + $0x28] sm:$0xff] }
  0x5a   : > { %4871 = vmatprep.mubr.msk.f32.mxu1 %vm348_vm0, %v336_v7  ;;  %4870 = vmatpush3.msra.mxu1 %v478_v6  ;;  %v342_v14 = vld [vmem:[%s5922_s29 + $0x30] sm:$0xff]  ;;  %v343_v15 = vld [vmem:[%s5922_s29 + $0x38] sm:$0xff]  ;;  %s5321_s29 = smul.u32 192, %s328_s18 }
  0x5b   : > { %4849 = vmatprep.subr.mxu0 %v344_v8  ;;  %4872 = vmatmul.mubr.msk.f32.vlgmr.msra.gmra.mxu1 %vm348_vm0, %v337_v9  ;;  %v5960_v25 = vld [vmem:[%s6845_s1 + $0x38] sm:$0xff] }
  0x5c   : > { %4850 = vmatpush3.msra.mxu0 %v344_v8  ;;  %4851 = vmatprep.mubr.msk.f32.mxu0 %vm348_vm0, %v336_v7  ;;  %s6756_s8 = scalar_lea.vmem [#allocation10], %s5321_s29 }
  0x5d   : > { %4874 = vmatprep.mubr.msk.f32.mxu1 %vm348_vm0, %v338_v10  ;;  %4852 = vmatmul.mubr.msk.f32.vlgmr.msra.gmra.mxu0 %vm348_vm0, %v337_v9 }
  0x5e   : > { %4854 = vmatprep.mubr.msk.f32.mxu0 %vm348_vm0, %v338_v10  ;;  %4883 = vmatprep.subr.mxu0 %v750_v16 }
  0x5f   : > { %4875 = vmatmul.mubr.msk.f32.gmra.mxu1 %vm348_vm0, %v339_v11  ;;  %4884 = vmatpush3.msra.mxu0 %v750_v16 }
  0x60   : > { %4877 = vmatprep.mubr.msk.f32.mxu1 %vm348_vm0, %v340_v12  ;;  %4885 = vmatprep.subr.mxu0 %v749_v17 }
  0x61   : > { %4855 = vmatmul.mubr.msk.f32.gmra.mxu0 %vm348_vm0, %v339_v11  ;;  %4903 = vmatprep.subr.mxu1 %v890_v20 }
  0x62   : > { %4857 = vmatprep.mubr.msk.f32.mxu0 %vm348_vm0, %v340_v12  ;;  %4886 = vmatpush3.msra.mxu0 %v749_v17 }
  0x63   : > { %4878 = vmatmul.mubr.msk.f32.gmra.mxu1 %vm348_vm0, %v341_v13  ;;  %4887 = vmatprep.subr.mxu0 %v748_v18 }
  0x64   : > { %4880 = vmatprep.mubr.msk.f32.mxu1 %vm348_vm0, %v342_v14  ;;  %4888 = vmatpush3.msra.mxu0 %v748_v18 }
  0x65   : > { %4858 = vmatmul.mubr.msk.f32.gmra.mxu0 %vm348_vm0, %v341_v13  ;;  %4889 = vmatprep.subr.mxu0 %v747_v19 }
  0x66   : > { %4860 = vmatprep.mubr.msk.f32.mxu0 %vm348_vm0, %v342_v14  ;;  %4890 = vmatpush3.msra.mxu0 %v747_v19 }
  0x67   : > { %4881 = vmatmul.mubr.msk.f32.gmra.mxu1 %vm348_vm0, %v343_v15  ;;  %4937 = vmatprep.subr.mxu0 %v5954_v24 }
  0x68   : > { %4904 = vmatpush3.msra.mxu1 %v890_v20 }
  0x69   : > { %4861 = vmatmul.mubr.msk.f32.gmra.mxu0 %vm348_vm0, %v343_v15  ;;  %4905 = vmatprep.subr.mxu1 %v889_v21 }
  0x6a   : > { %4906 = vmatpush3.msra.mxu1 %v889_v21 }
  0x6b   : > { %4907 = vmatprep.subr.mxu1 %v888_v22 }
  0x6c   : > { %4908 = vmatpush3.msra.mxu1 %v888_v22 }
  0x6d   : > { %4909 = vmatprep.subr.mxu1 %v887_v23 }
  0x6e   : > { %4910 = vmatpush3.msra.mxu1 %v887_v23 }
  0x6f   : > { %4917 = vmatprep.subr.mxu1 %v5960_v25 }
 0x11b   : > { %v4873_v26 = vpop.f32.mrf.mxu1 }
 0x11c   : > { %v597_v29 = vrot.slane %v4873_v26, 1 }
 0x11d   : > { %v4853_v27 = vpop.f32.mrf.mxu0  ;;  %v548_v28 = vpop.f32.mrf.mxu1 }
 0x11e   : > { %v596_v30 = vrot.slane %v548_v28, 1 }
 0x11f   : > { %v439_v31 = vpop.f32.mrf.mxu0  ;;  %v4876_v32 = vpop.f32.mrf.mxu1 }
 0x120   : > { %v598_v33 = vsel %vm595_vm1, %v596_v30, %v597_v29  ;;  %v601_v37 = vrot.slane %v4876_v32, 1 }
 0x121   : > { %v5964_v34 = vadd.f32 %v598_v33, %v439_v31  ;;  %v4856_v35 = vpop.f32.mrf.mxu0  ;;  %v558_v36 = vpop.f32.mrf.mxu1 }
 0x122   : > { %v599_v38 = vrot.slane %v558_v36, 1 }
 0x123   : > { %v627_v39 = vand.u32 2147483647, %v5964_v34  ;;  %v449_v40 = vpop.f32.mrf.mxu0  ;;  %v4879_v41 = vpop.f32.mrf.mxu1  ;;  %vm675_vm2 = vcmp.ge.f32.partialorder %v5964_v34, 0.0 }
 0x124   : > { %v600_v42 = vsel %vm595_vm1, %v597_v29, %v599_v38  ;;  %v602_v43 = vsel %vm595_vm1, %v599_v38, %v601_v37  ;;  %v605_v49 = vrot.slane %v4879_v41, 1 }
 0x125   : > { %v635_v44 = vsub.f32 0.0, %v627_v39  ;;  %v5969_v45 = vadd.f32 %v4853_v27, %v600_v42  ;;  %v5971_v46 = vadd.f32 %v602_v43, %v449_v40  ;;  %v4859_v47 = vpop.f32.mrf.mxu0  ;;  %v568_v48 = vpop.f32.mrf.mxu1 }
 0x126   : > { %v603_v50 = vrot.slane %v568_v48, 1 }
 0x127   : > { %v643_v51 = vmul.f32 1.442695, %v635_v44  ;;  %v628_v52 = vand.u32 2147483647, %v5969_v45  ;;  %v459_v53 = vpop.f32.mrf.mxu0  ;;  %v4882_v54 = vpop.f32.mrf.mxu1  ;;  %v629_v55 = vand.u32 2147483647, %v5971_v46 }
 0x128   : > { %v604_v56 = vsel %vm595_vm1, %v601_v37, %v603_v50  ;;  %v606_v57 = vsel %vm595_vm1, %v603_v50, %v605_v49  ;;  %v609_v58 = vrot.slane %v4882_v54, 1  ;;  %vm676_vm3 = vcmp.ge.f32.partialorder %v5969_v45, 0.0 }
 0x129   : > { %5421 = vpow2.f32 %v643_v51  ;;  %v636_v59 = vsub.f32 0.0, %v628_v52  ;;  %v5977_v60 = vadd.f32 %v4856_v35, %v604_v56  ;;  %v5979_v61 = vadd.f32 %v606_v57, %v459_v53  ;;  %v4862_v62 = vpop.f32.mrf.mxu0  ;;  %v578_v63 = vpop.f32.mrf.mxu1 }
 0x12a   : > { %v637_v0 = vsub.f32 0.0, %v629_v55  ;;  %v5981_v1 = vadd.f32 %v4862_v62, %v609_v58  ;;  %v607_v2 = vrot.slane %v578_v63, 1  ;;  %vm677_vm4 = vcmp.ge.f32.partialorder %v5971_v46, 0.0 }
 0x12b   : > { %v645_v3 = vmul.f32 1.442695, %v636_v59  ;;  %v630_v4 = vand.u32 2147483647, %v5977_v60  ;;  %v631_v6 = vand.u32 2147483647, %v5979_v61  ;;  %v469_v9 = vpop.f32.mrf.mxu0 }
 0x12c   : > { %v647_v5 = vmul.f32 1.442695, %v637_v0  ;;  %v634_v7 = vand.u32 2147483647, %v5981_v1  ;;  %v608_v8 = vsel %vm595_vm1, %v605_v49, %v607_v2  ;;  %v610_v14 = vsel %vm595_vm1, %v607_v2, %v609_v58 }
 0x12d   : > { %5423 = vpow2.f32 %v645_v3  ;;  %v638_v10 = vsub.f32 0.0, %v630_v4  ;;  %v5987_v11 = vadd.f32 %v4859_v47, %v608_v8  ;;  %v639_v12 = vsub.f32 0.0, %v631_v6 }
 0x12e   : > { %5425 = vpow2.f32 %v647_v5  ;;  %v642_v13 = vsub.f32 0.0, %v634_v7  ;;  %v5991_v16 = vadd.f32 %v610_v14, %v469_v9  ;;  %vm679_vm5 = vcmp.ge.f32.partialorder %v5979_v61, 0.0 }
 0x12f   : > { %v632_v15 = vand.u32 2147483647, %v5987_v11  ;;  %v649_v17 = vmul.f32 1.442695, %v638_v10  ;;  %v651_v18 = vmul.f32 1.442695, %v639_v12 }
 0x130   : > { %v657_v19 = vmul.f32 1.442695, %v642_v13  ;;  %v633_v21 = vand.u32 2147483647, %v5991_v16  ;;  %vm681_vm6 = vcmp.ge.f32.partialorder %v5991_v16, 0.0  ;;  %vm678_vm7 = vcmp.ge.f32.partialorder %v5977_v60, 0.0 }
 0x131   : > { %v640_v20 = vsub.f32 0.0, %v632_v15  ;;  %5427 = vpow2.f32 %v651_v18  ;;  %vm680_vm8 = vcmp.ge.f32.partialorder %v5987_v11, 0.0  ;;  %vm682_vm9 = vcmp.ge.f32.partialorder %v5981_v1, 0.0 }
 0x132   : > { %5429 = vpow2.f32 %v657_v19  ;;  %v641_v22 = vsub.f32 0.0, %v633_v21 }
 0x133   : > { %5431 = vpow2.f32 %v649_v17  ;;  %v653_v23 = vmul.f32 1.442695, %v640_v20 }
 0x134   : > { %v655_v26 = vmul.f32 1.442695, %v641_v22 }
 0x136   : > { %v5422_v27 = vpop.eup %5421  ;;  %5433 = vpow2.f32 %v655_v26 }
 0x137   : > { %v659_v28 = vmul.f32 %v5422_v27, %v5422_v27  ;;  %5435 = vpow2.f32 %v653_v23  ;;  %v715_v30 = vadd.f32 1.0, %v5422_v27  ;;  %v683_v49 = vsub.f32 0.0, %v5422_v27 }
 0x139   : > { %v707_v29 = vadd.f32 1.0, %v659_v28  ;;  %v667_v54 = vsub.f32 1.0, %v659_v28  ;;  %v691_v58 = vsel %vm675_vm2, 1.0, %v683_v49 }
 0x13a   : > { %v5424_v31 = vpop.eup %5423 }
 0x13b   : > { %v5426_v32 = vpop.eup %5425  ;;  %v723_v33 = vmul.f32 %v715_v30, %v707_v29  ;;  %v660_v35 = vmul.f32 %v5424_v31, %v5424_v31  ;;  %v716_v38 = vadd.f32 1.0, %v5424_v31  ;;  %v684_v59 = vsub.f32 0.0, %v5424_v31  ;;  %v1174_v31 = vld [vmem:[#allocation2 + $0x30] sm:$0xff] }
 0x13c   : > { %v661_v36 = vmul.f32 %v5426_v32, %v5426_v32  ;;  %v717_v40 = vadd.f32 1.0, %v5426_v32  ;;  %v685_v34 = vsub.f32 0.0, %v5426_v32  ;;  %v699_v4 = vmul.f32 %v691_v58, %v667_v54 }
 0x13d   : > { %5437 = vrcp.f32 %v723_v33  ;;  %v708_v37 = vadd.f32 1.0, %v660_v35  ;;  %v668_v45 = vsub.f32 1.0, %v660_v35  ;;  %v692_v8 = vsel %vm676_vm3, 1.0, %v684_v59  ;;  %v1173_v35 = vld [vmem:[#allocation2 + $0x28] sm:$0xff] }
 0x13e   : > { %v709_v39 = vadd.f32 1.0, %v661_v36  ;;  %v5994_v41 = vpop.eup %5427  ;;  %v669_v13 = vsub.f32 1.0, %v661_v36  ;;  %v693_v19 = vsel %vm677_vm4, 1.0, %v685_v34 }
 0x13f   : > { %v724_v42 = vmul.f32 %v716_v38, %v708_v37  ;;  %v5996_v43 = vpop.eup %5429  ;;  %v6000_v47 = vmul.f32 %v5994_v41, %v5994_v41  ;;  %v719_v52 = vadd.f32 1.0, %v5994_v41  ;;  %v700_v21 = vmul.f32 %v692_v8, %v668_v45  ;;  %v4398_v45 = vld [vmem:[%s6848_s4] ss:$0 sm:$0xff] }
 0x140   : > { %v725_v44 = vmul.f32 %v717_v40, %v709_v39  ;;  %v6002_v48 = vpop.eup %5431  ;;  %v6006_v50 = vmul.f32 %v5996_v43, %v5996_v43  ;;  %v722_v0 = vadd.f32 1.0, %v5996_v43  ;;  %v687_v22 = vsub.f32 0.0, %v5994_v41 }
 0x141   : > { %5439 = vrcp.f32 %v724_v42  ;;  %v711_v51 = vadd.f32 1.0, %v6000_v47  ;;  %v6015_v56 = vmul.f32 %v6002_v48, %v6002_v48  ;;  %v718_v6 = vadd.f32 1.0, %v6002_v48 }
 0x142   : > { %5441 = vrcp.f32 %v725_v44  ;;  %v714_v62 = vadd.f32 1.0, %v6006_v50  ;;  %v701_v26 = vmul.f32 %v693_v19, %v669_v13  ;;  %v671_v30 = vsub.f32 1.0, %v6000_v47 }
 0x143   : > { %v6010_v53 = vpop.eup %5433  ;;  %v727_v55 = vmul.f32 %v719_v52, %v711_v51  ;;  %v710_v5 = vadd.f32 1.0, %v6015_v56  ;;  %v686_v32 = vsub.f32 0.0, %v6002_v48  ;;  %v695_v33 = vsel %vm679_vm5, 1.0, %v687_v22 }
 0x144   : > { %v6017_v57 = vpop.eup %5435  ;;  %v6022_v63 = vmul.f32 %v6010_v53, %v6010_v53  ;;  %v721_v3 = vadd.f32 1.0, %v6010_v53  ;;  %v730_v9 = vmul.f32 %v722_v0, %v714_v62  ;;  %v689_v46 = vsub.f32 0.0, %v6010_v53 }
 0x145   : > { %5443 = vrcp.f32 %v727_v55  ;;  %v6033_v7 = vmul.f32 %v6017_v57, %v6017_v57  ;;  %v726_v14 = vmul.f32 %v718_v6, %v710_v5  ;;  %v720_v17 = vadd.f32 1.0, %v6017_v57  ;;  %v1172_v5 = vld [vmem:[#allocation2 + $0x20] sm:$0xff]  ;;  %v4413_v6 = vld [vmem:[%s6845_s1 + $0x28] sm:$0xff] }
 0x146   : > { %v713_v2 = vadd.f32 1.0, %v6022_v63  ;;  %v688_v37 = vsub.f32 0.0, %v6017_v57  ;;  %v673_v38 = vsub.f32 1.0, %v6022_v63  ;;  %v703_v61 = vmul.f32 %v695_v33, %v671_v30 }
 0x147   : > { %v712_v15 = vadd.f32 1.0, %v6033_v7  ;;  %v697_v39 = vsel %vm681_vm6, 1.0, %v689_v46  ;;  %v670_v40 = vsub.f32 1.0, %v6015_v56  ;;  %v694_v41 = vsel %vm678_vm7, 1.0, %v686_v32 }
 0x148   : > { %v729_v10 = vmul.f32 %v721_v3, %v713_v2  ;;  %v690_v42 = vsub.f32 0.0, %v5996_v43  ;;  %v672_v44 = vsub.f32 1.0, %v6033_v7  ;;  %v696_v47 = vsel %vm680_vm8, 1.0, %v688_v37  ;;  %v1444_v37 = vld [vmem:[#allocation5 + $0x30] sm:$0xff] }
 0x149   : > { %v728_v20 = vmul.f32 %v720_v17, %v712_v15  ;;  %v705_v16 = vmul.f32 %v697_v39, %v673_v38  ;;  %v674_v60 = vsub.f32 1.0, %v6006_v50  ;;  %v702_v49 = vmul.f32 %v694_v41, %v670_v40  ;;  %v1443_v38 = vld [vmem:[#allocation5 + $0x28] sm:$0xff]  ;;  %v1587_v39 = vld [vmem:[#allocation7 + $0x38] sm:$0xff]  ;;  %v1586_v40 = vld [vmem:[#allocation7 + $0x30] sm:$0xff] }
 0x14a   : > { %v5438_v12 = vpop.eup %5437  ;;  %5445 = vrcp.f32 %v729_v10  ;;  %v698_v52 = vsel %vm682_vm9, 1.0, %v690_v42  ;;  %v704_v56 = vmul.f32 %v696_v47, %v672_v44  ;;  %v1585_v41 = vld [vmem:[#allocation7 + $0x28] sm:$0xff]  ;;  %v1584_v42 = vld [vmem:[#allocation7 + $0x20] sm:$0xff]  ;;  %v6106_v44 = vld [vmem:[%s6845_s1 + $0x58] sm:$0xff]  ;;  %vm1596_vm6 = vcmask 1042432  }
 0x14b   : > { %v732_v18 = vmul.f32 %v5438_v12, %v699_v4  ;;  %5447 = vrcp.f32 %v726_v14  ;;  %v706_v11 = vmul.f32 %v698_v52, %v674_v60  ;;  %v4414_v4 = vld [vmem:[%s6845_s1 + $0x30] sm:$0xff]  ;;  %vm1988_vm7 = vcmask 1043456  }
 0x14c   : > { %5449 = vrcp.f32 %v730_v9 }
 0x14d   : > { %4891 = vmatprep.mubr.msk.f32.mxu0 %vm348_vm0, %v732_v18  ;;  %5451 = vrcp.f32 %v728_v20 }
 0x14e   : > { %v5440_v23 = vpop.eup %5439 }
 0x14f   : > { %v5442_v27 = vpop.eup %5441  ;;  %v734_v28 = vmul.f32 %v5440_v23, %v700_v21  ;;  %v4407_v21 = vld [vmem:[#allocation8] ss:$0 sm:$0xff] }
 0x150   : > { %v736_v29 = vmul.f32 %v5442_v27, %v701_v26 }
 0x151   : > { %4892 = vmatmul.mubr.msk.f32.vlgmr.msra.gmra.mxu0 %vm348_vm0, %v734_v28 }
 0x152   : > { %4894 = vmatprep.mubr.msk.f32.mxu0 %vm348_vm0, %v736_v29  ;;  %4938 = vmatpush3.msra.mxu0 %v5954_v24  ;;  %v5444_v36 = vpop.eup %5443 }
 0x153   : > { %4939 = vmatprep.subr.mxu0 %v1174_v31  ;;  %v740_v24 = vmul.f32 %v5444_v36, %v703_v61  ;;  %v1445_v36 = vld [vmem:[#allocation5 + $0x38] sm:$0xff]  ;;  %v1442_v61 = vld [vmem:[#allocation5 + $0x20] sm:$0xff] }
 0x154   : > { %4940 = vmatpush3.msra.mxu0 %v1174_v31 }
 0x155   : > { %4941 = vmatprep.subr.mxu0 %v1173_v35  ;;  %v900_v55 = vrot.slane %v740_v24, 7 }
 0x156   : > { %4942 = vmatpush3.msra.mxu0 %v1173_v35 }
 0x157   : > { %v5446_v48 = vpop.eup %5445  ;;  %4943 = vmatprep.subr.mxu0 %v1172_v5 }
 0x158   : > { %v5448_v51 = vpop.eup %5447  ;;  %v744_v53 = vmul.f32 %v5446_v48, %v705_v16  ;;  %4944 = vmatpush3.msra.mxu0 %v1172_v5 }
 0x159   : > { %v5450_v54 = vpop.eup %5449  ;;  %v738_v43 = vmul.f32 %v5448_v51, %v702_v49  ;;  %4977 = vmatprep.subr.mxu0 %v1587_v39 }
 0x15a   : > { %v5452_v57 = vpop.eup %5451  ;;  %v904_v62 = vrot.slane %v744_v53, 7  ;;  %v746_v50 = vmul.f32 %v5450_v54, %v706_v11 }
 0x15b   : > { %4895 = vmatmul.mubr.msk.f32.gmra.mxu0 %vm348_vm0, %v738_v43  ;;  %v899_v58 = vrot.slane %v738_v43, 7  ;;  %v742_v59 = vmul.f32 %v5452_v57, %v704_v56 }
 0x15c   : > { %4897 = vmatprep.mubr.msk.f32.mxu0 %vm348_vm0, %v740_v24  ;;  %v906_v2 = vrot.slane %v746_v50, 7  ;;  %v6100_v24 = vld [vmem:[#allocation2 + $0x58] sm:$0xff] }
 0x15d   : > { %v901_v1 = vsel %vm898_vm10, %v899_v58, %v900_v55  ;;  %v902_v63 = vrot.slane %v742_v59, 7 }
 0x15e   : > { %4911 = vmatprep.mubr.msk.f32.mxu1 %vm348_vm0, %v901_v1  ;;  %v907_v3 = vsel %vm898_vm10, %v904_v62, %v906_v2 }
 0x15f   : > { %4898 = vmatmul.mubr.msk.f32.gmra.mxu0 %vm348_vm0, %v742_v59  ;;  %v903_v34 = vsel %vm898_vm10, %v900_v55, %v902_v63  ;;  %v905_v0 = vsel %vm898_vm10, %v902_v63, %v904_v62 }
 0x160   : > { %4900 = vmatprep.mubr.msk.f32.mxu0 %vm348_vm0, %v744_v53  ;;  %4912 = vmatmul.mubr.msk.f32.vlgmr.msra.gmra.mxu1 %vm348_vm0, %v903_v34 }
 0x161   : > { %4914 = vmatprep.mubr.msk.f32.mxu1 %vm348_vm0, %v905_v0  ;;  %4918 = vmatpush3.msra.mxu1 %v5960_v25  ;;  %v4412_v25 = vld [vmem:[%s6845_s1 + $0x20] sm:$0xff] }
 0x162   : > { %4919 = vmatprep.subr.mxu1 %v4414_v4 }
 0x163   : > { %4901 = vmatmul.mubr.msk.f32.gmra.mxu0 %vm348_vm0, %v746_v50  ;;  %4920 = vmatpush3.msra.mxu1 %v4414_v4 }
 0x164   : > { %4915 = vmatmul.mubr.msk.f32.gmra.mxu1 %vm348_vm0, %v907_v3  ;;  %4921 = vmatprep.subr.mxu1 %v4413_v6 }
 0x165   : > { %4922 = vmatpush3.msra.mxu1 %v4413_v6 }
 0x166   : > { %4923 = vmatprep.subr.mxu1 %v4412_v25 }
 0x167   : > { %4924 = vmatpush3.msra.mxu1 %v4412_v25 }
 0x168   : > { %4957 = vmatprep.subr.mxu1 %v1445_v36 }
 0x211   : > { %v4893_v7 = vpop.f32.mrf.mxu0 }
 0x212   : > { %v854_v10 = vadd.f32 %v4893_v7, %v4398_v45 }
 0x213   : > { %v848_v8 = vpop.f32.mrf.mxu0 }
 0x214   : > { %v849_v9 = vadd.f32 %v4398_v45, %v848_v8 }
 0x216   : > { %4925 = vmatprep.mubr.msk.f32.mxu1 %vm348_vm0, %v849_v9  ;;  %4945 = vmatprep.mubr.msk.f32.mxu0 %vm348_vm0, %v849_v9 }
 0x217   : > { %4926 = vmatmul.mubr.msk.f32.vlgmr.msra.gmra.mxu1 %vm348_vm0, %v854_v10  ;;  %4946 = vmatmul.mubr.msk.f32.vlgmr.msra.gmra.mxu0 %vm348_vm0, %v854_v10 }
 0x218   : > { %4958 = vmatpush3.msra.mxu1 %v1445_v36  ;;  %4978 = vmatpush3.msra.mxu0 %v1587_v39 }
 0x219   : > { %4959 = vmatprep.subr.mxu1 %v1444_v37  ;;  %4979 = vmatprep.subr.mxu0 %v1586_v40 }
 0x21a   : > { %4960 = vmatpush3.msra.mxu1 %v1444_v37  ;;  %4980 = vmatpush3.msra.mxu0 %v1586_v40 }
 0x21b   : > { %v4896_v12 = vpop.f32.mrf.mxu0  ;;  %4961 = vmatprep.subr.mxu1 %v1443_v38  ;;  %4981 = vmatprep.subr.mxu0 %v1585_v41 }
 0x21c   : > { %v864_v15 = vadd.f32 %v4896_v12, %v4398_v45  ;;  %4962 = vmatpush3.msra.mxu1 %v1443_v38  ;;  %4982 = vmatpush3.msra.mxu0 %v1585_v41 }
 0x21d   : > { %v858_v13 = vpop.f32.mrf.mxu0  ;;  %4963 = vmatprep.subr.mxu1 %v1442_v61  ;;  %4983 = vmatprep.subr.mxu0 %v1584_v42 }
 0x21e   : > { %v859_v14 = vadd.f32 %v4398_v45, %v858_v13  ;;  %4964 = vmatpush3.msra.mxu1 %v1442_v61  ;;  %4984 = vmatpush3.msra.mxu0 %v1584_v42 }
 0x21f   : > { %v4899_v17 = vpop.f32.mrf.mxu0  ;;  %5011 = vmatprep.subr.mxu1 %v6100_v24  ;;  %4991 = vmatprep.subr.mxu0 %v6106_v44 }
 0x220   : > { %4928 = vmatprep.mubr.msk.f32.mxu1 %vm348_vm0, %v859_v14  ;;  %4948 = vmatprep.mubr.msk.f32.mxu0 %vm348_vm0, %v859_v14  ;;  %v4913_v18 = vpop.f32.mrf.mxu1  ;;  %v874_v23 = vadd.f32 %v4899_v17, %v4398_v45 }
 0x221   : > { %v868_v19 = vpop.f32.mrf.mxu0  ;;  %4929 = vmatmul.mubr.msk.f32.gmra.mxu1 %vm348_vm0, %v864_v15  ;;  %4949 = vmatmul.mubr.msk.f32.gmra.mxu0 %vm348_vm0, %v864_v15  ;;  %v988_v31 = vadd.f32 %v4913_v18, %v4407_v21 }
 0x222   : > { %v869_v20 = vadd.f32 %v4398_v45, %v868_v19  ;;  %v982_v22 = vpop.f32.mrf.mxu1 }
 0x223   : > { %v4902_v26 = vpop.f32.mrf.mxu0  ;;  %v983_v27 = vadd.f32 %v4407_v21, %v982_v22 }
 0x224   : > { %4931 = vmatprep.mubr.msk.f32.mxu1 %vm348_vm0, %v869_v20  ;;  %4951 = vmatprep.mubr.msk.f32.mxu0 %vm348_vm0, %v869_v20  ;;  %v4916_v29 = vpop.f32.mrf.mxu1  ;;  %v884_v46 = vadd.f32 %v4902_v26, %v4398_v45 }
 0x225   : > { %v878_v28 = vpop.f32.mrf.mxu0  ;;  %4932 = vmatmul.mubr.msk.f32.gmra.mxu1 %vm348_vm0, %v874_v23  ;;  %4952 = vmatmul.mubr.msk.f32.gmra.mxu0 %vm348_vm0, %v874_v23  ;;  %v998_v35 = vadd.f32 %v4916_v29, %v4407_v21 }
 0x226   : > { %v879_v30 = vadd.f32 %v4398_v45, %v878_v28  ;;  %1001 = vxpose.xlu0.b32.start [1/4] (short) (narrow) %v983_v27, 32  ;;  %v992_v32 = vpop.f32.mrf.mxu1 }
 0x227   : > { %v993_v33 = vadd.f32 %v4407_v21, %v992_v32 }
 0x228   : > { %4934 = vmatprep.mubr.msk.f32.mxu1 %vm348_vm0, %v879_v30  ;;  %4954 = vmatprep.mubr.msk.f32.mxu0 %vm348_vm0, %v879_v30 }
 0x229   : > { %4935 = vmatmul.mubr.msk.f32.gmra.mxu1 %vm348_vm0, %v884_v46  ;;  %4955 = vmatmul.mubr.msk.f32.gmra.mxu0 %vm348_vm0, %v884_v46 }
 0x22a   : > { %1002 = vxpose.xlu0.b32.cont [2/4] (short) (narrow) %v988_v31, 32 }
 0x22e   : > { %1003 = vxpose.xlu0.b32.cont [3/4] (short) (narrow) %v993_v33, 32 }
 0x232   : > { %1004 = vxpose.xlu0.b32.end [4/4] (short) (narrow) %v998_v35, 32 }
 0x2d7   : > { %v4947_v47 = vpop.f32.mrf.mxu0  ;;  %v4927_v16 = vpop.f32.mrf.mxu1 }
 0x2d8   : > { %v1291_v60 = vrot.slane %v4947_v47, 2 }
 0x2d9   : > { %v1242_v48 = vpop.f32.mrf.mxu0  ;;  %v1132_v51 = vpop.f32.mrf.mxu1 }
 0x2da   : > { %v1290_v49 = vrot.slane %v1242_v48, 2 }
 0x2dc   : > { %v1292_v52 = vsel %vm1289_vm11, %v1290_v49, %v1291_v60 }
 0x2dd   : > { %v6110_v53 = vadd.f32 %v1292_v52, %v1132_v51 }
 0x2df   : > { %v1321_v54 = vand.u32 2147483647, %v6110_v53  ;;  %vm1369_vm12 = vcmp.ge.f32.partialorder %v6110_v53, 0.0 }
 0x2e1   : > { %v1329_v43 = vsub.f32 0.0, %v1321_v54  ;;  %v4930_v55 = vpop.f32.mrf.mxu1  ;;  %v4950_v56 = vpop.f32.mrf.mxu0 }
 0x2e2   : > { %v1295_v59 = vrot.slane %v4950_v56, 2 }
 0x2e3   : > { %v1337_v57 = vmul.f32 1.442695, %v1329_v43  ;;  %v1142_v11 = vpop.f32.mrf.mxu1  ;;  %v1252_v58 = vpop.f32.mrf.mxu0 }
 0x2e4   : > { %v1293_v62 = vrot.slane %v1252_v58, 2 }
 0x2e5   : > { %5453 = vpow2.f32 %v1337_v57  ;;  %v4933_v50 = vpop.f32.mrf.mxu1  ;;  %v4953_v1 = vpop.f32.mrf.mxu0 }
 0x2e6   : > { %v1294_v63 = vsel %vm1289_vm11, %v1291_v60, %v1293_v62  ;;  %v1296_v34 = vsel %vm1289_vm11, %v1293_v62, %v1295_v59  ;;  %v1299_v5 = vrot.slane %v4953_v1, 2 }
 0x2e7   : > { %v6115_v0 = vadd.f32 %v4927_v16, %v1294_v63  ;;  %v6117_v2 = vadd.f32 %v1296_v34, %v1142_v11  ;;  %v1152_v3 = vpop.f32.mrf.mxu1  ;;  %v1262_v4 = vpop.f32.mrf.mxu0 }
 0x2e8   : > { %v1297_v6 = vrot.slane %v1262_v4, 2 }
 0x2e9   : > { %v1322_v25 = vand.u32 2147483647, %v6115_v0  ;;  %v1323_v7 = vand.u32 2147483647, %v6117_v2  ;;  %v4956_v45 = vpop.f32.mrf.mxu0  ;;  %v4936_v17 = vpop.f32.mrf.mxu1  ;;  %vm1370_vm13 = vcmp.ge.f32.partialorder %v6115_v0, 0.0  ;;  %vm1371_vm14 = vcmp.ge.f32.partialorder %v6117_v2, 0.0 }
 0x2ea   : > { %v1298_v8 = vsel %vm1289_vm11, %v1295_v59, %v1297_v6  ;;  %v1300_v9 = vsel %vm1289_vm11, %v1297_v6, %v1299_v5  ;;  %v1303_v10 = vrot.slane %v4956_v45, 2 }
 0x2eb   : > { %v1330_v12 = vsub.f32 0.0, %v1322_v25  ;;  %v1331_v13 = vsub.f32 0.0, %v1323_v7  ;;  %v6123_v14 = vadd.f32 %v4930_v55, %v1298_v8  ;;  %v6125_v15 = vadd.f32 %v1300_v9, %v1152_v3  ;;  %v1272_v18 = vpop.f32.mrf.mxu0  ;;  %v1162_v31 = vpop.f32.mrf.mxu1 }
 0x2ec   : > { %v6127_v19 = vadd.f32 %v4936_v17, %v1303_v10  ;;  %v1301_v20 = vrot.slane %v1272_v18, 2 }
 0x2ed   : > { %v1339_v21 = vmul.f32 1.442695, %v1330_v12  ;;  %v1341_v22 = vmul.f32 1.442695, %v1331_v13  ;;  %v1324_v23 = vand.u32 2147483647, %v6123_v14 }
 0x2ee   : > { %v1325_v26 = vand.u32 2147483647, %v6125_v15  ;;  %v1328_v27 = vand.u32 2147483647, %v6127_v19  ;;  %v1302_v29 = vsel %vm1289_vm11, %v1299_v5, %v1301_v20  ;;  %v1304_v32 = vsel %vm1289_vm11, %v1301_v20, %v1303_v10 }
 0x2ef   : > { %5455 = vpow2.f32 %v1339_v21  ;;  %v1332_v28 = vsub.f32 0.0, %v1324_v23  ;;  %v6134_v36 = vadd.f32 %v4933_v50, %v1302_v29  ;;  %v6136_v37 = vadd.f32 %v1304_v32, %v1162_v31 }
 0x2f0   : > { %5457 = vpow2.f32 %v1341_v22  ;;  %v1333_v30 = vsub.f32 0.0, %v1325_v26  ;;  %v1336_v46 = vsub.f32 0.0, %v1328_v27  ;;  %vm1372_vm15 = vcmp.ge.f32.partialorder %v6123_v14, 0.0 }
 0x2f1   : > { %v1343_v35 = vmul.f32 1.442695, %v1332_v28  ;;  %v1326_v40 = vand.u32 2147483647, %v6134_v36  ;;  %v1327_v41 = vand.u32 2147483647, %v6136_v37 }
 0x2f2   : > { %v5454_v33 = vpop.eup %5453  ;;  %v1345_v38 = vmul.f32 1.442695, %v1333_v30  ;;  %v1351_v61 = vmul.f32 1.442695, %v1336_v46  ;;  %vm1373_vm2 = vcmp.ge.f32.partialorder %v6125_v15, 0.0  ;;  %vm1374_vm3 = vcmp.ge.f32.partialorder %v6134_v36, 0.0 }
 0x2f3   : > { %v1353_v39 = vmul.f32 %v5454_v33, %v5454_v33  ;;  %5459 = vpow2.f32 %v1343_v35  ;;  %v1334_v42 = vsub.f32 0.0, %v1326_v40  ;;  %v1335_v47 = vsub.f32 0.0, %v1327_v41 }
 0x2f4   : > { %5461 = vpow2.f32 %v1351_v61  ;;  %v1409_v48 = vadd.f32 1.0, %v5454_v33  ;;  %v1377_v58 = vsub.f32 0.0, %v5454_v33  ;;  %vm1376_vm4 = vcmp.ge.f32.partialorder %v6127_v19, 0.0 }
 0x2f5   : > { %v1401_v16 = vadd.f32 1.0, %v1353_v39  ;;  %5463 = vpow2.f32 %v1345_v38  ;;  %v1347_v60 = vmul.f32 1.442695, %v1334_v42  ;;  %v1349_v49 = vmul.f32 1.442695, %v1335_v47 }
 0x2f6   : > { %v1361_v5 = vsub.f32 1.0, %v1353_v39  ;;  %v1385_v6 = vsel %vm1369_vm12, 1.0, %v1377_v58  ;;  %vm1375_vm5 = vcmp.ge.f32.partialorder %v6136_v37, 0.0 }
 0x2f7   : > { %v1417_v51 = vmul.f32 %v1409_v48, %v1401_v16  ;;  %5465 = vpow2.f32 %v1347_v60 }
 0x2f8   : > { %5467 = vpow2.f32 %v1349_v49  ;;  %v1393_v12 = vmul.f32 %v1385_v6, %v1361_v5 }
 0x2f9   : > { %5469 = vrcp.f32 %v1417_v51  ;;  %v1873_v51 = vld [vmem:[#allocation2 + $0x50] sm:$0xff] }
 0x2fc   : > { %v5456_v52 = vpop.eup %5455 }
 0x2fd   : > { %v5458_v54 = vpop.eup %5457  ;;  %v1354_v43 = vmul.f32 %v5456_v52, %v5456_v52  ;;  %v1410_v57 = vadd.f32 1.0, %v5456_v52  ;;  %v1378_v10 = vsub.f32 0.0, %v5456_v52 }
 0x2fe   : > { %v1355_v55 = vmul.f32 %v5458_v54, %v5458_v54  ;;  %v1411_v62 = vadd.f32 1.0, %v5458_v54  ;;  %v1379_v23 = vsub.f32 0.0, %v5458_v54 }
 0x2ff   : > { %v1402_v56 = vadd.f32 1.0, %v1354_v43  ;;  %v1362_v29 = vsub.f32 1.0, %v1354_v43  ;;  %v1386_v32 = vsel %vm1370_vm13, 1.0, %v1378_v10 }
 0x300   : > { %v6140_v11 = vpop.eup %5459  ;;  %v1403_v59 = vadd.f32 1.0, %v1355_v55  ;;  %v1363_v33 = vsub.f32 1.0, %v1355_v55  ;;  %v1387_v0 = vsel %vm1371_vm14, 1.0, %v1379_v23  ;;  %v1872_v55 = vld [vmem:[#allocation2 + $0x48] sm:$0xff]  ;;  %v1871_v23 = vld [vmem:[#allocation2 + $0x40] sm:$0xff] }
 0x301   : > { %v1418_v50 = vmul.f32 %v1410_v57, %v1402_v56  ;;  %v6144_v1 = vmul.f32 %v6140_v11, %v6140_v11  ;;  %v6146_v63 = vpop.eup %5461  ;;  %v1412_v7 = vadd.f32 1.0, %v6140_v11  ;;  %v1394_v39 = vmul.f32 %v1386_v32, %v1362_v29 }
 0x302   : > { %v1419_v34 = vmul.f32 %v1411_v62, %v1403_v59  ;;  %v6148_v3 = vpop.eup %5463  ;;  %v6153_v4 = vmul.f32 %v6146_v63, %v6146_v63  ;;  %v1416_v18 = vadd.f32 1.0, %v6146_v63  ;;  %v1380_v40 = vsub.f32 0.0, %v6140_v11 }
 0x303   : > { %5471 = vrcp.f32 %v1418_v50  ;;  %v1404_v25 = vadd.f32 1.0, %v6144_v1  ;;  %v6162_v9 = vmul.f32 %v6148_v3, %v6148_v3  ;;  %v1413_v21 = vadd.f32 1.0, %v6148_v3 }
 0x304   : > { %5473 = vrcp.f32 %v1419_v34  ;;  %v6157_v45 = vpop.eup %5465  ;;  %v1408_v8 = vadd.f32 1.0, %v6153_v4  ;;  %v1395_v47 = vmul.f32 %v1387_v0, %v1363_v33  ;;  %v1381_v2 = vsub.f32 0.0, %v6148_v3 }
 0x305   : > { %v6164_v53 = vpop.eup %5467  ;;  %v1420_v13 = vmul.f32 %v1412_v7, %v1404_v25  ;;  %v1405_v20 = vadd.f32 1.0, %v6162_v9  ;;  %v6171_v22 = vmul.f32 %v6157_v45, %v6157_v45  ;;  %v1414_v46 = vadd.f32 1.0, %v6157_v45 }
 0x306   : > { %v5470_v17 = vpop.eup %5469  ;;  %v1424_v27 = vmul.f32 %v1416_v18, %v1408_v8  ;;  %v6179_v31 = vmul.f32 %v6164_v53, %v6164_v53  ;;  %v1415_v61 = vadd.f32 1.0, %v6164_v53  ;;  %v1364_v49 = vsub.f32 1.0, %v6144_v1 }
 0x307   : > { %v1426_v26 = vmul.f32 %v5470_v17, %v1393_v12  ;;  %5475 = vrcp.f32 %v1420_v13  ;;  %v1421_v28 = vmul.f32 %v1413_v21, %v1405_v20  ;;  %v1406_v30 = vadd.f32 1.0, %v6171_v22 }
 0x308   : > { %v1407_v38 = vadd.f32 1.0, %v6179_v31  ;;  %v1388_v52 = vsel %vm1372_vm15, 1.0, %v1380_v40  ;;  %v1382_v54 = vsub.f32 0.0, %v6157_v45  ;;  %v1365_v43 = vsub.f32 1.0, %v6162_v9 }
 0x309   : > { %4965 = vmatprep.mubr.msk.f32.mxu1 %vm348_vm0, %v1426_v26  ;;  %5477 = vrcp.f32 %v1421_v28  ;;  %v1422_v35 = vmul.f32 %v1414_v46, %v1406_v30  ;;  %v1389_v56 = vsel %vm1373_vm2, 1.0, %v1381_v2  ;;  %v1384_v14 = vsub.f32 0.0, %v6146_v63  ;;  %v4452_v26 = vld [vmem:[%s6845_s1 + $0x48] sm:$0xff]  ;;  %v4433_v28 = vld [vmem:[%s6848_s4 + $0x1] ss:$0 sm:$0xff] }
 0x30a   : > { %5479 = vrcp.f32 %v1424_v27  ;;  %v1423_v41 = vmul.f32 %v1415_v61, %v1407_v38  ;;  %v1383_v57 = vsub.f32 0.0, %v6164_v53  ;;  %v1396_v11 = vmul.f32 %v1388_v52, %v1364_v49 }
 0x30b   : > { %5481 = vrcp.f32 %v1422_v35  ;;  %v1366_v15 = vsub.f32 1.0, %v6171_v22  ;;  %v1390_v59 = vsel %vm1374_vm3, 1.0, %v1382_v54  ;;  %v1397_v50 = vmul.f32 %v1389_v56, %v1365_v43  ;;  %v4453_v22 = vld [vmem:[%s6845_s1 + $0x50] sm:$0xff] }
 0x30c   : > { %5483 = vrcp.f32 %v1423_v41  ;;  %v1368_v1 = vsub.f32 1.0, %v6153_v4  ;;  %v1367_v63 = vsub.f32 1.0, %v6179_v31  ;;  %v1392_v34 = vsel %vm1376_vm4, 1.0, %v1384_v14  ;;  %v2143_v56 = vld [vmem:[#allocation5 + $0x50] sm:$0xff]  ;;  %v2142_v14 = vld [vmem:[#allocation5 + $0x48] sm:$0xff] }
 0x30d   : > { %v1391_v3 = vsel %vm1375_vm5, 1.0, %v1383_v57  ;;  %v1398_v25 = vmul.f32 %v1390_v59, %v1366_v15  ;;  %v2141_v57 = vld [vmem:[#allocation5 + $0x40] sm:$0xff]  ;;  %v2284_v15 = vld [vmem:[#allocation7 + $0x48] sm:$0xff]  ;;  %vm5754_vm3 = vmmov 0  }
 0x30e   : > { %v1400_v4 = vmul.f32 %v1392_v34, %v1368_v1  ;;  %v1399_v19 = vmul.f32 %v1391_v3, %v1367_v63  ;;  %v2283_v59 = vld [vmem:[#allocation7 + $0x40] sm:$0xff] }
 0x310   : > { %v5472_v42 = vpop.eup %5471 }
 0x311   : > { %v5474_v16 = vpop.eup %5473  ;;  %v1428_v48 = vmul.f32 %v5472_v42, %v1394_v39  ;;  %v4442_v42 = vld [vmem:[#allocation8 + $0x1] ss:$0 sm:$0xff] }
 0x312   : > { %v1430_v60 = vmul.f32 %v5474_v16, %v1395_v47 }
 0x313   : > { %4966 = vmatmul.mubr.msk.f32.vlgmr.msra.gmra.mxu1 %vm348_vm0, %v1428_v48 }
 0x314   : > { %4968 = vmatprep.mubr.msk.f32.mxu1 %vm348_vm0, %v1430_v60  ;;  %5012 = vmatpush3.msra.mxu1 %v6100_v24  ;;  %v5476_v58 = vpop.eup %5475 }
 0x315   : > { %5013 = vmatprep.subr.mxu1 %v1873_v51  ;;  %v1432_v62 = vmul.f32 %v5476_v58, %v1396_v11  ;;  %v2286_v11 = vld [vmem:[#allocation7 + $0x58] sm:$0xff]  ;;  %v2285_v58 = vld [vmem:[#allocation7 + $0x50] sm:$0xff] }
 0x316   : > { %5014 = vmatpush3.msra.mxu1 %v1873_v51  ;;  %v5478_v24 = vpop.eup %5477 }
 0x317   : > { %5015 = vmatprep.subr.mxu1 %v1872_v55  ;;  %4969 = vmatmul.mubr.msk.f32.gmra.mxu1 %vm348_vm0, %v1432_v62  ;;  %v1434_v36 = vmul.f32 %v5478_v24, %v1397_v50  ;;  %v1597_v5 = vrot.slane %v1432_v62, 5  ;;  %v5480_v6 = vpop.eup %5479  ;;  %v6244_v62 = vld [vmem:[#allocation2 + $0x78] sm:$0xff] }
 0x318   : > { %5016 = vmatpush3.msra.mxu1 %v1872_v55  ;;  %v5482_v7 = vpop.eup %5481  ;;  %v1440_v12 = vmul.f32 %v5480_v6, %v1400_v4  ;;  %v2144_v55 = vld [vmem:[#allocation5 + $0x58] sm:$0xff] }
 0x319   : > { %4971 = vmatprep.mubr.msk.f32.mxu1 %vm348_vm0, %v1434_v36  ;;  %v1598_v45 = vrot.slane %v1434_v36, 5  ;;  %v1436_v8 = vmul.f32 %v5482_v7, %v1398_v25  ;;  %v5484_v9 = vpop.eup %5483  ;;  %5017 = vmatprep.subr.mxu1 %v1871_v23  ;;  %v6250_v50 = vld [vmem:[%s6845_s1 + $0x78] sm:$0xff] }
 0x31a   : > { %v1438_v10 = vmul.f32 %v5484_v9, %v1399_v19  ;;  %v1604_v20 = vrot.slane %v1440_v12, 5  ;;  %5018 = vmatpush3.msra.mxu1 %v1871_v23 }
 0x31b   : > { %v1599_v37 = vsel %vm1596_vm6, %v1597_v5, %v1598_v45  ;;  %4972 = vmatmul.mubr.msk.f32.gmra.mxu1 %vm348_vm0, %v1436_v8  ;;  %v1600_v53 = vrot.slane %v1436_v8, 5  ;;  %5051 = vmatprep.subr.mxu1 %v2286_v11 }
 0x31c   : > { %4985 = vmatprep.mubr.msk.f32.mxu0 %vm348_vm0, %v1599_v37  ;;  %4974 = vmatprep.mubr.msk.f32.mxu1 %vm348_vm0, %v1438_v10  ;;  %v1602_v17 = vrot.slane %v1438_v10, 5 }
 0x31d   : > { %v1601_v13 = vsel %vm1596_vm6, %v1598_v45, %v1600_v53 }
 0x31e   : > { %4986 = vmatmul.mubr.msk.f32.vlgmr.msra.gmra.mxu0 %vm348_vm0, %v1601_v13  ;;  %v1603_v18 = vsel %vm1596_vm6, %v1600_v53, %v1602_v17  ;;  %v1605_v21 = vsel %vm1596_vm6, %v1602_v17, %v1604_v20 }
 0x31f   : > { %4975 = vmatmul.mubr.msk.f32.gmra.mxu1 %vm348_vm0, %v1440_v12  ;;  %4992 = vmatpush3.msra.mxu0 %v6106_v44  ;;  %v4451_v44 = vld [vmem:[%s6845_s1 + $0x40] sm:$0xff] }
 0x320   : > { %4988 = vmatprep.mubr.msk.f32.mxu0 %vm348_vm0, %v1603_v18  ;;  %4993 = vmatprep.subr.mxu0 %v4453_v22 }
 0x321   : > { %4994 = vmatpush3.msra.mxu0 %v4453_v22 }
 0x322   : > { %4989 = vmatmul.mubr.msk.f32.gmra.mxu0 %vm348_vm0, %v1605_v21  ;;  %4995 = vmatprep.subr.mxu0 %v4452_v26 }
 0x323   : > { %4996 = vmatpush3.msra.mxu0 %v4452_v26 }
 0x324   : > { %4997 = vmatprep.subr.mxu0 %v4451_v44 }
 0x325   : > { %4998 = vmatpush3.msra.mxu0 %v4451_v44 }
 0x326   : > { %5031 = vmatprep.subr.mxu0 %v2144_v55 }
 0x3d3   : > { %v4967_v27 = vpop.f32.mrf.mxu1 }
 0x3d4   : > { %v1550_v46 = vadd.f32 %v4967_v27, %v4433_v28 }
 0x3d5   : > { %v1544_v29 = vpop.f32.mrf.mxu1 }
 0x3d6   : > { %v1545_v30 = vadd.f32 %v4433_v28, %v1544_v29 }
 0x3d7   : > { %v4970_v31 = vpop.f32.mrf.mxu1 }
 0x3d8   : > { %4999 = vmatprep.mubr.msk.f32.mxu0 %vm348_vm0, %v1545_v30  ;;  %5019 = vmatprep.mubr.msk.f32.mxu1 %vm348_vm0, %v1545_v30  ;;  %v1560_v0 = vadd.f32 %v4970_v31, %v4433_v28 }
 0x3d9   : > { %5000 = vmatmul.mubr.msk.f32.vlgmr.msra.gmra.mxu0 %vm348_vm0, %v1550_v46  ;;  %5020 = vmatmul.mubr.msk.f32.vlgmr.msra.gmra.mxu1 %vm348_vm0, %v1550_v46  ;;  %v1554_v32 = vpop.f32.mrf.mxu1 }
 0x3da   : > { %v1555_v33 = vadd.f32 %v4433_v28, %v1554_v32  ;;  %5032 = vmatpush3.msra.mxu0 %v2144_v55  ;;  %5052 = vmatpush3.msra.mxu1 %v2286_v11 }
 0x3db   : > { %v4973_v35 = vpop.f32.mrf.mxu1  ;;  %5033 = vmatprep.subr.mxu0 %v2143_v56  ;;  %5053 = vmatprep.subr.mxu1 %v2285_v58 }
 0x3dc   : > { %5002 = vmatprep.mubr.msk.f32.mxu0 %vm348_vm0, %v1555_v33  ;;  %5022 = vmatprep.mubr.msk.f32.mxu1 %vm348_vm0, %v1555_v33  ;;  %v1570_v40 = vadd.f32 %v4973_v35, %v4433_v28 }
 0x3dd   : > { %5003 = vmatmul.mubr.msk.f32.gmra.mxu0 %vm348_vm0, %v1560_v0  ;;  %5023 = vmatmul.mubr.msk.f32.gmra.mxu1 %vm348_vm0, %v1560_v0  ;;  %v1564_v38 = vpop.f32.mrf.mxu1 }
 0x3de   : > { %v1565_v61 = vadd.f32 %v4433_v28, %v1564_v38  ;;  %v4987_v39 = vpop.f32.mrf.mxu0  ;;  %5034 = vmatpush3.msra.mxu0 %v2143_v56  ;;  %5054 = vmatpush3.msra.mxu1 %v2285_v58 }
 0x3df   : > { %v4976_v41 = vpop.f32.mrf.mxu1  ;;  %v1686_v51 = vadd.f32 %v4987_v39, %v4442_v42  ;;  %5035 = vmatprep.subr.mxu0 %v2142_v14  ;;  %5055 = vmatprep.subr.mxu1 %v2284_v15 }
 0x3e0   : > { %v1680_v47 = vpop.f32.mrf.mxu0  ;;  %5005 = vmatprep.mubr.msk.f32.mxu0 %vm348_vm0, %v1565_v61  ;;  %5025 = vmatprep.mubr.msk.f32.mxu1 %vm348_vm0, %v1565_v61  ;;  %v1580_v49 = vadd.f32 %v4976_v41, %v4433_v28 }
 0x3e1   : > { %v1574_v16 = vpop.f32.mrf.mxu1  ;;  %5006 = vmatmul.mubr.msk.f32.gmra.mxu0 %vm348_vm0, %v1570_v40  ;;  %5026 = vmatmul.mubr.msk.f32.gmra.mxu1 %vm348_vm0, %v1570_v40  ;;  %v1681_v48 = vadd.f32 %v4442_v42, %v1680_v47 }
 0x3e2   : > { %v1575_v2 = vadd.f32 %v4433_v28, %v1574_v16  ;;  %v4990_v60 = vpop.f32.mrf.mxu0  ;;  %5036 = vmatpush3.msra.mxu0 %v2142_v14  ;;  %5056 = vmatpush3.msra.mxu1 %v2284_v15 }
 0x3e3   : > { %1699 = vxpose.xlu1.b32.start [1/4] (short) (narrow) %v1681_v48, 32  ;;  %v1696_v43 = vadd.f32 %v4990_v60, %v4442_v42  ;;  %5037 = vmatprep.subr.mxu0 %v2141_v57 }
 0x3e4   : > { %5008 = vmatprep.mubr.msk.f32.mxu0 %vm348_vm0, %v1575_v2  ;;  %5028 = vmatprep.mubr.msk.f32.mxu1 %vm348_vm0, %v1575_v2  ;;  %v1690_v52 = vpop.f32.mrf.mxu0 }
 0x3e5   : > { %5009 = vmatmul.mubr.msk.f32.gmra.mxu0 %vm348_vm0, %v1580_v49  ;;  %5029 = vmatmul.mubr.msk.f32.gmra.mxu1 %vm348_vm0, %v1580_v49  ;;  %v1691_v54 = vadd.f32 %v4442_v42, %v1690_v52 }
 0x3e6   : > { %5038 = vmatpush3.msra.mxu0 %v2141_v57  ;;  %5057 = vmatprep.subr.mxu1 %v2283_v59 }
 0x3e7   : > { %1700 = vxpose.xlu1.b32.cont [2/4] (short) (narrow) %v1686_v51, 32  ;;  %5058 = vmatpush3.msra.mxu1 %v2283_v59 }
 0x3e8   : > { %5085 = vmatprep.subr.mxu0 %v6244_v62  ;;  %5065 = vmatprep.subr.mxu1 %v6250_v50 }
 0x3eb   : > { %1701 = vxpose.xlu1.b32.cont [3/4] (short) (narrow) %v1691_v54, 32 }
 0x3ef   : > { %1702 = vxpose.xlu1.b32.end [4/4] (short) (narrow) %v1696_v43, 32 }
 0x499   : > { %v5001_v24 = vpop.f32.mrf.mxu0  ;;  %v5021_v1 = vpop.f32.mrf.mxu1 }
 0x49a   : > { %v1990_v34 = vrot.slane %v5021_v1, 4 }
 0x49b   : > { %v1941_v63 = vpop.f32.mrf.mxu1  ;;  %v1831_v3 = vpop.f32.mrf.mxu0 }
 0x49c   : > { %v1989_v36 = vrot.slane %v1941_v63, 4 }
 0x49d   : > { %v5004_v25 = vpop.f32.mrf.mxu0  ;;  %v5024_v7 = vpop.f32.mrf.mxu1 }
 0x49e   : > { %v1991_v5 = vsel %vm1988_vm7, %v1989_v36, %v1990_v34  ;;  %v1994_v9 = vrot.slane %v5024_v7, 4 }
 0x49f   : > { %v6254_v6 = vadd.f32 %v1991_v5, %v1831_v3  ;;  %v1841_v4 = vpop.f32.mrf.mxu0  ;;  %v1951_v8 = vpop.f32.mrf.mxu1 }
 0x4a0   : > { %v1992_v37 = vrot.slane %v1951_v8, 4 }
 0x4a1   : > { %v2020_v45 = vand.u32 2147483647, %v6254_v6  ;;  %v5007_v13 = vpop.f32.mrf.mxu0  ;;  %v5027_v17 = vpop.f32.mrf.mxu1  ;;  %vm2068_vm8 = vcmp.ge.f32.partialorder %v6254_v6, 0.0 }
 0x4a2   : > { %v1993_v10 = vsel %vm1988_vm7, %v1990_v34, %v1992_v37  ;;  %v1995_v12 = vsel %vm1988_vm7, %v1992_v37, %v1994_v9  ;;  %v1998_v44 = vrot.slane %v5027_v17, 4 }
 0x4a3   : > { %v2028_v19 = vsub.f32 0.0, %v2020_v45  ;;  %v6259_v18 = vadd.f32 %v5001_v24, %v1993_v10  ;;  %v6261_v20 = vadd.f32 %v1995_v12, %v1841_v4  ;;  %v1961_v21 = vpop.f32.mrf.mxu1  ;;  %v1851_v26 = vpop.f32.mrf.mxu0 }
 0x4a4   : > { %v1996_v27 = vrot.slane %v1961_v21, 4 }
 0x4a5   : > { %v2036_v53 = vmul.f32 1.442695, %v2028_v19  ;;  %v2021_v22 = vand.u32 2147483647, %v6259_v18  ;;  %v2022_v23 = vand.u32 2147483647, %v6261_v20  ;;  %v5030_v28 = vpop.f32.mrf.mxu1  ;;  %v5010_v39 = vpop.f32.mrf.mxu0 }
 0x4a6   : > { %v2002_v46 = vrot.slane %v5030_v28, 4  ;;  %v1997_v31 = vsel %vm1988_vm7, %v1994_v9, %v1996_v27  ;;  %v1999_v32 = vsel %vm1988_vm7, %v1996_v27, %v1998_v44  ;;  %vm2069_vm9 = vcmp.ge.f32.partialorder %v6259_v18, 0.0 }
 0x4a7   : > { %5485 = vpow2.f32 %v2036_v53  ;;  %v2029_v29 = vsub.f32 0.0, %v2021_v22  ;;  %v2030_v30 = vsub.f32 0.0, %v2022_v23  ;;  %v1971_v33 = vpop.f32.mrf.mxu1  ;;  %v6267_v38 = vadd.f32 %v5004_v25, %v1997_v31  ;;  %v1861_v60 = vpop.f32.mrf.mxu0 }
 0x4a8   : > { %v6269_v61 = vadd.f32 %v1999_v32, %v1851_v26  ;;  %v6271_v40 = vadd.f32 %v5010_v39, %v2002_v46  ;;  %v2000_v41 = vrot.slane %v1971_v33, 4  ;;  %vm2070_vm10 = vcmp.ge.f32.partialorder %v6261_v20, 0.0 }
 0x4a9   : > { %v2038_v0 = vmul.f32 1.442695, %v2029_v29  ;;  %v2040_v35 = vmul.f32 1.442695, %v2030_v30  ;;  %v2023_v42 = vand.u32 2147483647, %v6267_v38 }
 0x4aa   : > { %v2024_v47 = vand.u32 2147483647, %v6269_v61  ;;  %v2027_v16 = vand.u32 2147483647, %v6271_v40  ;;  %v2001_v49 = vsel %vm1988_vm7, %v1998_v44, %v2000_v41  ;;  %v2003_v51 = vsel %vm1988_vm7, %v2000_v41, %v2002_v46 }
 0x4ab   : > { %5487 = vpow2.f32 %v2038_v0  ;;  %v2031_v48 = vsub.f32 0.0, %v2023_v42  ;;  %v6278_v54 = vadd.f32 %v5007_v13, %v2001_v49  ;;  %v6280_v43 = vadd.f32 %v2003_v51, %v1861_v60 }
 0x4ac   : > { %5489 = vpow2.f32 %v2040_v35  ;;  %v2032_v2 = vsub.f32 0.0, %v2024_v47  ;;  %v2035_v52 = vsub.f32 0.0, %v2027_v16  ;;  %vm2071_vm12 = vcmp.ge.f32.partialorder %v6267_v38, 0.0 }
 0x4ad   : > { %v2042_v55 = vmul.f32 1.442695, %v2031_v48  ;;  %v2025_v57 = vand.u32 2147483647, %v6278_v54  ;;  %v2026_v11 = vand.u32 2147483647, %v6280_v43 }
 0x4ae   : > { %v2044_v56 = vmul.f32 1.442695, %v2032_v2  ;;  %v2050_v14 = vmul.f32 1.442695, %v2035_v52  ;;  %vm2072_vm13 = vcmp.ge.f32.partialorder %v6269_v61, 0.0  ;;  %vm2073_vm14 = vcmp.ge.f32.partialorder %v6278_v54, 0.0 }
 0x4af   : > { %5491 = vpow2.f32 %v2042_v55  ;;  %v2033_v15 = vsub.f32 0.0, %v2025_v57  ;;  %v2034_v59 = vsub.f32 0.0, %v2026_v11  ;;  %vm2075_vm15 = vcmp.ge.f32.partialorder %v6271_v40, 0.0 }
 0x4b0   : > { %5493 = vpow2.f32 %v2044_v56  ;;  %vm2074_vm2 = vcmp.ge.f32.partialorder %v6280_v43, 0.0 }
 0x4b1   : > { %5495 = vpow2.f32 %v2050_v14  ;;  %v2046_v1 = vmul.f32 1.442695, %v2033_v15  ;;  %v2048_v63 = vmul.f32 1.442695, %v2034_v59 }
 0x4b3   : > { %5497 = vpow2.f32 %v2046_v1 }
 0x4b4   : > { %v5486_v58 = vpop.eup %5485  ;;  %5499 = vpow2.f32 %v2048_v63 }
 0x4b5   : > { %v2052_v24 = vmul.f32 %v5486_v58, %v5486_v58  ;;  %v2108_v3 = vadd.f32 1.0, %v5486_v58  ;;  %v2076_v10 = vsub.f32 0.0, %v5486_v58 }
 0x4b7   : > { %v2100_v34 = vadd.f32 1.0, %v2052_v24  ;;  %v2060_v26 = vsub.f32 1.0, %v2052_v24  ;;  %v2084_v44 = vsel %vm2068_vm8, 1.0, %v2076_v10 }
 0x4b8   : > { %v5488_v5 = vpop.eup %5487 }
 0x4b9   : > { %v2116_v36 = vmul.f32 %v2108_v3, %v2100_v34  ;;  %v5490_v25 = vpop.eup %5489  ;;  %v2053_v7 = vmul.f32 %v5488_v5, %v5488_v5  ;;  %v2109_v8 = vadd.f32 1.0, %v5488_v5  ;;  %v2077_v30 = vsub.f32 0.0, %v5488_v5 }
 0x4ba   : > { %v2054_v45 = vmul.f32 %v5490_v25, %v5490_v25  ;;  %v2110_v9 = vadd.f32 1.0, %v5490_v25  ;;  %v2078_v0 = vsub.f32 0.0, %v5490_v25  ;;  %v2092_v39 = vmul.f32 %v2084_v44, %v2060_v26 }
 0x4bb   : > { %5501 = vrcp.f32 %v2116_v36  ;;  %v2101_v4 = vadd.f32 1.0, %v2053_v7  ;;  %v2061_v47 = vsub.f32 1.0, %v2053_v7  ;;  %v2085_v48 = vsel %vm2069_vm9, 1.0, %v2077_v30  ;;  %v2570_v36 = vld [vmem:[#allocation2 + $0x70] sm:$0xff]  ;;  %v2569_v7 = vld [vmem:[#allocation2 + $0x68] sm:$0xff] }
 0x4bc   : > { %v2102_v19 = vadd.f32 1.0, %v2054_v45  ;;  %v5492_v53 = vpop.eup %5491  ;;  %v2062_v49 = vsub.f32 1.0, %v2054_v45  ;;  %v2086_v55 = vsel %vm2070_vm10, 1.0, %v2078_v0 }
 0x4bd   : > { %v2117_v37 = vmul.f32 %v2109_v8, %v2101_v4  ;;  %v6284_v13 = vpop.eup %5493  ;;  %v6286_v17 = vmul.f32 %v5492_v53, %v5492_v53  ;;  %v2111_v28 = vadd.f32 1.0, %v5492_v53  ;;  %v2093_v57 = vmul.f32 %v2085_v48, %v2061_v47  ;;  %v4491_v47 = vld [vmem:[%s6845_s1 + $0x68] sm:$0xff]  ;;  %v4472_v48 = vld [vmem:[%s6848_s4 + $0x2] ss:$0 sm:$0xff] }
 0x4be   : > { %v2118_v12 = vmul.f32 %v2110_v9, %v2102_v19  ;;  %v6288_v21 = vpop.eup %5495  ;;  %v6292_v22 = vmul.f32 %v6284_v13, %v6284_v13  ;;  %v2112_v32 = vadd.f32 1.0, %v6284_v13  ;;  %v2079_v11 = vsub.f32 0.0, %v5492_v53 }
 0x4bf   : > { %5503 = vrcp.f32 %v2117_v37  ;;  %v6297_v23 = vmul.f32 %v6288_v21, %v6288_v21  ;;  %v2103_v27 = vadd.f32 1.0, %v6286_v17  ;;  %v2115_v35 = vadd.f32 1.0, %v6288_v21 }
 0x4c0   : > { %5505 = vrcp.f32 %v2118_v12  ;;  %v6300_v29 = vpop.eup %5497  ;;  %v2104_v31 = vadd.f32 1.0, %v6292_v22  ;;  %v2094_v59 = vmul.f32 %v2086_v55, %v2062_v49  ;;  %v2080_v63 = vsub.f32 0.0, %v6284_v13 }
 0x4c1   : > { %v2107_v46 = vadd.f32 1.0, %v6297_v23  ;;  %v6305_v33 = vpop.eup %5499  ;;  %v2119_v6 = vmul.f32 %v2111_v28, %v2103_v27  ;;  %v6312_v16 = vmul.f32 %v6300_v29, %v6300_v29  ;;  %v2113_v52 = vadd.f32 1.0, %v6300_v29 }
 0x4c2   : > { %v2120_v41 = vmul.f32 %v2112_v32, %v2104_v31  ;;  %v6316_v18 = vmul.f32 %v6305_v33, %v6305_v33  ;;  %v2114_v56 = vadd.f32 1.0, %v6305_v33  ;;  %v2063_v3 = vsub.f32 1.0, %v6286_v17 }
 0x4c3   : > { %5507 = vrcp.f32 %v2119_v6  ;;  %v2123_v2 = vmul.f32 %v2115_v35, %v2107_v46  ;;  %v2105_v51 = vadd.f32 1.0, %v6312_v16  ;;  %v2087_v5 = vsel %vm2071_vm12, 1.0, %v2079_v11 }
 0x4c4   : > { %5509 = vrcp.f32 %v2120_v41  ;;  %v2106_v20 = vadd.f32 1.0, %v6316_v18  ;;  %v2064_v25 = vsub.f32 1.0, %v6292_v22  ;;  %v2088_v45 = vsel %vm2072_vm13, 1.0, %v2080_v63  ;;  %v4492_v41 = vld [vmem:[%s6845_s1 + $0x70] sm:$0xff] }
 0x4c5   : > { %v2121_v14 = vmul.f32 %v2113_v52, %v2105_v51  ;;  %5511 = vrcp.f32 %v2123_v2  ;;  %v2081_v4 = vsub.f32 0.0, %v6300_v29  ;;  %v2082_v38 = vsub.f32 0.0, %v6305_v33 }
 0x4c6   : > { %v2122_v58 = vmul.f32 %v2114_v56, %v2106_v20  ;;  %v2095_v8 = vmul.f32 %v2087_v5, %v2063_v3  ;;  %v2083_v9 = vsub.f32 0.0, %v6288_v21  ;;  %v2096_v37 = vmul.f32 %v2088_v45, %v2064_v25 }
 0x4c7   : > { %5513 = vrcp.f32 %v2121_v14  ;;  %v2065_v53 = vsub.f32 1.0, %v6312_v16  ;;  %v2089_v10 = vsel %vm2073_vm14, 1.0, %v2081_v4  ;;  %v2066_v12 = vsub.f32 1.0, %v6316_v18  ;;  %v2823_v4 = vld [vmem:[#allocation5 + $0x78] sm:$0xff] }
 0x4c8   : > { %v5502_v42 = vpop.eup %5501  ;;  %5515 = vrcp.f32 %v2122_v58  ;;  %v2067_v13 = vsub.f32 1.0, %v6297_v23  ;;  %v2090_v17 = vsel %vm2074_vm2, 1.0, %v2082_v38  ;;  %v2091_v22 = vsel %vm2075_vm15, 1.0, %v2083_v9  ;;  %v2822_v38 = vld [vmem:[#allocation5 + $0x70] sm:$0xff]  ;;  %v2957_v9 = vld [vmem:[#allocation7 + $0x78] sm:$0xff] }
 0x4c9   : > { %v2125_v60 = vmul.f32 %v5502_v42, %v2092_v39  ;;  %v2097_v27 = vmul.f32 %v2089_v10, %v2065_v53  ;;  %v2098_v40 = vmul.f32 %v2090_v17, %v2066_v12  ;;  %v2568_v42 = vld [vmem:[#allocation2 + $0x60] sm:$0xff]  ;;  %v5753_v45 = vmov 0.0  }
 0x4ca   : > { %v2099_v43 = vmul.f32 %v2091_v22, %v2067_v13  ;;  %v2954_v53 = vld [vmem:[#allocation7 + $0x60] sm:$0xff] }
 0x4cb   : > { %5039 = vmatprep.mubr.msk.f32.mxu0 %vm348_vm0, %v2125_v60 }
 0x4cc   : > { %v5504_v15 = vpop.eup %5503 }
 0x4cd   : > { %v5506_v24 = vpop.eup %5505  ;;  %v2127_v1 = vmul.f32 %v5504_v15, %v2093_v57  ;;  %v4481_v15 = vld [vmem:[#allocation8 + $0x2] ss:$0 sm:$0xff] }
 0x4ce   : > { %v2129_v34 = vmul.f32 %v5506_v24, %v2094_v59 }
 0x4cf   : > { %5040 = vmatmul.mubr.msk.f32.vlgmr.msra.gmra.mxu0 %vm348_vm0, %v2127_v1 }
 0x4d0   : > { %5042 = vmatprep.mubr.msk.f32.mxu0 %vm348_vm0, %v2129_v34  ;;  %5086 = vmatpush3.msra.mxu0 %v6244_v62  ;;  %v5508_v19 = vpop.eup %5507 }
 0x4d1   : > { %5087 = vmatprep.subr.mxu0 %v2570_v36  ;;  %v2131_v61 = vmul.f32 %v5508_v19, %v2095_v8  ;;  %v5510_v62 = vpop.eup %5509  ;;  %v2821_v8 = vld [vmem:[#allocation5 + $0x68] sm:$0xff]  ;;  %v2820_v19 = vld [vmem:[#allocation5 + $0x60] sm:$0xff] }
 0x4d2   : > { %5088 = vmatpush3.msra.mxu0 %v2570_v36  ;;  %v2133_v21 = vmul.f32 %v5510_v62, %v2096_v37  ;;  %v5512_v26 = vpop.eup %5511  ;;  %v2955_v37 = vld [vmem:[#allocation7 + $0x68] sm:$0xff] }
 0x4d3   : > { %5089 = vmatprep.subr.mxu0 %v2569_v7  ;;  %5043 = vmatmul.mubr.msk.f32.gmra.mxu0 %vm348_vm0, %v2131_v61  ;;  %v2295_v54 = vrot.slane %v2131_v61, 1  ;;  %v2139_v32 = vmul.f32 %v5512_v26, %v2099_v43  ;;  %v2956_v61 = vld [vmem:[#allocation7 + $0x70] sm:$0xff] }
 0x4d4   : > { %5090 = vmatpush3.msra.mxu0 %v2569_v7  ;;  %5045 = vmatprep.mubr.msk.f32.mxu0 %vm348_vm0, %v2133_v21  ;;  %v2296_v44 = vrot.slane %v2133_v21, 1  ;;  %v5514_v28 = vpop.eup %5513 }
 0x4d5   : > { %v5516_v29 = vpop.eup %5515  ;;  %v2135_v46 = vmul.f32 %v5514_v28, %v2097_v27  ;;  %v2302_v35 = vrot.slane %v2139_v32, 1  ;;  %5091 = vmatprep.subr.mxu0 %v2568_v42 }
 0x4d6   : > { %v2297_v30 = vsel %vm595_vm1, %v2295_v54, %v2296_v44  ;;  %v2137_v23 = vmul.f32 %v5516_v29, %v2098_v40  ;;  %5092 = vmatpush3.msra.mxu0 %v2568_v42 }
 0x4d7   : > { %5059 = vmatprep.mubr.msk.f32.mxu1 %vm348_vm0, %v2297_v30  ;;  %5046 = vmatmul.mubr.msk.f32.gmra.mxu0 %vm348_vm0, %v2135_v46  ;;  %v2298_v31 = vrot.slane %v2135_v46, 1 }
 0x4d8   : > { %5048 = vmatprep.mubr.msk.f32.mxu0 %vm348_vm0, %v2137_v23  ;;  %v2300_v33 = vrot.slane %v2137_v23, 1  ;;  %5134 = vmatprep.subr.mxu0 %v2957_v9 }
 0x4d9   : > { %v2299_v6 = vsel %vm595_vm1, %v2296_v44, %v2298_v31 }
 0x4da   : > { %5060 = vmatmul.mubr.msk.f32.vlgmr.msra.gmra.mxu1 %vm348_vm0, %v2299_v6  ;;  %v2301_v0 = vsel %vm595_vm1, %v2298_v31, %v2300_v33  ;;  %v2303_v39 = vsel %vm595_vm1, %v2300_v33, %v2302_v35 }
 0x4db   : > { %5049 = vmatmul.mubr.msk.f32.gmra.mxu0 %vm348_vm0, %v2139_v32  ;;  %5062 = vmatprep.mubr.msk.f32.mxu1 %vm348_vm0, %v2301_v0 }
 0x4dc   : > { %5066 = vmatpush3.msra.mxu1 %v6250_v50  ;;  %v4490_v50 = vld [vmem:[%s6845_s1 + $0x60] sm:$0xff] }
 0x4dd   : > { %5067 = vmatprep.subr.mxu1 %v4492_v41 }
 0x4de   : > { %5063 = vmatmul.mubr.msk.f32.gmra.mxu1 %vm348_vm0, %v2303_v39 }
 0x4df   : > { %5068 = vmatpush3.msra.mxu1 %v4492_v41 }
 0x4e0   : > { %5069 = vmatprep.subr.mxu1 %v4491_v47 }
 0x4e1   : > { %5070 = vmatpush3.msra.mxu1 %v4491_v47 }
 0x4e2   : > { %5071 = vmatprep.subr.mxu1 %v4490_v50 }
 0x4e3   : > { %5072 = vmatpush3.msra.mxu1 %v4490_v50 }
 0x4e4   : > { %5105 = vmatprep.subr.mxu1 %v5753_v45 }
 0x58f   : > { %v5041_v16 = vpop.f32.mrf.mxu0 }
 0x590   : > { %v2249_v18 = vadd.f32 %v5041_v16, %v4472_v48 }
 0x591   : > { %v2243_v2 = vpop.f32.mrf.mxu0 }
 0x592   : > { %v2244_v60 = vadd.f32 %v4472_v48, %v2243_v2 }
 0x593   : > { %v5044_v49 = vpop.f32.mrf.mxu0 }
 0x594   : > { %5073 = vmatprep.mubr.msk.f32.mxu1 %vm348_vm0, %v2244_v60  ;;  %5093 = vmatprep.mubr.msk.f32.mxu0 %vm348_vm0, %v2244_v60  ;;  %v2259_v55 = vadd.f32 %v5044_v49, %v4472_v48 }
 0x595   : > { %5074 = vmatmul.mubr.msk.f32.vlgmr.msra.gmra.mxu1 %vm348_vm0, %v2249_v18  ;;  %5094 = vmatmul.mubr.msk.f32.vlgmr.msra.gmra.mxu0 %vm348_vm0, %v2249_v18  ;;  %v2253_v51 = vpop.f32.mrf.mxu0 }
 0x596   : > { %v2254_v52 = vadd.f32 %v4472_v48, %v2253_v51  ;;  %5106 = vmatpush3.msra.mxu1 %v2823_v4  ;;  %5135 = vmatpush3.msra.mxu0 %v2957_v9 }
 0x597   : > { %v5047_v20 = vpop.f32.mrf.mxu0  ;;  %5107 = vmatprep.subr.mxu1 %v5753_v45  ;;  %5136 = vmatprep.subr.mxu0 %v2956_v61 }
 0x598   : > { %5076 = vmatprep.mubr.msk.f32.mxu1 %vm348_vm0, %v2254_v52  ;;  %5096 = vmatprep.mubr.msk.f32.mxu0 %vm348_vm0, %v2254_v52  ;;  %v2269_v11 = vadd.f32 %v5047_v20, %v4472_v48 }
 0x599   : > { %5077 = vmatmul.mubr.msk.f32.gmra.mxu1 %vm348_vm0, %v2259_v55  ;;  %5097 = vmatmul.mubr.msk.f32.gmra.mxu0 %vm348_vm0, %v2259_v55  ;;  %v2263_v56 = vpop.f32.mrf.mxu0 }
 0x59a   : > { %v2264_v14 = vadd.f32 %v4472_v48, %v2263_v56  ;;  %v5061_v57 = vpop.f32.mrf.mxu1  ;;  %5108 = vmatpush3.msra.mxu1 %v2822_v38  ;;  %5137 = vmatpush3.msra.mxu0 %v2956_v61 }
 0x59b   : > { %v5050_v58 = vpop.f32.mrf.mxu0  ;;  %v2384_v36 = vadd.f32 %v5061_v57, %v4481_v15  ;;  %5109 = vmatprep.subr.mxu1 %v5753_v45  ;;  %5138 = vmatprep.subr.mxu0 %v2955_v37 }
 0x59c   : > { %v2378_v59 = vpop.f32.mrf.mxu1  ;;  %5079 = vmatprep.mubr.msk.f32.mxu1 %vm348_vm0, %v2264_v14  ;;  %5099 = vmatprep.mubr.msk.f32.mxu0 %vm348_vm0, %v2264_v14  ;;  %v2279_v3 = vadd.f32 %v5050_v58, %v4472_v48 }
 0x59d   : > { %v2379_v24 = vadd.f32 %v4481_v15, %v2378_v59  ;;  %v2273_v1 = vpop.f32.mrf.mxu0  ;;  %5080 = vmatmul.mubr.msk.f32.gmra.mxu1 %vm348_vm0, %v2269_v11  ;;  %5100 = vmatmul.mubr.msk.f32.gmra.mxu0 %vm348_vm0, %v2269_v11 }
 0x59e   : > { %v2274_v63 = vadd.f32 %v4472_v48, %v2273_v1  ;;  %v5064_v34 = vpop.f32.mrf.mxu1  ;;  %5110 = vmatpush3.msra.mxu1 %v2821_v8  ;;  %5139 = vmatpush3.msra.mxu0 %v2955_v37 }
 0x59f   : > { %2397 = vxpose.xlu0.b32.start [1/4] (short) (narrow) %v2379_v24, 32  ;;  %v2394_v7 = vadd.f32 %v5064_v34, %v4481_v15  ;;  %5111 = vmatprep.subr.mxu1 %v5753_v45 }
 0x5a0   : > { %5082 = vmatprep.mubr.msk.f32.mxu1 %vm348_vm0, %v2274_v63  ;;  %5102 = vmatprep.mubr.msk.f32.mxu0 %vm348_vm0, %v2274_v63  ;;  %v2388_v5 = vpop.f32.mrf.mxu1 }
 0x5a1   : > { %5083 = vmatmul.mubr.msk.f32.gmra.mxu1 %vm348_vm0, %v2279_v3  ;;  %5103 = vmatmul.mubr.msk.f32.gmra.mxu0 %vm348_vm0, %v2279_v3  ;;  %v2389_v25 = vadd.f32 %v4481_v15, %v2388_v5 }
 0x5a2   : > { %5112 = vmatpush3.msra.mxu1 %v2820_v19  ;;  %5113 = vmatprep.mubr.msk.f32.mxu1 %vm5754_vm3, %v5753_v45 }
 0x5a3   : > { %2398 = vxpose.xlu0.b32.cont [2/4] (short) (narrow) %v2384_v36, 32  ;;  %5177 = vmatprep.subr.mxu1 %v5753_v45 }
 0x5a4   : > { %5140 = vmatprep.subr.mxu0 %v2954_v53 }
 0x5a5   : > { %5141 = vmatpush3.msra.mxu0 %v2954_v53 }
 0x5a6   : > { %5148 = vmatprep.subr.mxu0 %v5753_v45 }
 0x5a7   : > { %2399 = vxpose.xlu0.b32.cont [3/4] (short) (narrow) %v2389_v25, 32 }
 0x5ab   : > { %2400 = vxpose.xlu0.b32.end [4/4] (short) (narrow) %v2394_v7, 32 }
 0x655   : > { %v5075_v62 = vpop.f32.mrf.mxu1  ;;  %v5095_v10 = vpop.f32.mrf.mxu0 }
 0x656   : > { %v2686_v13 = vrot.slane %v5095_v10, 1 }
 0x657   : > { %v2638_v12 = vpop.f32.mrf.mxu0  ;;  %v2529_v17 = vpop.f32.mrf.mxu1 }
 0x658   : > { %v2685_v21 = vrot.slane %v2638_v12, 1 }
 0x659   : > { %v5078_v26 = vpop.f32.mrf.mxu1  ;;  %v5098_v44 = vpop.f32.mrf.mxu0 }
 0x65a   : > { %v2687_v54 = vsel %vm595_vm1, %v2685_v21, %v2686_v13  ;;  %v2690_v43 = vrot.slane %v5098_v44, 1 }
 0x65b   : > { %v6391_v22 = vadd.f32 %v2687_v54, %v2529_v17  ;;  %v2539_v28 = vpop.f32.mrf.mxu1  ;;  %v2648_v40 = vpop.f32.mrf.mxu0 }
 0x65c   : > { %v2688_v30 = vrot.slane %v2648_v40, 1 }
 0x65d   : > { %v2714_v27 = vand.u32 2147483647, %v6391_v22  ;;  %v5081_v6 = vpop.f32.mrf.mxu1  ;;  %v5101_v0 = vpop.f32.mrf.mxu0 }
 0x65e   : > { %v2689_v23 = vsel %vm595_vm1, %v2686_v13, %v2688_v30  ;;  %v2691_v31 = vsel %vm595_vm1, %v2688_v30, %v2690_v43  ;;  %v2694_v47 = vrot.slane %v5101_v0, 1 }
 0x65f   : > { %v2721_v29 = vsub.f32 0.0, %v2714_v27  ;;  %v6396_v32 = vadd.f32 %v5075_v62, %v2689_v23  ;;  %v6398_v33 = vadd.f32 %v2691_v31, %v2539_v28  ;;  %v2549_v41 = vpop.f32.mrf.mxu1  ;;  %v2658_v42 = vpop.f32.mrf.mxu0 }
 0x660   : > { %v2692_v50 = vrot.slane %v2658_v42, 1 }
 0x661   : > { %v2728_v46 = vmul.f32 1.442695, %v2721_v29  ;;  %v2715_v35 = vand.u32 2147483647, %v6396_v32  ;;  %v2716_v39 = vand.u32 2147483647, %v6398_v33  ;;  %v5084_v2 = vpop.f32.mrf.mxu1  ;;  %v5104_v60 = vpop.f32.mrf.mxu0 }
 0x662   : > { %v2693_v18 = vsel %vm595_vm1, %v2690_v43, %v2692_v50  ;;  %v2695_v49 = vsel %vm595_vm1, %v2692_v50, %v2694_v47  ;;  %v2698_v14 = vrot.slane %v5104_v60, 1  ;;  %vm2757_vm4 = vcmp.ge.f32.partialorder %v6396_v32, 0.0  ;;  %v3216_v32 = vld [vmem:[#allocation2 + $0x88] sm:$0xff] }
 0x663   : > { %5517 = vpow2.f32 %v2728_v46  ;;  %v2722_v16 = vsub.f32 0.0, %v2715_v35  ;;  %v2723_v48 = vsub.f32 0.0, %v2716_v39  ;;  %v6404_v55 = vadd.f32 %v5078_v26, %v2693_v18  ;;  %v2668_v56 = vpop.f32.mrf.mxu0  ;;  %v2559_v15 = vpop.f32.mrf.mxu1 }
 0x664   : > { %v6406_v20 = vadd.f32 %v2695_v49, %v2549_v41  ;;  %v2696_v57 = vrot.slane %v2668_v56, 1  ;;  %vm2758_vm5 = vcmp.ge.f32.partialorder %v6398_v33, 0.0 }
 0x665   : > { %v2730_v51 = vmul.f32 1.442695, %v2722_v16  ;;  %v2732_v52 = vmul.f32 1.442695, %v2723_v48  ;;  %v2717_v11 = vand.u32 2147483647, %v6404_v55 }
 0x666   : > { %v2718_v58 = vand.u32 2147483647, %v6406_v20  ;;  %v2697_v59 = vsel %vm595_vm1, %v2694_v47, %v2696_v57  ;;  %v2699_v24 = vsel %vm595_vm1, %v2696_v57, %v2698_v14  ;;  %vm2756_vm1 = vcmp.ge.f32.partialorder %v6391_v22, 0.0 }
 0x667   : > { %5519 = vpow2.f32 %v2730_v51  ;;  %v2724_v1 = vsub.f32 0.0, %v2717_v11  ;;  %v6412_v34 = vadd.f32 %v5081_v6, %v2697_v59  ;;  %v6414_v3 = vadd.f32 %v2699_v24, %v2559_v15  ;;  %v3217_v59 = vld [vmem:[#allocation2 + $0x90] sm:$0xff] }
 0x668   : > { %5521 = vpow2.f32 %v2732_v52  ;;  %v2725_v63 = vsub.f32 0.0, %v2718_v58  ;;  %v3218_v52 = vld [vmem:[#allocation2 + $0x98] sm:$0xff]  ;;  %vm2759_vm6 = vcmp.ge.f32.partialorder %v6404_v55, 0.0  ;;  %vm2760_vm8 = vcmp.ge.f32.partialorder %v6406_v20, 0.0 }
 0x669   : > { %v2734_v36 = vmul.f32 1.442695, %v2724_v1  ;;  %v2719_v25 = vand.u32 2147483647, %v6412_v34  ;;  %v2720_v7 = vand.u32 2147483647, %v6414_v3 }
 0x66a   : > { %v2736_v5 = vmul.f32 1.442695, %v2725_v63  ;;  %vm2761_vm9 = vcmp.ge.f32.partialorder %v6412_v34, 0.0  ;;  %vm2762_vm10 = vcmp.ge.f32.partialorder %v6414_v3, 0.0 }
 0x66b   : > { %5523 = vpow2.f32 %v2734_v36  ;;  %v2726_v38 = vsub.f32 0.0, %v2719_v25  ;;  %v2727_v19 = vsub.f32 0.0, %v2720_v7 }
 0x66c   : > { %5525 = vpow2.f32 %v2736_v5 }
 0x66d   : > { %v2738_v9 = vmul.f32 1.442695, %v2726_v38  ;;  %v2740_v53 = vmul.f32 1.442695, %v2727_v19 }
 0x66f   : > { %5527 = vpow2.f32 %v2738_v9 }
 0x670   : > { %v5518_v4 = vpop.eup %5517  ;;  %5529 = vpow2.f32 %v2740_v53 }
 0x671   : > { %v2742_v8 = vmul.f32 %v5518_v4, %v5518_v4  ;;  %v2791_v37 = vadd.f32 1.0, %v5518_v4  ;;  %v2763_v27 = vsub.f32 0.0, %v5518_v4 }
 0x673   : > { %v2784_v61 = vadd.f32 1.0, %v2742_v8  ;;  %v2749_v46 = vsub.f32 1.0, %v2742_v8  ;;  %v2770_v31 = vsel %vm2756_vm1, 1.0, %v2763_v27  ;;  %v3215_v8 = vld [vmem:[#allocation2 + $0x80] sm:$0xff]  ;;  %v4531_v27 = vld [vmem:[%s6845_s1 + $0x98] sm:$0xff] }
 0x674   : > { %v5520_v10 = vpop.eup %5519 }
 0x675   : > { %v2798_v62 = vmul.f32 %v2791_v37, %v2784_v61  ;;  %v5522_v12 = vpop.eup %5521  ;;  %v2743_v13 = vmul.f32 %v5520_v10, %v5520_v10  ;;  %v2792_v54 = vadd.f32 1.0, %v5520_v10  ;;  %v2777_v50 = vmul.f32 %v2770_v31, %v2749_v46  ;;  %v4528_v31 = vld [vmem:[%s6845_s1 + $0x80] sm:$0xff] }
 0x676   : > { %v6418_v17 = vmul.f32 %v5522_v12, %v5522_v12  ;;  %v2793_v44 = vadd.f32 1.0, %v5522_v12  ;;  %v2764_v16 = vsub.f32 0.0, %v5520_v10  ;;  %v2765_v56 = vsub.f32 0.0, %v5522_v12 }
 0x677   : > { %5531 = vrcp.f32 %v2798_v62  ;;  %v2785_v21 = vadd.f32 1.0, %v2743_v13  ;;  %v2750_v14 = vsub.f32 1.0, %v2743_v13 }
 0x678   : > { %v2786_v26 = vadd.f32 1.0, %v6418_v17  ;;  %v6421_v40 = vpop.eup %5523  ;;  %v2771_v57 = vsel %vm2757_vm4, 1.0, %v2764_v16  ;;  %v2751_v5 = vsub.f32 1.0, %v6418_v17  ;;  %v2772_v7 = vsel %vm2758_vm5, 1.0, %v2765_v56 }
 0x679   : > { %v2799_v28 = vmul.f32 %v2792_v54, %v2785_v21  ;;  %v6423_v43 = vpop.eup %5525  ;;  %v6427_v30 = vmul.f32 %v6421_v40, %v6421_v40  ;;  %v2794_v0 = vadd.f32 1.0, %v6421_v40  ;;  %v2766_v24 = vsub.f32 0.0, %v6421_v40  ;;  %v4530_v40 = vld [vmem:[%s6845_s1 + $0x90] sm:$0xff] }
 0x67a   : > { %v2800_v29 = vmul.f32 %v2793_v44, %v2786_v26  ;;  %v6432_v23 = vmul.f32 %v6423_v43, %v6423_v43  ;;  %v2795_v41 = vadd.f32 1.0, %v6423_v43  ;;  %v2767_v63 = vsub.f32 0.0, %v6423_v43 }
 0x67b   : > { %5533 = vrcp.f32 %v2799_v28  ;;  %v2787_v6 = vadd.f32 1.0, %v6427_v30  ;;  %v2778_v36 = vmul.f32 %v2771_v57, %v2750_v14  ;;  %v2752_v38 = vsub.f32 1.0, %v6427_v30 }
 0x67c   : > { %5535 = vrcp.f32 %v2800_v29  ;;  %v6436_v35 = vpop.eup %5527  ;;  %v2788_v39 = vadd.f32 1.0, %v6432_v23  ;;  %v2753_v33 = vsub.f32 1.0, %v6432_v23  ;;  %v2773_v9 = vsel %vm2759_vm6, 1.0, %v2766_v24  ;;  %v4529_v23 = vld [vmem:[%s6845_s1 + $0x88] sm:$0xff] }
 0x67d   : > { %v2801_v42 = vmul.f32 %v2794_v0, %v2787_v6  ;;  %v6442_v22 = vmul.f32 %v6436_v35, %v6436_v35  ;;  %v6444_v47 = vpop.eup %5529  ;;  %v2796_v60 = vadd.f32 1.0, %v6436_v35  ;;  %v2774_v61 = vsel %vm2760_vm8, 1.0, %v2767_v63  ;;  %v4511_v6 = vld [vmem:[%s6848_s4 + $0x3] ss:$0 sm:$0xff] }
 0x67e   : > { %v2802_v48 = vmul.f32 %v2795_v41, %v2788_v39  ;;  %v6450_v51 = vmul.f32 %v6444_v47, %v6444_v47  ;;  %v2797_v15 = vadd.f32 1.0, %v6444_v47  ;;  %v2768_v37 = vsub.f32 0.0, %v6436_v35 }
 0x67f   : > { %5537 = vrcp.f32 %v2801_v42  ;;  %v2789_v49 = vadd.f32 1.0, %v6442_v22  ;;  %v2779_v53 = vmul.f32 %v2772_v7, %v2751_v5  ;;  %v2769_v55 = vsub.f32 0.0, %v6444_v47  ;;  %v3462_v7 = vld [vmem:[#allocation5 + $0x98] sm:$0xff] }
 0x680   : > { %5539 = vrcp.f32 %v2802_v48  ;;  %v2790_v58 = vadd.f32 1.0, %v6450_v51  ;;  %v2780_v10 = vmul.f32 %v2773_v9, %v2752_v38  ;;  %v2781_v13 = vmul.f32 %v2774_v61, %v2753_v33  ;;  %v3460_v38 = vld [vmem:[#allocation5 + $0x88] sm:$0xff]  ;;  %v3595_v33 = vld [vmem:[#allocation7 + $0x90] sm:$0xff]  ;;  %v3593_v61 = vld [vmem:[#allocation7 + $0x80] sm:$0xff] }
 0x681   : > { %v2803_v11 = vmul.f32 %v2796_v60, %v2789_v49  ;;  %v2754_v20 = vsub.f32 1.0, %v6442_v22  ;;  %v2775_v21 = vsel %vm2761_vm9, 1.0, %v2768_v37  ;;  %v2755_v44 = vsub.f32 1.0, %v6450_v51  ;;  %v4519_v60 = vld [vmem:[#allocation8 + $0x3] ss:$0 sm:$0xff]  ;;  %v3594_v9 = vld [vmem:[#allocation7 + $0x88] sm:$0xff] }
 0x682   : > { %v2804_v1 = vmul.f32 %v2797_v15, %v2790_v58  ;;  %v2776_v34 = vsel %vm2762_vm10, 1.0, %v2769_v55  ;;  %vm3605_vm4 = vcmask 1041408  }
 0x683   : > { %5541 = vrcp.f32 %v2803_v11  ;;  %v2782_v28 = vmul.f32 %v2775_v21, %v2754_v20  ;;  %v2783_v43 = vmul.f32 %v2776_v34, %v2755_v44 }
 0x684   : > { %v5532_v2 = vpop.eup %5531  ;;  %5543 = vrcp.f32 %v2804_v1 }
 0x685   : > { %v2806_v18 = vmul.f32 %v5532_v2, %v2777_v50 }
 0x687   : > { %5114 = vmatmul.mubr.msk.f32.vlgmr.msra.gmra.mxu1 %vm348_vm0, %v2806_v18 }
 0x688   : > { %5116 = vmatprep.mubr.msk.f32.mxu1 %vm5754_vm3, %v5753_v45  ;;  %5178 = vmatpush3.msra.mxu1 %v3218_v52  ;;  %v5534_v25 = vpop.eup %5533 }
 0x689   : > { %5179 = vmatprep.subr.mxu1 %v5753_v45  ;;  %v2808_v4 = vmul.f32 %v5534_v25, %v2778_v36  ;;  %v5536_v19 = vpop.eup %5535 }
 0x68a   : > { %5180 = vmatpush3.msra.mxu1 %v3217_v59  ;;  %v2810_v62 = vmul.f32 %v5536_v19, %v2779_v53  ;;  %v3596_v19 = vld [vmem:[#allocation7 + $0x98] sm:$0xff] }
 0x68b   : > { %5181 = vmatprep.subr.mxu1 %v5753_v45  ;;  %5117 = vmatmul.mubr.msk.f32.gmra.mxu1 %vm348_vm0, %v2808_v4  ;;  %v3461_v4 = vld [vmem:[#allocation5 + $0x90] sm:$0xff] }
 0x68c   : > { %5182 = vmatpush3.msra.mxu1 %v3216_v32  ;;  %5119 = vmatprep.mubr.msk.f32.mxu1 %vm5754_vm3, %v5753_v45  ;;  %v5538_v12 = vpop.eup %5537 }
 0x68d   : > { %5183 = vmatprep.subr.mxu1 %v5753_v45  ;;  %v5540_v17 = vpop.eup %5539  ;;  %v2812_v54 = vmul.f32 %v5538_v12, %v2780_v10 }
 0x68e   : > { %5184 = vmatpush3.msra.mxu1 %v3215_v8  ;;  %v2814_v26 = vmul.f32 %v5540_v17, %v2781_v13  ;;  %v3459_v8 = vld [vmem:[#allocation5 + $0x80] sm:$0xff] }
 0x68f   : > { %5120 = vmatmul.mubr.msk.f32.gmra.mxu1 %vm348_vm0, %v2810_v62  ;;  %5142 = vmatprep.mubr.msk.f32.mxu0 %vm348_vm0, %v2812_v54 }
 0x690   : > { %5122 = vmatprep.mubr.msk.f32.mxu1 %vm5754_vm3, %v5753_v45  ;;  %5143 = vmatmul.mubr.msk.f32.vlgmr.msra.gmra.mxu0 %vm348_vm0, %v2814_v26  ;;  %v5542_v3 = vpop.eup %5541 }
 0x691   : > { %5149 = vmatpush3.msra.mxu0 %v4531_v27  ;;  %v2816_v29 = vmul.f32 %v5542_v3, %v2782_v28  ;;  %v5544_v30 = vpop.eup %5543  ;;  %5235 = vmatprep.subr.mxu1 %v3596_v19 }
 0x692   : > { %5150 = vmatprep.subr.mxu0 %v5753_v45  ;;  %v2818_v46 = vmul.f32 %v5544_v30, %v2783_v43 }
 0x693   : > { %5123 = vmatmul.mubr.msk.f32.gmra.mxu1 %vm348_vm0, %v2812_v54  ;;  %5151 = vmatpush3.msra.mxu0 %v4530_v40 }
 0x694   : > { %5125 = vmatprep.mubr.msk.f32.mxu1 %vm5754_vm3, %v5753_v45  ;;  %5145 = vmatprep.mubr.msk.f32.mxu0 %vm348_vm0, %v2816_v29 }
 0x695   : > { %5152 = vmatprep.subr.mxu0 %v5753_v45  ;;  %5146 = vmatmul.mubr.msk.f32.gmra.mxu0 %vm348_vm0, %v2818_v46 }
 0x696   : > { %5156 = vmatprep.mubr.msk.f32.mxu0 %vm5754_vm3, %v5753_v45  ;;  %5153 = vmatpush3.msra.mxu0 %v4529_v23 }
 0x697   : > { %5126 = vmatmul.mubr.msk.f32.gmra.mxu1 %vm348_vm0, %v2814_v26  ;;  %5154 = vmatprep.subr.mxu0 %v5753_v45 }
 0x698   : > { %5128 = vmatprep.mubr.msk.f32.mxu1 %vm5754_vm3, %v5753_v45  ;;  %5155 = vmatpush3.msra.mxu0 %v4528_v31 }
 0x699   : > { %5206 = vmatprep.subr.mxu0 %v5753_v45 }
 0x69b   : > { %5129 = vmatmul.mubr.msk.f32.gmra.mxu1 %vm348_vm0, %v2816_v29 }
 0x69c   : > { %5131 = vmatprep.mubr.msk.f32.mxu1 %vm5754_vm3, %v5753_v45 }
 0x69f   : > { %5132 = vmatmul.mubr.msk.f32.gmra.mxu1 %vm348_vm0, %v2818_v46 }
 0x6a0   : > { %5185 = vmatprep.mubr.msk.f32.mxu1 %vm5754_vm3, %v5753_v45 }
 0x747   : > { %v2919_v0 = vpop.f32.mrf.mxu1 }
 0x748   : > { %v2920_v35 = vadd.f32 %v4511_v6, %v2919_v0 }
 0x749   : > { %v5115_v39 = vpop.f32.mrf.mxu1 }
 0x74a   : > { %5157 = vmatmul.mubr.msk.f32.vlgmr.msra.gmra.mxu0 %vm348_vm0, %v2920_v35  ;;  %5186 = vmatmul.mubr.msk.f32.vlgmr.msra.gmra.mxu1 %vm348_vm0, %v2920_v35 }
 0x74b   : > { %5159 = vmatprep.mubr.msk.f32.mxu0 %vm5754_vm3, %v5753_v45  ;;  %5188 = vmatprep.mubr.msk.f32.mxu1 %vm5754_vm3, %v5753_v45  ;;  %v2924_v41 = vpop.f32.mrf.mxu1 }
 0x74c   : > { %v2925_v42 = vadd.f32 %v4511_v6, %v2924_v41  ;;  %5207 = vmatpush3.msra.mxu0 %v3462_v7  ;;  %5236 = vmatpush3.msra.mxu1 %v3596_v19 }
 0x74d   : > { %v5118_v22 = vpop.f32.mrf.mxu1  ;;  %5208 = vmatprep.subr.mxu0 %v5753_v45  ;;  %5237 = vmatprep.subr.mxu1 %v3595_v33 }
 0x74e   : > { %5160 = vmatmul.mubr.msk.f32.gmra.mxu0 %vm348_vm0, %v2925_v42  ;;  %5189 = vmatmul.mubr.msk.f32.gmra.mxu1 %vm348_vm0, %v2925_v42 }
 0x74f   : > { %v2929_v47 = vpop.f32.mrf.mxu1  ;;  %5162 = vmatprep.mubr.msk.f32.mxu0 %vm5754_vm3, %v5753_v45  ;;  %5191 = vmatprep.mubr.msk.f32.mxu1 %vm5754_vm3, %v5753_v45 }
 0x750   : > { %v2930_v50 = vadd.f32 %v4511_v6, %v2929_v47  ;;  %v5144_v48 = vpop.f32.mrf.mxu0  ;;  %5209 = vmatpush3.msra.mxu0 %v3461_v4  ;;  %5238 = vmatpush3.msra.mxu1 %v3595_v33 }
 0x751   : > { %v5121_v16 = vpop.f32.mrf.mxu1  ;;  %v3038_v11 = vadd.f32 %v5144_v48, %v4519_v60  ;;  %5210 = vmatprep.subr.mxu0 %v5753_v45  ;;  %5239 = vmatprep.subr.mxu1 %v3594_v9 }
 0x752   : > { %5163 = vmatmul.mubr.msk.f32.gmra.mxu0 %vm348_vm0, %v2930_v50  ;;  %5192 = vmatmul.mubr.msk.f32.gmra.mxu1 %vm348_vm0, %v2930_v50  ;;  %v3032_v18 = vpop.f32.mrf.mxu0 }
 0x753   : > { %v2934_v2 = vpop.f32.mrf.mxu1  ;;  %5165 = vmatprep.mubr.msk.f32.mxu0 %vm5754_vm3, %v5753_v45  ;;  %5194 = vmatprep.mubr.msk.f32.mxu1 %vm5754_vm3, %v5753_v45  ;;  %v3033_v51 = vadd.f32 %v4519_v60, %v3032_v18 }
 0x754   : > { %v2935_v49 = vadd.f32 %v4511_v6, %v2934_v2  ;;  %5211 = vmatpush3.msra.mxu0 %v3460_v38  ;;  %5240 = vmatpush3.msra.mxu1 %v3594_v9 }
 0x755   : > { %v5124_v52 = vpop.f32.mrf.mxu1  ;;  %3051 = vxpose.xlu1.b32.start [1/4] (short) (narrow) %v3033_v51, 32  ;;  %v5147_v14 = vpop.f32.mrf.mxu0  ;;  %5212 = vmatprep.subr.mxu0 %v5753_v45 }
 0x756   : > { %5166 = vmatmul.mubr.msk.f32.gmra.mxu0 %vm348_vm0, %v2935_v49  ;;  %5195 = vmatmul.mubr.msk.f32.gmra.mxu1 %vm348_vm0, %v2935_v49  ;;  %v3048_v5 = vadd.f32 %v5147_v14, %v4519_v60 }
 0x757   : > { %v2939_v56 = vpop.f32.mrf.mxu1  ;;  %5168 = vmatprep.mubr.msk.f32.mxu0 %vm5754_vm3, %v5753_v45  ;;  %5197 = vmatprep.mubr.msk.f32.mxu1 %vm5754_vm3, %v5753_v45  ;;  %v3042_v15 = vpop.f32.mrf.mxu0 }
 0x758   : > { %v2940_v57 = vadd.f32 %v4511_v6, %v2939_v56  ;;  %v3043_v1 = vadd.f32 %v4519_v60, %v3042_v15  ;;  %5213 = vmatpush3.msra.mxu0 %v3459_v8  ;;  %5241 = vmatprep.subr.mxu1 %v3593_v61 }
 0x759   : > { %v5127_v58 = vpop.f32.mrf.mxu1  ;;  %3052 = vxpose.xlu1.b32.cont [2/4] (short) (narrow) %v3038_v11, 32  ;;  %5278 = vmatprep.subr.mxu0 %v5753_v45 }
 0x75a   : > { %5169 = vmatmul.mubr.msk.f32.gmra.mxu0 %vm348_vm0, %v2940_v57  ;;  %5198 = vmatmul.mubr.msk.f32.gmra.mxu1 %vm348_vm0, %v2940_v57 }
 0x75b   : > { %v2944_v59 = vpop.f32.mrf.mxu1  ;;  %5171 = vmatprep.mubr.msk.f32.mxu0 %vm5754_vm3, %v5753_v45  ;;  %5200 = vmatprep.mubr.msk.f32.mxu1 %vm5754_vm3, %v5753_v45 }
 0x75c   : > { %v2945_v24 = vadd.f32 %v4511_v6, %v2944_v59  ;;  %5242 = vmatpush3.msra.mxu1 %v3593_v61 }
 0x75d   : > { %v5130_v32 = vpop.f32.mrf.mxu1  ;;  %3053 = vxpose.xlu1.b32.cont [3/4] (short) (narrow) %v3043_v1, 32  ;;  %5249 = vmatprep.subr.mxu1 %v5753_v45 }
 0x75e   : > { %5172 = vmatmul.mubr.msk.f32.gmra.mxu0 %vm348_vm0, %v2945_v24  ;;  %5201 = vmatmul.mubr.msk.f32.gmra.mxu1 %vm348_vm0, %v2945_v24 }
 0x75f   : > { %v2949_v63 = vpop.f32.mrf.mxu1  ;;  %5174 = vmatprep.mubr.msk.f32.mxu0 %vm5754_vm3, %v5753_v45  ;;  %5203 = vmatprep.mubr.msk.f32.mxu1 %vm5754_vm3, %v5753_v45 }
 0x760   : > { %v2950_v36 = vadd.f32 %v4511_v6, %v2949_v63 }
 0x761   : > { %v5133_v25 = vpop.f32.mrf.mxu1  ;;  %3054 = vxpose.xlu1.b32.end [4/4] (short) (narrow) %v3048_v5, 32 }
 0x762   : > { %5175 = vmatmul.mubr.msk.f32.gmra.mxu0 %vm348_vm0, %v2950_v36  ;;  %5204 = vmatmul.mubr.msk.f32.gmra.mxu1 %vm348_vm0, %v2950_v36 }
 0x763   : > { %5214 = vmatprep.mubr.msk.f32.mxu0 %vm5754_vm3, %v5753_v45 }
 0x80a   : > { %v3180_v37 = vpop.f32.mrf.mxu0  ;;  %v3285_v53 = vpop.f32.mrf.mxu1 }
 0x80b   : > { %v3326_v13 = vrot.slane %v3285_v53, 2 }
 0x80c   : > { %v5158_v55 = vpop.f32.mrf.mxu0  ;;  %v5187_v62 = vpop.f32.mrf.mxu1 }
 0x80e   : > { %v3185_v10 = vpop.f32.mrf.mxu0  ;;  %v3290_v12 = vpop.f32.mrf.mxu1 }
 0x80f   : > { %v3327_v20 = vrot.slane %v3290_v12, 2 }
 0x810   : > { %v5161_v17 = vpop.f32.mrf.mxu0  ;;  %v5190_v21 = vpop.f32.mrf.mxu1 }
 0x811   : > { %v3328_v54 = vsel %vm1289_vm11, %v3326_v13, %v3327_v20 }
 0x812   : > { %v6564_v26 = vadd.f32 %v3328_v54, %v3180_v37  ;;  %v3190_v44 = vpop.f32.mrf.mxu0  ;;  %v3295_v27 = vpop.f32.mrf.mxu1 }
 0x813   : > { %v3329_v34 = vrot.slane %v3295_v27, 2 }
 0x814   : > { %v3353_v28 = vand.u32 2147483647, %v6564_v26  ;;  %v5164_v40 = vpop.f32.mrf.mxu0  ;;  %v5193_v3 = vpop.f32.mrf.mxu1  ;;  %vm3395_vm12 = vcmp.ge.f32.partialorder %v6564_v26, 0.0 }
 0x815   : > { %v3330_v29 = vsel %vm1289_vm11, %v3327_v20, %v3329_v34 }
 0x816   : > { %v3360_v43 = vsub.f32 0.0, %v3353_v28  ;;  %v6568_v30 = vadd.f32 %v3330_v29, %v3185_v10  ;;  %v3195_v46 = vpop.f32.mrf.mxu0  ;;  %v3300_v23 = vpop.f32.mrf.mxu1 }
 0x817   : > { %v3331_v31 = vrot.slane %v3300_v23, 2 }
 0x818   : > { %v3367_v6 = vmul.f32 1.442695, %v3360_v43  ;;  %v3354_v0 = vand.u32 2147483647, %v6568_v30  ;;  %v5167_v35 = vpop.f32.mrf.mxu0  ;;  %v5196_v39 = vpop.f32.mrf.mxu1  ;;  %vm3396_vm13 = vcmp.ge.f32.partialorder %v6568_v30, 0.0  ;;  %v3873_v30 = vld [vmem:[#allocation2 + $0xb8] sm:$0xff] }
 0x819   : > { %v3332_v41 = vsel %vm1289_vm11, %v3329_v34, %v3331_v31 }
 0x81a   : > { %5545 = vpow2.f32 %v3367_v6  ;;  %v3361_v42 = vsub.f32 0.0, %v3354_v0  ;;  %v6572_v22 = vadd.f32 %v3332_v41, %v3190_v44  ;;  %v3200_v47 = vpop.f32.mrf.mxu0  ;;  %v3305_v50 = vpop.f32.mrf.mxu1 }
 0x81b   : > { %v3333_v16 = vrot.slane %v3305_v50, 2 }
 0x81c   : > { %v3369_v48 = vmul.f32 1.442695, %v3361_v42  ;;  %v3355_v2 = vand.u32 2147483647, %v6572_v22  ;;  %v5170_v60 = vpop.f32.mrf.mxu0  ;;  %v5199_v18 = vpop.f32.mrf.mxu1  ;;  %vm3397_vm14 = vcmp.ge.f32.partialorder %v6572_v22, 0.0 }
 0x81d   : > { %v3334_v49 = vsel %vm1289_vm11, %v3331_v31, %v3333_v16 }
 0x81e   : > { %5547 = vpow2.f32 %v3369_v48  ;;  %v3362_v51 = vsub.f32 0.0, %v3355_v2  ;;  %v6576_v52 = vadd.f32 %v3334_v49, %v3195_v46  ;;  %v3205_v56 = vpop.f32.mrf.mxu0  ;;  %v3310_v14 = vpop.f32.mrf.mxu1 }
 0x81f   : > { %v3335_v57 = vrot.slane %v3310_v14, 2 }
 0x820   : > { %v3371_v11 = vmul.f32 1.442695, %v3362_v51  ;;  %v3356_v58 = vand.u32 2147483647, %v6576_v52  ;;  %v5173_v15 = vpop.f32.mrf.mxu0  ;;  %v5202_v59 = vpop.f32.mrf.mxu1  ;;  %vm3398_vm15 = vcmp.ge.f32.partialorder %v6576_v52, 0.0 }
 0x821   : > { %v3336_v24 = vsel %vm1289_vm11, %v3333_v16, %v3335_v57 }
 0x822   : > { %5549 = vpow2.f32 %v3371_v11  ;;  %v3363_v1 = vsub.f32 0.0, %v3356_v58  ;;  %v6580_v32 = vadd.f32 %v3336_v24, %v3200_v47  ;;  %v3210_v63 = vpop.f32.mrf.mxu0  ;;  %v3315_v36 = vpop.f32.mrf.mxu1 }
 0x823   : > { %v3337_v5 = vrot.slane %v3315_v36, 2 }
 0x824   : > { %v3373_v25 = vmul.f32 1.442695, %v3363_v1  ;;  %v3357_v7 = vand.u32 2147483647, %v6580_v32  ;;  %v5176_v4 = vpop.f32.mrf.mxu0  ;;  %v5205_v38 = vpop.f32.mrf.mxu1  ;;  %vm3399_vm2 = vcmp.ge.f32.partialorder %v6580_v32, 0.0 }
 0x825   : > { %v3338_v8 = vsel %vm1289_vm11, %v3335_v57, %v3337_v5  ;;  %v6584_v19 = vadd.f32 %v3337_v5, %v3210_v63  ;;  %v3872_v5 = vld [vmem:[#allocation2 + $0xb0] sm:$0xff] }
 0x826   : > { %5551 = vpow2.f32 %v3373_v25  ;;  %v3364_v33 = vsub.f32 0.0, %v3357_v7  ;;  %v6586_v9 = vadd.f32 %v3338_v8, %v3205_v56 }
 0x827   : > { %v5546_v61 = vpop.eup %5545  ;;  %v3359_v37 = vand.u32 2147483647, %v6584_v19  ;;  %vm3401_vm1 = vcmp.ge.f32.partialorder %v6584_v19, 0.0 }
 0x828   : > { %v3381_v53 = vmul.f32 %v5546_v61, %v5546_v61  ;;  %v3375_v55 = vmul.f32 1.442695, %v3364_v33  ;;  %v3358_v62 = vand.u32 2147483647, %v6586_v9  ;;  %v3430_v13 = vadd.f32 1.0, %v5546_v61 }
 0x829   : > { %v3366_v10 = vsub.f32 0.0, %v3359_v37  ;;  %v3402_v43 = vsub.f32 0.0, %v5546_v61  ;;  %v3871_v61 = vld [vmem:[#allocation2 + $0xa8] sm:$0xff]  ;;  %vm3400_vm5 = vcmp.ge.f32.partialorder %v6586_v9, 0.0  ;;  %v4567_v9 = vld [vmem:[%s6845_s1 + $0xb8] sm:$0xff] }
 0x82a   : > { %v3423_v12 = vadd.f32 1.0, %v3381_v53  ;;  %5553 = vpow2.f32 %v3375_v55  ;;  %v3365_v17 = vsub.f32 0.0, %v3358_v62  ;;  %v3388_v35 = vsub.f32 1.0, %v3381_v53  ;;  %v3870_v62 = vld [vmem:[#allocation2 + $0xa0] sm:$0xff] }
 0x82b   : > { %v5548_v20 = vpop.eup %5547  ;;  %v3379_v21 = vmul.f32 1.442695, %v3366_v10  ;;  %v3409_v39 = vsel %vm3395_vm12, 1.0, %v3402_v43 }
 0x82c   : > { %v3437_v54 = vmul.f32 %v3430_v13, %v3423_v12  ;;  %v3382_v44 = vmul.f32 %v5548_v20, %v5548_v20  ;;  %v3377_v27 = vmul.f32 1.442695, %v3365_v17  ;;  %v3431_v28 = vadd.f32 1.0, %v5548_v20 }
 0x82d   : > { %5555 = vpow2.f32 %v3379_v21  ;;  %v3403_v50 = vsub.f32 0.0, %v5548_v20  ;;  %v3416_v2 = vmul.f32 %v3409_v39, %v3388_v35 }
 0x82e   : > { %5557 = vrcp.f32 %v3437_v54  ;;  %v3424_v34 = vadd.f32 1.0, %v3382_v44  ;;  %v3389_v18 = vsub.f32 1.0, %v3382_v44 }
 0x82f   : > { %v5550_v40 = vpop.eup %5549  ;;  %5559 = vpow2.f32 %v3377_v27  ;;  %v3410_v56 = vsel %vm3396_vm13, 1.0, %v3403_v50  ;;  %v4566_v50 = vld [vmem:[%s6845_s1 + $0xb0] sm:$0xff] }
 0x830   : > { %v3438_v3 = vmul.f32 %v3431_v28, %v3424_v34  ;;  %v3383_v29 = vmul.f32 %v5550_v40, %v5550_v40  ;;  %v3432_v23 = vadd.f32 1.0, %v5550_v40  ;;  %v3404_v14 = vsub.f32 0.0, %v5550_v40 }
 0x831   : > { %v3417_v1 = vmul.f32 %v3410_v56, %v3389_v18 }
 0x832   : > { %5561 = vrcp.f32 %v3438_v3  ;;  %v3425_v46 = vadd.f32 1.0, %v3383_v29  ;;  %v3390_v63 = vsub.f32 1.0, %v3383_v29  ;;  %v3411_v7 = vsel %vm3397_vm14, 1.0, %v3404_v14 }
 0x833   : > { %v5552_v31 = vpop.eup %5551 }
 0x834   : > { %v3439_v6 = vmul.f32 %v3432_v23, %v3425_v46  ;;  %v6590_v0 = vmul.f32 %v5552_v31, %v5552_v31  ;;  %v3433_v42 = vadd.f32 1.0, %v5552_v31  ;;  %v3405_v4 = vsub.f32 0.0, %v5552_v31 }
 0x835   : > { %v3418_v37 = vmul.f32 %v3411_v7, %v3390_v63 }
 0x836   : > { %5563 = vrcp.f32 %v3439_v6  ;;  %v3426_v41 = vadd.f32 1.0, %v6590_v0  ;;  %v3391_v53 = vsub.f32 1.0, %v6590_v0  ;;  %v3412_v12 = vsel %vm3398_vm15, 1.0, %v3405_v4 }
 0x837   : > { %v6594_v47 = vpop.eup %5553 }
 0x838   : > { %v3440_v16 = vmul.f32 %v3433_v42, %v3426_v41  ;;  %v6598_v48 = vmul.f32 %v6594_v47, %v6594_v47  ;;  %v3434_v49 = vadd.f32 1.0, %v6594_v47  ;;  %v3406_v13 = vsub.f32 0.0, %v6594_v47 }
 0x839   : > { %v3419_v17 = vmul.f32 %v3412_v12, %v3391_v53 }
 0x83a   : > { %v6601_v60 = vpop.eup %5555  ;;  %5565 = vrcp.f32 %v3440_v16  ;;  %v3427_v26 = vadd.f32 1.0, %v6598_v48  ;;  %v3392_v21 = vsub.f32 1.0, %v6598_v48  ;;  %v3413_v44 = vsel %vm3399_vm2, 1.0, %v3406_v13 }
 0x83b   : > { %v5558_v51 = vpop.eup %5557  ;;  %v6607_v57 = vmul.f32 %v6601_v60, %v6601_v60  ;;  %v3436_v24 = vadd.f32 1.0, %v6601_v60  ;;  %v3408_v52 = vsub.f32 0.0, %v6601_v60 }
 0x83c   : > { %v6609_v11 = vpop.eup %5559  ;;  %v3445_v58 = vmul.f32 %v5558_v51, %v3416_v2  ;;  %v3441_v15 = vmul.f32 %v3434_v49, %v3427_v26  ;;  %v3420_v29 = vmul.f32 %v3413_v44, %v3392_v21  ;;  %v4565_v26 = vld [vmem:[%s6845_s1 + $0xa8] sm:$0xff]  ;;  %v4564_v49 = vld [vmem:[%s6845_s1 + $0xa0] sm:$0xff]  ;;  %v4074_v21 = vld [vmem:[#allocation7 + $0xb0] sm:$0xff] }
 0x83d   : > { %v3429_v59 = vadd.f32 1.0, %v6607_v57  ;;  %v6617_v36 = vmul.f32 %v6609_v11, %v6609_v11  ;;  %v3435_v33 = vadd.f32 1.0, %v6609_v11  ;;  %v3394_v34 = vsub.f32 1.0, %v6607_v57  ;;  %v4547_v51 = vld [vmem:[%s6848_s4 + $0x4] ss:$0 sm:$0xff] }
 0x83e   : > { %5215 = vmatmul.mubr.msk.f32.vlgmr.msra.gmra.mxu0 %vm348_vm0, %v3445_v58  ;;  %5567 = vrcp.f32 %v3441_v15  ;;  %v3407_v28 = vsub.f32 0.0, %v6609_v11  ;;  %v3415_v32 = vsel %vm3401_vm1, 1.0, %v3408_v52 }
 0x83f   : > { %v5562_v25 = vpop.eup %5561  ;;  %v3443_v38 = vmul.f32 %v3436_v24, %v3429_v59  ;;  %5217 = vmatprep.mubr.msk.f32.mxu0 %vm5754_vm3, %v5753_v45  ;;  %5279 = vmatpush3.msra.mxu0 %v3873_v30  ;;  %v3428_v8 = vadd.f32 1.0, %v6617_v36  ;;  %v3393_v19 = vsub.f32 1.0, %v6617_v36  ;;  %v3422_v6 = vmul.f32 %v3415_v32, %v3394_v34 }
 0x840   : > { %v3447_v22 = vmul.f32 %v5562_v25, %v3417_v1  ;;  %5280 = vmatprep.subr.mxu0 %v5753_v45  ;;  %v3414_v31 = vsel %vm3400_vm5, 1.0, %v3407_v28 }
 0x841   : > { %5569 = vrcp.f32 %v3443_v38  ;;  %5281 = vmatpush3.msra.mxu0 %v3872_v5  ;;  %v3442_v55 = vmul.f32 %v3435_v33, %v3428_v8  ;;  %v3421_v42 = vmul.f32 %v3414_v31, %v3393_v19  ;;  %v4555_v38 = vld [vmem:[#allocation8 + $0x4] ss:$0 sm:$0xff] }
 0x842   : > { %5218 = vmatmul.mubr.msk.f32.gmra.mxu0 %vm348_vm0, %v3447_v22  ;;  %5282 = vmatprep.subr.mxu0 %v5753_v45 }
 0x843   : > { %v5564_v10 = vpop.eup %5563  ;;  %5220 = vmatprep.mubr.msk.f32.mxu0 %vm5754_vm3, %v5753_v45  ;;  %5283 = vmatpush3.msra.mxu0 %v3871_v61  ;;  %5571 = vrcp.f32 %v3442_v55 }
 0x844   : > { %v3449_v20 = vmul.f32 %v5564_v10, %v3418_v37  ;;  %5284 = vmatprep.subr.mxu0 %v5753_v45 }
 0x845   : > { %5285 = vmatpush3.msra.mxu0 %v3870_v62 }
 0x846   : > { %5221 = vmatmul.mubr.msk.f32.gmra.mxu0 %vm348_vm0, %v3449_v20  ;;  %v3606_v40 = vrot.slane %v3449_v20, 6 }
 0x847   : > { %v5566_v54 = vpop.eup %5565  ;;  %5223 = vmatprep.mubr.msk.f32.mxu0 %vm5754_vm3, %v5753_v45 }
 0x848   : > { %v3451_v27 = vmul.f32 %v5566_v54, %v3419_v17  ;;  %v4075_v17 = vld [vmem:[#allocation7 + $0xb8] sm:$0xff]  ;;  %v4073_v54 = vld [vmem:[#allocation7 + $0xa8] sm:$0xff] }
 0x84a   : > { %5224 = vmatmul.mubr.msk.f32.gmra.mxu0 %vm348_vm0, %v3451_v27  ;;  %v3607_v3 = vrot.slane %v3451_v27, 6 }
 0x84b   : > { %v5568_v43 = vpop.eup %5567  ;;  %5226 = vmatprep.mubr.msk.f32.mxu0 %vm5754_vm3, %v5753_v45 }
 0x84c   : > { %v3608_v46 = vsel %vm3605_vm4, %v3606_v40, %v3607_v3  ;;  %v3453_v23 = vmul.f32 %v5568_v43, %v3420_v29 }
 0x84d   : > { %5243 = vmatprep.mubr.msk.f32.mxu1 %vm348_vm0, %v3608_v46 }
 0x84e   : > { %v5570_v0 = vpop.eup %5569  ;;  %5227 = vmatmul.mubr.msk.f32.gmra.mxu0 %vm348_vm0, %v3453_v23  ;;  %v3609_v35 = vrot.slane %v3453_v23, 6 }
 0x84f   : > { %5229 = vmatprep.mubr.msk.f32.mxu0 %vm5754_vm3, %v5753_v45  ;;  %v3457_v39 = vmul.f32 %v5570_v0, %v3422_v6 }
 0x850   : > { %v3610_v41 = vsel %vm3605_vm4, %v3607_v3, %v3609_v35  ;;  %v5572_v47 = vpop.eup %5571 }
 0x851   : > { %5244 = vmatmul.mubr.msk.f32.vlgmr.msra.gmra.mxu1 %vm348_vm0, %v3610_v41  ;;  %v3455_v16 = vmul.f32 %v5572_v47, %v3421_v42  ;;  %v3613_v48 = vrot.slane %v3457_v39, 6 }
 0x852   : > { %5250 = vmatpush3.msra.mxu1 %v4567_v9 }
 0x853   : > { %5251 = vmatprep.subr.mxu1 %v5753_v45  ;;  %5230 = vmatmul.mubr.msk.f32.gmra.mxu0 %vm348_vm0, %v3455_v16  ;;  %v3611_v2 = vrot.slane %v3455_v16, 6 }
 0x854   : > { %5252 = vmatpush3.msra.mxu1 %v4566_v50  ;;  %5232 = vmatprep.mubr.msk.f32.mxu0 %vm5754_vm3, %v5753_v45 }
 0x855   : > { %5253 = vmatprep.subr.mxu1 %v5753_v45  ;;  %v3612_v60 = vsel %vm3605_vm4, %v3609_v35, %v3611_v2  ;;  %v3614_v18 = vsel %vm3605_vm4, %v3611_v2, %v3613_v48 }
 0x856   : > { %5246 = vmatprep.mubr.msk.f32.mxu1 %vm348_vm0, %v3612_v60  ;;  %5254 = vmatpush3.msra.mxu1 %v4565_v26 }
 0x857   : > { %5233 = vmatmul.mubr.msk.f32.gmra.mxu0 %vm348_vm0, %v3457_v39  ;;  %5247 = vmatmul.mubr.msk.f32.gmra.mxu1 %vm348_vm0, %v3614_v18 }
 0x858   : > { %5257 = vmatprep.mubr.msk.f32.mxu1 %vm5754_vm3, %v5753_v45  ;;  %5286 = vmatprep.mubr.msk.f32.mxu0 %vm5754_vm3, %v5753_v45 }
 0x859   : > { %5255 = vmatprep.subr.mxu1 %v5753_v45 }
 0x85a   : > { %5256 = vmatpush3.msra.mxu1 %v4564_v49 }
 0x85b   : > { %5307 = vmatprep.subr.mxu1 %v4075_v17 }
 0x8fe   : > { %v3558_v56 = vpop.f32.mrf.mxu0 }
 0x8ff   : > { %v3559_v14 = vadd.f32 %v4547_v51, %v3558_v56 }
 0x900   : > { %v5216_v57 = vpop.f32.mrf.mxu0 }
 0x901   : > { %5258 = vmatmul.mubr.msk.f32.vlgmr.msra.gmra.mxu1 %vm348_vm0, %v3559_v14  ;;  %5287 = vmatmul.mubr.msk.f32.vlgmr.msra.gmra.mxu0 %vm348_vm0, %v3559_v14 }
 0x902   : > { %v3563_v11 = vpop.f32.mrf.mxu0  ;;  %5260 = vmatprep.mubr.msk.f32.mxu1 %vm5754_vm3, %v5753_v45  ;;  %5289 = vmatprep.mubr.msk.f32.mxu0 %vm5754_vm3, %v5753_v45 }
 0x903   : > { %v3564_v58 = vadd.f32 %v4547_v51, %v3563_v11  ;;  %5308 = vmatpush3.msra.mxu1 %v4075_v17 }
 0x904   : > { %v5219_v15 = vpop.f32.mrf.mxu0  ;;  %5309 = vmatprep.subr.mxu1 %v4074_v21 }
 0x905   : > { %5261 = vmatmul.mubr.msk.f32.gmra.mxu1 %vm348_vm0, %v3564_v58  ;;  %5290 = vmatmul.mubr.msk.f32.gmra.mxu0 %vm348_vm0, %v3564_v58 }
 0x906   : > { %v3568_v30 = vpop.f32.mrf.mxu0  ;;  %5263 = vmatprep.mubr.msk.f32.mxu1 %vm5754_vm3, %v5753_v45  ;;  %5292 = vmatprep.mubr.msk.f32.mxu0 %vm5754_vm3, %v5753_v45 }
 0x907   : > { %v3569_v59 = vadd.f32 %v4547_v51, %v3568_v30  ;;  %5310 = vmatpush3.msra.mxu1 %v4074_v21 }
 0x908   : > { %v5222_v24 = vpop.f32.mrf.mxu0  ;;  %5311 = vmatprep.subr.mxu1 %v4073_v54 }
 0x909   : > { %5264 = vmatmul.mubr.msk.f32.gmra.mxu1 %vm348_vm0, %v3569_v59  ;;  %5293 = vmatmul.mubr.msk.f32.gmra.mxu0 %vm348_vm0, %v3569_v59 }
 0x90a   : > { %v3573_v1 = vpop.f32.mrf.mxu0  ;;  %5266 = vmatprep.mubr.msk.f32.mxu1 %vm5754_vm3, %v5753_v45  ;;  %5295 = vmatprep.mubr.msk.f32.mxu0 %vm5754_vm3, %v5753_v45 }
 0x90b   : > { %v3574_v63 = vadd.f32 %v4547_v51, %v3573_v1  ;;  %5312 = vmatpush3.msra.mxu1 %v4073_v54 }
 0x90c   : > { %v5225_v36 = vpop.f32.mrf.mxu0 }
 0x90d   : > { %5267 = vmatmul.mubr.msk.f32.gmra.mxu1 %vm348_vm0, %v3574_v63  ;;  %5296 = vmatmul.mubr.msk.f32.gmra.mxu0 %vm348_vm0, %v3574_v63 }
 0x90e   : > { %v3578_v5 = vpop.f32.mrf.mxu0  ;;  %5269 = vmatprep.mubr.msk.f32.mxu1 %vm5754_vm3, %v5753_v45  ;;  %5298 = vmatprep.mubr.msk.f32.mxu0 %vm5754_vm3, %v5753_v45 }
 0x90f   : > { %v3579_v25 = vadd.f32 %v4547_v51, %v3578_v5 }
 0x910   : > { %v5228_v7 = vpop.f32.mrf.mxu0 }
 0x911   : > { %v5245_v4 = vpop.f32.mrf.mxu1  ;;  %5270 = vmatmul.mubr.msk.f32.gmra.mxu1 %vm348_vm0, %v3579_v25  ;;  %5299 = vmatmul.mubr.msk.f32.gmra.mxu0 %vm348_vm0, %v3579_v25 }
 0x912   : > { %5272 = vmatprep.mubr.msk.f32.mxu1 %vm5754_vm3, %v5753_v45  ;;  %5301 = vmatprep.mubr.msk.f32.mxu0 %vm5754_vm3, %v5753_v45  ;;  %v3695_v53 = vadd.f32 %v5245_v4, %v4555_v38 }
 0x913   : > { %v3689_v22 = vpop.f32.mrf.mxu1  ;;  %v3583_v8 = vpop.f32.mrf.mxu0 }
 0x914   : > { %v3690_v33 = vadd.f32 %v4555_v38, %v3689_v22  ;;  %v3584_v61 = vadd.f32 %v4547_v51, %v3583_v8 }
 0x915   : > { %v5231_v37 = vpop.f32.mrf.mxu0 }
 0x916   : > { %3708 = vxpose.xlu0.b32.start [1/4] (short) (narrow) %v3690_v33, 32  ;;  %5273 = vmatmul.mubr.msk.f32.gmra.mxu1 %vm348_vm0, %v3584_v61 }
 0x917   : > { %5302 = vmatmul.mubr.msk.f32.gmra.mxu0 %vm348_vm0, %v3584_v61  ;;  %v3588_v55 = vpop.f32.mrf.mxu0  ;;  %v5248_v62 = vpop.f32.mrf.mxu1  ;;  %5275 = vmatprep.mubr.msk.f32.mxu1 %vm5754_vm3, %v5753_v45 }
 0x918   : > { %5304 = vmatprep.mubr.msk.f32.mxu0 %vm5754_vm3, %v5753_v45  ;;  %v3589_v10 = vadd.f32 %v4547_v51, %v3588_v55  ;;  %v3705_v52 = vadd.f32 %v5248_v62, %v4555_v38  ;;  %v4072_v45 = vld [vmem:[#allocation7 + $0xa0] sm:$0xff] }
 0x919   : > { %v5234_v12 = vpop.f32.mrf.mxu0  ;;  %v3699_v13 = vpop.f32.mrf.mxu1  ;;  %5313 = vmatprep.subr.mxu1 %v4072_v45 }
 0x91a   : > { %3709 = vxpose.xlu0.b32.cont [2/4] (short) (narrow) %v3695_v53, 32  ;;  %5276 = vmatmul.mubr.msk.f32.gmra.mxu1 %vm348_vm0, %v3589_v10  ;;  %v3700_v20 = vadd.f32 %v4555_v38, %v3699_v13 }
 0x91b   : > { %5305 = vmatmul.mubr.msk.f32.gmra.mxu0 %vm348_vm0, %v3589_v10  ;;  %5314 = vmatpush3.msra.mxu1 %v4072_v45 }
 0x91e   : > { %3710 = vxpose.xlu0.b32.cont [3/4] (short) (narrow) %v3700_v20, 32 }
 0x922   : > { %3711 = vxpose.xlu0.b32.end [4/4] (short) (narrow) %v3705_v52, 32 }
 0x9c1   : > { %v3837_v44 = vpop.f32.mrf.mxu1  ;;  %v3940_v27 = vpop.f32.mrf.mxu0 }
 0x9c3   : > { %v5259_v34 = vpop.f32.mrf.mxu1  ;;  %v5288_v28 = vpop.f32.mrf.mxu0 }
 0x9c5   : > { %v3841_v32 = vpop.f32.mrf.mxu1  ;;  %v3944_v40 = vpop.f32.mrf.mxu0 }
 0x9c7   : > { %v5262_v3 = vpop.f32.mrf.mxu1  ;;  %v5291_v29 = vpop.f32.mrf.mxu0 }
 0x9c9   : > { %v3845_v43 = vpop.f32.mrf.mxu1  ;;  %v3948_v46 = vpop.f32.mrf.mxu0 }
 0x9ca   : > { %v3977_v0 = vrot.slane %v3948_v46, 4 }
 0x9cb   : > { %v5265_v23 = vpop.f32.mrf.mxu1  ;;  %v5294_v19 = vpop.f32.mrf.mxu0 }
 0x9cd   : > { %v3850_v31 = vpop.f32.mrf.mxu1  ;;  %v3953_v6 = vpop.f32.mrf.mxu0 }
 0x9ce   : > { %v3978_v35 = vrot.slane %v3953_v6, 4 }
 0x9cf   : > { %v5268_v39 = vpop.f32.mrf.mxu1  ;;  %v5297_v9 = vpop.f32.mrf.mxu0 }
 0x9d0   : > { %v3979_v41 = vsel %vm1988_vm7, %v3977_v0, %v3978_v35 }
 0x9d1   : > { %v6722_v42 = vadd.f32 %v3979_v41, %v3845_v43  ;;  %v3855_v47 = vpop.f32.mrf.mxu1  ;;  %v3958_v50 = vpop.f32.mrf.mxu0 }
 0x9d2   : > { %v3980_v16 = vrot.slane %v3958_v50, 4 }
 0x9d3   : > { %v3996_v48 = vand.u32 2147483647, %v6722_v42  ;;  %v5271_v2 = vpop.f32.mrf.mxu1  ;;  %v5300_v60 = vpop.f32.mrf.mxu0 }
 0x9d4   : > { %v3981_v18 = vsel %vm1988_vm7, %v3978_v35, %v3980_v16 }
 0x9d5   : > { %v4001_v26 = vsub.f32 0.0, %v3996_v48  ;;  %v6726_v49 = vadd.f32 %v3981_v18, %v3850_v31 }
 0x9d6   : > { %v3860_v14 = vpop.f32.mrf.mxu1 }
 0x9d7   : > { %v4006_v51 = vmul.f32 1.442695, %v4001_v26  ;;  %v3997_v56 = vand.u32 2147483647, %v6726_v49  ;;  %v3963_v57 = vpop.f32.mrf.mxu0  ;;  %vm4027_vm3 = vcmp.ge.f32.partialorder %v6726_v49, 0.0 }
 0x9d8   : > { %v3982_v11 = vrot.slane %v3963_v57, 4  ;;  %v5274_v15 = vpop.f32.mrf.mxu1 }
 0x9d9   : > { %5573 = vpow2.f32 %v4006_v51  ;;  %v4002_v58 = vsub.f32 0.0, %v3997_v56  ;;  %v5303_v30 = vpop.f32.mrf.mxu0 }
 0x9da   : > { %v3983_v59 = vsel %vm1988_vm7, %v3980_v16, %v3982_v11  ;;  %v3865_v63 = vpop.f32.mrf.mxu1 }
 0x9db   : > { %v4008_v24 = vmul.f32 1.442695, %v4002_v58  ;;  %v6730_v1 = vadd.f32 %v3983_v59, %v3855_v47  ;;  %v3968_v36 = vpop.f32.mrf.mxu0 }
 0x9dc   : > { %v3984_v5 = vrot.slane %v3968_v36, 4  ;;  %v5277_v7 = vpop.f32.mrf.mxu1 }
 0x9dd   : > { %5575 = vpow2.f32 %v4008_v24  ;;  %v3998_v25 = vand.u32 2147483647, %v6730_v1  ;;  %v5306_v4 = vpop.f32.mrf.mxu0  ;;  %vm4028_vm6 = vcmp.ge.f32.partialorder %v6730_v1, 0.0 }
 0x9de   : > { %v3985_v38 = vsel %vm1988_vm7, %v3982_v11, %v3984_v5  ;;  %v6734_v22 = vadd.f32 %v3984_v5, %v3865_v63  ;;  %vm4026_vm7 = vcmp.ge.f32.partialorder %v6722_v42, 0.0 }
 0x9df   : > { %v4003_v8 = vsub.f32 0.0, %v3998_v25  ;;  %v6736_v33 = vadd.f32 %v3985_v38, %v3860_v14 }
 0x9e0   : > { %v4000_v61 = vand.u32 2147483647, %v6734_v22  ;;  %vm4030_vm9 = vcmp.ge.f32.partialorder %v6734_v22, 0.0 }
 0x9e1   : > { %v4010_v37 = vmul.f32 1.442695, %v4003_v8  ;;  %v3999_v53 = vand.u32 2147483647, %v6736_v33  ;;  %vm4029_vm8 = vcmp.ge.f32.partialorder %v6736_v33, 0.0 }
 0x9e2   : > { %v4005_v55 = vsub.f32 0.0, %v4000_v61 }
 0x9e3   : > { %5577 = vpow2.f32 %v4010_v37  ;;  %v4004_v62 = vsub.f32 0.0, %v3999_v53 }
 0x9e4   : > { %v4014_v10 = vmul.f32 1.442695, %v4005_v55 }
 0x9e5   : > { %v4012_v12 = vmul.f32 1.442695, %v4004_v62 }
 0x9e6   : > { %v5574_v13 = vpop.eup %5573  ;;  %5579 = vpow2.f32 %v4014_v10 }
 0x9e7   : > { %v4016_v20 = vmul.f32 %v5574_v13, %v5574_v13  ;;  %5581 = vpow2.f32 %v4012_v12  ;;  %v4051_v17 = vadd.f32 1.0, %v5574_v13  ;;  %v4031_v46 = vsub.f32 0.0, %v5574_v13  ;;  %v1017_v13 = vpop.trf.xlu0 }
 0x9e8   : > { %1033 = vst.msk [vmem:[%s6756_s8] sm:$0xff] %vm348_vm0, %v1017_v13 }
 0x9e9   : > { %v4046_v52 = vadd.f32 1.0, %v4016_v20  ;;  %v4021_v39 = vsub.f32 1.0, %v4016_v20  ;;  %v4036_v47 = vsel %vm4026_vm7, 1.0, %v4031_v46  ;;  %v1715_v20 = vpop.trf.xlu1 }
 0x9ea   : > { %v5576_v21 = vpop.eup %5575  ;;  %4447 = vst.msk [vmem:[%s6756_s8 + $0x20] sm:$0xff] %vm348_vm0, %v1715_v20 }
 0x9eb   : > { %v4056_v54 = vmul.f32 %v4051_v17, %v4046_v52  ;;  %v4017_v45 = vmul.f32 %v5576_v21, %v5576_v21  ;;  %v4052_v27 = vadd.f32 1.0, %v5576_v21  ;;  %v4032_v6 = vsub.f32 0.0, %v5576_v21  ;;  %v1018_v52 = vpop.trf.xlu0 }
 0x9ec   : > { %v4041_v18 = vmul.f32 %v4036_v47, %v4021_v39  ;;  %1034 = vst.msk [vmem:[%s6756_s8 + $0x8] sm:$0xff] %vm348_vm0, %v1018_v52 }
 0x9ed   : > { %5583 = vrcp.f32 %v4056_v54  ;;  %v4047_v44 = vadd.f32 1.0, %v4017_v45  ;;  %v4022_v16 = vsub.f32 1.0, %v4017_v45  ;;  %v4037_v60 = vsel %vm4027_vm3, 1.0, %v4032_v6  ;;  %v1716_v17 = vpop.trf.xlu1 }
 0x9ee   : > { %4448 = vst.msk [vmem:[%s6756_s8 + $0x28] sm:$0xff] %vm348_vm0, %v1716_v17 }
 0x9ef   : > { %v4057_v34 = vmul.f32 %v4052_v27, %v4047_v44  ;;  %v4042_v42 = vmul.f32 %v4037_v60, %v4022_v16  ;;  %v1019_v21 = vpop.trf.xlu0 }
 0x9f0   : > { %v5578_v28 = vpop.eup %5577  ;;  %1035 = vst.msk [vmem:[%s6756_s8 + $0x10] sm:$0xff] %vm348_vm0, %v1019_v21 }
 0x9f1   : > { %5585 = vrcp.f32 %v4057_v34  ;;  %v4018_v32 = vmul.f32 %v5578_v28, %v5578_v28  ;;  %v4053_v29 = vadd.f32 1.0, %v5578_v28  ;;  %v4033_v26 = vsub.f32 0.0, %v5578_v28  ;;  %v1717_v54 = vpop.trf.xlu1 }
 0x9f2   : > { %4449 = vst.msk [vmem:[%s6756_s8 + $0x30] sm:$0xff] %vm348_vm0, %v1717_v54 }
 0x9f3   : > { %v5580_v40 = vpop.eup %5579  ;;  %v4048_v3 = vadd.f32 1.0, %v4018_v32  ;;  %v4023_v14 = vsub.f32 1.0, %v4018_v32  ;;  %v4038_v58 = vsel %vm4028_vm6, 1.0, %v4033_v26  ;;  %v1020_v45 = vpop.trf.xlu0 }
 0x9f4   : > { %v5582_v43 = vpop.eup %5581  ;;  %v4020_v23 = vmul.f32 %v5580_v40, %v5580_v40  ;;  %v4055_v35 = vadd.f32 1.0, %v5580_v40  ;;  %v4035_v57 = vsub.f32 0.0, %v5580_v40  ;;  %1036 = vst.msk [vmem:[%s6756_s8 + $0x18] sm:$0xff] %vm348_vm0, %v1020_v45 }
 0x9f5   : > { %v4058_v19 = vmul.f32 %v4053_v29, %v4048_v3  ;;  %v4019_v31 = vmul.f32 %v5582_v43, %v5582_v43  ;;  %v4054_v41 = vadd.f32 1.0, %v5582_v43  ;;  %v4034_v15 = vsub.f32 0.0, %v5582_v43  ;;  %v1718_v44 = vpop.trf.xlu1 }
 0x9f6   : > { %v4050_v0 = vadd.f32 1.0, %v4020_v23  ;;  %v4025_v49 = vsub.f32 1.0, %v4020_v23  ;;  %v4043_v24 = vmul.f32 %v4038_v58, %v4023_v14  ;;  %v4040_v36 = vsel %vm4030_vm9, 1.0, %v4035_v57  ;;  %4450 = vst.msk [vmem:[%s6756_s8 + $0x38] sm:$0xff] %vm348_vm0, %v1718_v44  ;;  %v4582_v23 = vld [vmem:[#allocation8 + $0x5] ss:$0 sm:$0xff] }
 0x9f7   : > { %5587 = vrcp.f32 %v4058_v19  ;;  %v4049_v9 = vadd.f32 1.0, %v4019_v31  ;;  %v4024_v63 = vsub.f32 1.0, %v4019_v31  ;;  %v4039_v7 = vsel %vm4029_vm8, 1.0, %v4034_v15  ;;  %v2413_v27 = vpop.trf.xlu0 }
 0x9f8   : > { %v4060_v50 = vmul.f32 %v4055_v35, %v4050_v0  ;;  %v4045_v4 = vmul.f32 %v4040_v36, %v4025_v49  ;;  %4486 = vst.msk [vmem:[%s6756_s8 + $0x40] sm:$0xff] %vm348_vm0, %v2413_v27 }
 0x9f9   : > { %v4059_v48 = vmul.f32 %v4054_v41, %v4049_v9  ;;  %v4044_v61 = vmul.f32 %v4039_v7, %v4024_v63  ;;  %v3067_v34 = vpop.trf.xlu1 }
 0x9fa   : > { %v5584_v2 = vpop.eup %5583  ;;  %5589 = vrcp.f32 %v4060_v50  ;;  %4524 = vst.msk [vmem:[%s6756_s8 + $0x60] sm:$0xff] %vm348_vm0, %v3067_v34 }
 0x9fb   : > { %5591 = vrcp.f32 %v4059_v48  ;;  %v4062_v51 = vmul.f32 %v5584_v2, %v4041_v18  ;;  %v2414_v28 = vpop.trf.xlu0 }
 0x9fc   : > { %4487 = vst.msk [vmem:[%s6756_s8 + $0x48] sm:$0xff] %vm348_vm0, %v2414_v28 }
 0x9fd   : > { %v4089_v30 = vrot.slane %v4062_v51, 2  ;;  %v3068_v32 = vpop.trf.xlu1 }
 0x9fe   : > { %v5586_v56 = vpop.eup %5585  ;;  %4525 = vst.msk [vmem:[%s6756_s8 + $0x68] sm:$0xff] %vm348_vm0, %v3068_v32 }
 0x9ff   : > { %v4064_v11 = vmul.f32 %v5586_v56, %v4042_v42  ;;  %v2415_v40 = vpop.trf.xlu0 }
 0xa00   : > { %4488 = vst.msk [vmem:[%s6756_s8 + $0x50] sm:$0xff] %vm348_vm0, %v2415_v40 }
 0xa01   : > { %v4090_v59 = vrot.slane %v4064_v11, 2  ;;  %v3069_v3 = vpop.trf.xlu1 }
 0xa02   : > { %4526 = vst.msk [vmem:[%s6756_s8 + $0x70] sm:$0xff] %vm348_vm0, %v3069_v3 }
 0xa03   : > { %v4091_v5 = vsel %vm1289_vm11, %v4089_v30, %v4090_v59  ;;  %v2416_v29 = vpop.trf.xlu0 }
 0xa04   : > { %v5588_v25 = vpop.eup %5587  ;;  %5315 = vmatprep.mubr.msk.f32.mxu1 %vm348_vm0, %v4091_v5  ;;  %4489 = vst.msk [vmem:[%s6756_s8 + $0x58] sm:$0xff] %vm348_vm0, %v2416_v29 }
 0xa05   : > { %v4066_v1 = vmul.f32 %v5588_v25, %v4043_v24  ;;  %v3070_v43 = vpop.trf.xlu1 }
 0xa06   : > { %4527 = vst.msk [vmem:[%s6756_s8 + $0x78] sm:$0xff] %vm348_vm0, %v3070_v43 }
 0xa07   : > { %v5590_v38 = vpop.eup %5589  ;;  %v4092_v8 = vrot.slane %v4066_v1, 2  ;;  %v3724_v31 = vpop.trf.xlu0 }
 0xa08   : > { %v5592_v37 = vpop.eup %5591  ;;  %v4070_v33 = vmul.f32 %v5590_v38, %v4045_v4  ;;  %4560 = vst.msk [vmem:[%s6756_s8 + $0x80] sm:$0xff] %vm348_vm0, %v3724_v31 }
 0xa09   : > { %v4093_v22 = vsel %vm1289_vm11, %v4090_v59, %v4092_v8  ;;  %v4068_v53 = vmul.f32 %v5592_v37, %v4044_v61 }
 0xa0a   : > { %5316 = vmatmul.mubr.msk.f32.vlgmr.msra.gmra.mxu1 %vm348_vm0, %v4093_v22  ;;  %v4096_v55 = vrot.slane %v4070_v33, 2 }
 0xa0b   : > { %v4094_v62 = vrot.slane %v4068_v53, 2  ;;  %v3725_v35 = vpop.trf.xlu0 }
 0xa0c   : > { %4561 = vst.msk [vmem:[%s6756_s8 + $0x88] sm:$0xff] %vm348_vm0, %v3725_v35 }
 0xa0d   : > { %v4095_v10 = vsel %vm1289_vm11, %v4092_v8, %v4094_v62  ;;  %v4097_v12 = vsel %vm1289_vm11, %v4094_v62, %v4096_v55 }
 0xa0e   : > { %5318 = vmatprep.mubr.msk.f32.mxu1 %vm348_vm0, %v4095_v10 }
 0xa0f   : > { %5319 = vmatmul.mubr.msk.f32.gmra.mxu1 %vm348_vm0, %v4097_v12  ;;  %v3726_v41 = vpop.trf.xlu0 }
 0xa10   : > { %4562 = vst.msk [vmem:[%s6756_s8 + $0x90] sm:$0xff] %vm348_vm0, %v3726_v41 }
 0xa13   : > { %v3727_v50 = vpop.trf.xlu0 }
 0xa14   : > { %4563 = vst.msk [vmem:[%s6756_s8 + $0x98] sm:$0xff] %vm348_vm0, %v3727_v50 }
 0xaca   : > { %v5317_v46 = vpop.f32.mrf.mxu1 }
 0xacb   : > { %v4178_v39 = vadd.f32 %v5317_v46, %v4582_v23 }
 0xacc   : > { %v4172_v19 = vpop.f32.mrf.mxu1 }
 0xacd   : > { %v4173_v6 = vadd.f32 %v4582_v23, %v4172_v19 }
 0xacf   : > { %v5320_v0 = vpop.f32.mrf.mxu1  ;;  %4191 = vxpose.xlu1.b32.start [1/4] (short) (narrow) %v4173_v6, 32 }
 0xad0   : > { %v4188_v16 = vadd.f32 %v5320_v0, %v4582_v23 }
 0xad1   : > { %v4182_v9 = vpop.f32.mrf.mxu1 }
 0xad2   : > { %v4183_v47 = vadd.f32 %v4582_v23, %v4182_v9 }
 0xad3   : > { %4192 = vxpose.xlu1.b32.cont [2/4] (short) (narrow) %v4178_v39, 32 }
 0xad7   : > { %4193 = vxpose.xlu1.b32.cont [3/4] (short) (narrow) %v4183_v47, 32 }
 0xadb   : > { %4194 = vxpose.xlu1.b32.end [4/4] (short) (narrow) %v4188_v16, 32 }
 0xb4b   : > { %v4207_v48 = vpop.trf.xlu1 }
 0xb4c   : > { %4587 = vst.msk [vmem:[%s6756_s8 + $0xa0] sm:$0xff] %vm348_vm0, %v4207_v48 }
 0xb4f   : > { %v4208_v2 = vpop.trf.xlu1 }
 0xb50   : > { %4588 = vst.msk [vmem:[%s6756_s8 + $0xa8] sm:$0xff] %vm348_vm0, %v4208_v2 }
 0xb53   : > { %v4209_v60 = vpop.trf.xlu1 }
 0xb54   : > { %4589 = vst.msk [vmem:[%s6756_s8 + $0xb0] sm:$0xff] %vm348_vm0, %v4209_v60 }
 0xb57   : > { %v4210_v18 = vpop.trf.xlu1 }
 0xb58   : > { %4590 = vst.msk [vmem:[%s6756_s8 + $0xb8] sm:$0xff] %vm348_vm0, %v4210_v18 }
 0xb59   : > { %s4596_s14 = sshll.u32 %s5823_s28, 9  ;;  %s4252_s17 = sshll.u32 %s6756_s8, 4  ;;  %s4253_s17 = int_to_ptr.vmem [resolvable:$true] %s4252_s17 }
 0xb5a   : > { %s4241_s16 = scalar_lea.hbm %s6851_s7, %s4596_s14  ;;  %s5755_s22 = smov 512  }
 0xb5b   : > { %p6864_p9 = scmp.ne.s32.totalorder %s6854_s11, 0  ;;  %s5756_s23 = smov 1024  }
 0xb5c   : > { %s5757_s15 = smov 4   ;;  %s5758_s19 = smov 128  }
 0xb5d   : > { %5338 = sst [smem:[#allocation12]] (%p6864_p9), %s5755_s22  ;;  %s5759_s28 = smov 8  }
 0xb5e   : > { %5339 = sst [smem:[#allocation12 + $0x1]] (%p6864_p9), %s5756_s23  ;;  %s5760_s21 = smov 131072  }
 0xb5f   : > { %5340 = sst [smem:[#allocation12 + $0x2]] (%p6864_p9), %s5757_s15  ;;  %s5761_s18 = smov 0  }
 0xb60   : > { %5341 = sst [smem:[#allocation12 + $0x3]] (%p6864_p9), %s5758_s19 }
 0xb61   : > { %5342 = sst [smem:[#allocation12 + $0x4]] (%p6864_p9), %s5758_s19 }
 0xb62   : > { %5343 = sst [smem:[#allocation12 + $0x5]] (%p6864_p9), %s5759_s28 }
 0xb63   : > { %5344 = dma.general (%p6864_p9), %s4253_s17, 3072, %s4241_s16, %s4229_s9, %s5760_s21, [#allocation12], %s5761_s18, 0  }
 0xb64 PF: > { %p5371_p1 = scmp.ge.s32.totalorder %s5743_s27, 2  ;;  %s4280_s29 = sand.u32 1, %s5731_s24  }
 0xb65   : > { %p6865_p3 = scmp.ne.s32.totalorder %s6855_s12, 0  ;;  %s4281_s8 = scalar_lea.sflag [#allocation4], %s4280_s29 }
 0xb67   : > { %p5360_p2 = pnand %p5371_p1, %p6865_p3 }
 0xb69   : > { %p5361_p4 = pneg %p5360_p2 }
 0xb6b   : > { %5726 = dma.done.wait (%p5361_p4), %s4281_s8, 3072  }
 0xb6c   : > { %5728 = vsyncadd (%p5361_p4), %s4281_s8, 4294964224  ;;  %p20_p5 = scmp.ge.s32.totalorder %s5827_s30, 4   ;;  %s6866_s24 = smov %s5735_s25 }
 0xb6d   : > { %s6867_s25 = smov %s5739_s26  ;;  %s6868_s26 = smov %s5838_s10 }
 0xb6e   : > { %s6869_s27 = smov %s5827_s30  ;;  %22 = sbr.rel (!%p20_p5) target bundleno = 6 (0x6), region = 138 }
 0xb73   :  { %4286 = vsyncpa [#allocation3], 1 }
 0xb74   :  { %4288 = vsyncpa [#allocation3 + $0x1], 1 }
 0xb75   :  { %4289 = vsyncpa [#allocation6], 1 }
 0xb76   :  { %4290 = vsyncpa [#allocation9], 1 }
 0xb77   :  { %4291 = vsyncpa [#allocation4], 1 }
 0xb78   :  { %4293 = vsyncpa [#allocation4 + $0x1], 1 }

</bundles_post_ra>
